<compile_context>
chip_gen: v7x
topology: tpu7x:2x2x1
jax: 0.10.0
libtpu: 0.0.40
codegen_flags: <defaults>
</compile_context>

<pallas_src>
import math
from functools import partial

import numpy as np
import jax
import jax.numpy as jnp
from jax.experimental import pallas as pl
from jax.experimental.pallas import tpu as pltpu

EPS = 1e-5  # nn.BatchNorm3d default eps


def _conv_stats_kernel(*refs, k, Wp, L, Cout):
    """Conv3d(k, same, no bias) for one (n, d) output plane + partial BN stats.

    refs = (x_0..x_{k-1}, w, mask, y, sum, ssq) where
      x_kd  : (1, 1, Cin, Hp*Wp) bf16  padded depth-plane d+kd, spatial flat on lanes
      w     : (k, k, Cp, k*Cin)  bf16  per-(kd,kh) weight matrix, cols = kw*Cin+ci,
                                       rows >= Cout are zero padding
      mask  : (1, L) f32               1.0 on lanes that map to valid (h, w)
      y     : (1, 1, Cout, L) bf16     conv output on the padded-flat lane grid
      sum   : (1, 1, Cout, 1) f32      masked per-plane sum
      ssq   : (1, 1, Cout, 1) f32      masked per-plane sum of squares
    """
    x_refs = refs[:k]
    w_ref, mask_ref = refs[k], refs[k + 1]
    y_ref, sum_ref, ssq_ref = refs[k + 2], refs[k + 3], refs[k + 4]

    Cp = w_ref.shape[2]
    acc = jnp.zeros((Cp, L), jnp.float32)
    for kd in range(k):
        for kh in range(k):
            base = kh * Wp
            # k lane-shifted taps of the padded plane, stacked along sublanes.
            taps = [x_refs[kd][0, 0, :, base + kw: base + kw + L]
                    for kw in range(k)]
            xs = jnp.concatenate(taps, axis=0)                 # (k*Cin, L) bf16
            acc = acc + jnp.dot(w_ref[kd, kh], xs,
                                preferred_element_type=jnp.float32)

    res = acc[:Cout]                                           # (Cout, L) f32
    y_ref[0, 0] = res.astype(y_ref.dtype)
    masked = res * mask_ref[...]                               # zero pad lanes
    sum_ref[0, 0] = jnp.sum(masked, axis=-1, keepdims=True)
    ssq_ref[0, 0] = jnp.sum(masked * res, axis=-1, keepdims=True)


def _bn_sigmoid_kernel(y_ref, scale_ref, shift_ref, o_ref):
    """out = sigmoid(y * scale + shift); per-channel (Cout, 1) scale/shift."""
    z = y_ref[0].astype(jnp.float32) * scale_ref[...] + shift_ref[...]
    # exp and the approximate reciprocal both run on the (otherwise idle) EUP.
    o_ref[0] = pl.reciprocal(1.0 + jnp.exp(-z), approx=True)


def _largest_divisor_leq(n, cap):
    for c in range(min(n, cap), 0, -1):
        if n % c == 0:
            return c
    return 1


def vnet_output_transition(x, weight, gamma, beta):
    """x: (N, Cin, D, H, W) f32; weight: (Cout, Cin, 5, 5, 5); returns NCDHW f32."""
    N, Cin, D, H, W = x.shape
    Cout, _, k, _, _ = weight.shape
    pad = k // 2
    Dp, Hp, Wp = D + 2 * pad, H + 2 * pad, W + 2 * pad
    HpWp = Hp * Wp
    # Lanes needed to cover every valid flat output p = h*Wp + w (h < H, w < W).
    L = (H - 1) * Wp + W

    # --- layout plumbing (cheap, ~input-sized; no 125x im2col blow-up) ------
    xp = jnp.pad(x, ((0, 0), (0, 0), (pad, pad), (pad, pad), (pad, pad)))
    xp = xp.transpose(0, 2, 1, 3, 4).reshape(N, Dp, Cin, HpWp)
    xp = xp.astype(jnp.bfloat16)

    # Weights: (Cout, Cin, kd, kh, kw) -> (kd, kh, Cp, kw*Cin); pad the row dim
    # to a sublane multiple so the in-kernel matmul LHS is at least (8, k*Cin).
    Cp = max(8, ((Cout + 7) // 8) * 8)
    wt = weight.transpose(2, 3, 0, 4, 1).reshape(k, k, Cout, k * Cin)
    wk = jnp.zeros((k, k, Cp, k * Cin), jnp.float32).at[:, :, :Cout, :].set(wt)
    wk = wk.astype(jnp.bfloat16)

    # Validity mask over the padded-flat plane: lane p is valid iff p % Wp < W.
    mask = ((jnp.arange(L) % Wp) < W).astype(jnp.float32).reshape(1, L)

    x_specs = [
        pl.BlockSpec((1, 1, Cin, HpWp), (lambda n, d, kk=kd: (n, d + kk, 0, 0)))
        for kd in range(k)
    ]

    y, sum_p, ssq_p = pl.pallas_call(
        partial(_conv_stats_kernel, k=k, Wp=Wp, L=L, Cout=Cout),
        out_shape=(
            jax.ShapeDtypeStruct((N, D, Cout, L), jnp.bfloat16),
            jax.ShapeDtypeStruct((N, D, Cout, 1), jnp.float32),
            jax.ShapeDtypeStruct((N, D, Cout, 1), jnp.float32),
        ),
        grid=(N, D),
        in_specs=x_specs + [
            pl.BlockSpec((k, k, Cp, k * Cin), lambda n, d: (0, 0, 0, 0)),
            pl.BlockSpec((1, L), lambda n, d: (0, 0)),
        ],
        out_specs=(
            pl.BlockSpec((1, 1, Cout, L), lambda n, d: (n, d, 0, 0)),
            pl.BlockSpec((1, 1, Cout, 1), lambda n, d: (n, d, 0, 0)),
            pl.BlockSpec((1, 1, Cout, 1), lambda n, d: (n, d, 0, 0)),
        ),
        compiler_params=pltpu.CompilerParams(
            dimension_semantics=("parallel", "parallel")),
    )(*([xp] * k), wk, mask)

    # BatchNorm3d training-mode stats (biased variance over N, D, H, W),
    # reduced in f32 from the per-plane partial sums.
    m_count = float(N * D * H * W)
    mean = jnp.sum(sum_p, axis=(0, 1)) / m_count          # (Cout, 1)
    mean_sq = jnp.sum(ssq_p, axis=(0, 1)) / m_count       # (Cout, 1)
    var = mean_sq - mean * mean
    inv_std = jax.lax.rsqrt(var + EPS)
    scale = gamma.reshape(Cout, 1) * inv_std
    shift = beta.reshape(Cout, 1) - mean * scale

    td = _largest_divisor_leq(D, 8)
    out_p = pl.pallas_call(
        _bn_sigmoid_kernel,
        out_shape=jax.ShapeDtypeStruct((N, D, Cout, L), jnp.float32),
        grid=(N, D // td),
        in_specs=[
            pl.BlockSpec((1, td, Cout, L), lambda n, t: (n, t, 0, 0)),
            pl.BlockSpec((Cout, 1), lambda n, t: (0, 0)),
            pl.BlockSpec((Cout, 1), lambda n, t: (0, 0)),
        ],
        out_specs=pl.BlockSpec((1, td, Cout, L), lambda n, t: (n, t, 0, 0)),
        compiler_params=pltpu.CompilerParams(
            dimension_semantics=("parallel", "parallel")),
    )(y, scale.astype(jnp.float32), shift.astype(jnp.float32))

    # Crop the padded-flat lane axis back to (H, W) and return NCDHW.
    out = jnp.pad(out_p, ((0, 0), (0, 0), (0, 0), (0, H * Wp - L)))
    out = out.reshape(N, D, Cout, H, Wp)[..., :W]
    return out.transpose(0, 2, 1, 3, 4)


def init_params(key, ch_in, ch_out, k=5):
    # kaiming_uniform_(mode='fan_out', nonlinearity='relu'); L=1 => no rescale.
    fan_out = ch_out * k * k * k
    gain = math.sqrt(2.0)
    bound = gain * math.sqrt(3.0 / fan_out)
    w = jax.random.uniform(key, (ch_out, ch_in, k, k, k), jnp.float32,
                           minval=-bound, maxval=bound)
    gamma = jnp.ones((ch_out,), jnp.float32)   # BatchNorm3d default affine init
    beta = jnp.zeros((ch_out,), jnp.float32)
    return w, gamma, beta


if __name__ == "__main__":
    key = jax.random.PRNGKey(0)
    kx, kw_key = jax.random.split(key)

    N, Cin, Cout, D, H, W = 2, 4, 2, 8, 8, 8   # ch = (4, 2)
    x = jax.random.normal(kx, (N, Cin, D, H, W), jnp.float32)
    w, gamma, beta = init_params(kw_key, Cin, Cout, k=5)

    fwd = jax.jit(vnet_output_transition)
    out = jax.block_until_ready(fwd(x, w, gamma, beta))
    assert out.shape == (N, Cout, D, H, W)

    # Pure-JAX f32 reference (independent conv path) to verify semantics.
    ref_conv = jax.lax.conv_general_dilated(
        x, w, window_strides=(1, 1, 1), padding=((2, 2), (2, 2), (2, 2)),
        dimension_numbers=("NCDHW", "OIDHW", "NCDHW"))
    m = ref_conv.mean(axis=(0, 2, 3, 4), keepdims=True)
    v = ref_conv.var(axis=(0, 2, 3, 4), keepdims=True)
    ref = jax.nn.sigmoid((ref_conv - m) / jnp.sqrt(v + EPS)
                         * gamma.reshape(1, -1, 1, 1, 1)
                         + beta.reshape(1, -1, 1, 1, 1))
    # bf16 conv stream + approx reciprocal => loosened (still bug-catching) tol.
    np.testing.assert_allclose(np.asarray(out), np.asarray(ref),
                               rtol=2e-2, atol=2e-2)
    print("KERNEL_OK")
</pallas_src>

<mosaic_0001>
module attributes {stable_mosaic.version = 11 : i64} {
  func.func @_conv_stats_kernel(%arg0: i32, %arg1: i32, %arg2: memref<1x1x4x144xbf16, #tpu.memory_space<vmem>>, %arg3: memref<1x1x4x144xbf16, #tpu.memory_space<vmem>>, %arg4: memref<1x1x4x144xbf16, #tpu.memory_space<vmem>>, %arg5: memref<1x1x4x144xbf16, #tpu.memory_space<vmem>>, %arg6: memref<1x1x4x144xbf16, #tpu.memory_space<vmem>>, %arg7: memref<5x5x8x20xbf16, #tpu.memory_space<vmem>>, %arg8: memref<1x92xf32, #tpu.memory_space<vmem>>, %arg9: memref<1x1x2x92xbf16, #tpu.memory_space<vmem>>, %arg10: memref<1x1x2x1xf32, #tpu.memory_space<vmem>>, %arg11: memref<1x1x2x1xf32, #tpu.memory_space<vmem>>) attributes {dimension_semantics = [#tpu.dimension_semantics<parallel>, #tpu.dimension_semantics<parallel>], iteration_bounds = array<i64: 2, 8>, scalar_prefetch = 0 : i64, scratch_operands = 0 : i64, tpu.core_type = #tpu.core_type<tc>, window_params = [{transform_indices = @transform_0, window_bounds = array<i64: 1, 1, 4, 144>}, {transform_indices = @transform_1, window_bounds = array<i64: 1, 1, 4, 144>}, {transform_indices = @transform_2, window_bounds = array<i64: 1, 1, 4, 144>}, {transform_indices = @transform_3, window_bounds = array<i64: 1, 1, 4, 144>}, {transform_indices = @transform_4, window_bounds = array<i64: 1, 1, 4, 144>}, {pipeline_mode = #tpu.pipeline_mode<synchronous>, transform_indices = @transform_5, window_bounds = array<i64: 5, 5, 8, 20>}, {pipeline_mode = #tpu.pipeline_mode<synchronous>, transform_indices = @transform_6, window_bounds = array<i64: 1, 92>}, {transform_indices = @transform_7, window_bounds = array<i64: 1, 1, 2, 92>}, {transform_indices = @transform_8, window_bounds = array<i64: 1, 1, 2, 1>}, {transform_indices = @transform_9, window_bounds = array<i64: 1, 1, 2, 1>}]} {
    %cst = arith.constant 0.000000e+00 : f32
    %0 = vector.broadcast %cst : f32 to vector<8x92xf32>
    %c0 = arith.constant 0 : index
    %c0_0 = arith.constant 0 : index
    %c0_1 = arith.constant 0 : index
    %c0_2 = arith.constant 0 : index
    %1 = vector.load %arg2[%c0, %c0_0, %c0_1, %c0_2] : memref<1x1x4x144xbf16, #tpu.memory_space<vmem>>, vector<1x1x4x92xbf16>
    %2 = vector.shape_cast %1 : vector<1x1x4x92xbf16> to vector<4x92xbf16>
    %c0_3 = arith.constant 0 : index
    %c0_4 = arith.constant 0 : index
    %c0_5 = arith.constant 0 : index
    %c1 = arith.constant 1 : index
    %3 = vector.load %arg2[%c0_3, %c0_4, %c0_5, %c1] : memref<1x1x4x144xbf16, #tpu.memory_space<vmem>>, vector<1x1x4x92xbf16>
    %4 = vector.shape_cast %3 : vector<1x1x4x92xbf16> to vector<4x92xbf16>
    %c0_6 = arith.constant 0 : index
    %c0_7 = arith.constant 0 : index
    %c0_8 = arith.constant 0 : index
    %c2 = arith.constant 2 : index
    %5 = vector.load %arg2[%c0_6, %c0_7, %c0_8, %c2] : memref<1x1x4x144xbf16, #tpu.memory_space<vmem>>, vector<1x1x4x92xbf16>
    %6 = vector.shape_cast %5 : vector<1x1x4x92xbf16> to vector<4x92xbf16>
    %c0_9 = arith.constant 0 : index
    %c0_10 = arith.constant 0 : index
    %c0_11 = arith.constant 0 : index
    %c3 = arith.constant 3 : index
    %7 = vector.load %arg2[%c0_9, %c0_10, %c0_11, %c3] : memref<1x1x4x144xbf16, #tpu.memory_space<vmem>>, vector<1x1x4x92xbf16>
    %8 = vector.shape_cast %7 : vector<1x1x4x92xbf16> to vector<4x92xbf16>
    %c0_12 = arith.constant 0 : index
    %c0_13 = arith.constant 0 : index
    %c0_14 = arith.constant 0 : index
    %c4 = arith.constant 4 : index
    %9 = vector.load %arg2[%c0_12, %c0_13, %c0_14, %c4] : memref<1x1x4x144xbf16, #tpu.memory_space<vmem>>, vector<1x1x4x92xbf16>
    %10 = vector.shape_cast %9 : vector<1x1x4x92xbf16> to vector<4x92xbf16>
    %11 = tpu.concatenate %2, %4, %6, %8, %10 in 0 : vector<4x92xbf16>, vector<4x92xbf16>, vector<4x92xbf16>, vector<4x92xbf16>, vector<4x92xbf16> -> vector<20x92xbf16>
    %c0_15 = arith.constant 0 : index
    %c0_16 = arith.constant 0 : index
    %c0_17 = arith.constant 0 : index
    %c0_18 = arith.constant 0 : index
    %12 = vector.load %arg7[%c0_15, %c0_16, %c0_17, %c0_18] : memref<5x5x8x20xbf16, #tpu.memory_space<vmem>>, vector<1x1x8x20xbf16>
    %13 = vector.shape_cast %12 : vector<1x1x8x20xbf16> to vector<8x20xbf16>
    %cst_19 = arith.constant dense<0.000000e+00> : vector<8x92xf32>
    %14 = tpu.matmul %13, %11, %cst_19 {dimension_numbers = #tpu.dot_dimension_numbers<[1], [0], [0], [1], [0, 0, 1, 1], [], []>} : vector<8x20xbf16>, vector<20x92xbf16>, vector<8x92xf32> -> vector<8x92xf32>
    %15 = arith.addf %0, %14 : vector<8x92xf32>
    %c0_20 = arith.constant 0 : index
    %c0_21 = arith.constant 0 : index
    %c0_22 = arith.constant 0 : index
    %c12 = arith.constant 12 : index
    %16 = vector.load %arg2[%c0_20, %c0_21, %c0_22, %c12] : memref<1x1x4x144xbf16, #tpu.memory_space<vmem>>, vector<1x1x4x92xbf16>
    %17 = vector.shape_cast %16 : vector<1x1x4x92xbf16> to vector<4x92xbf16>
    %c0_23 = arith.constant 0 : index
    %c0_24 = arith.constant 0 : index
    %c0_25 = arith.constant 0 : index
    %c13 = arith.constant 13 : index
    %18 = vector.load %arg2[%c0_23, %c0_24, %c0_25, %c13] : memref<1x1x4x144xbf16, #tpu.memory_space<vmem>>, vector<1x1x4x92xbf16>
    %19 = vector.shape_cast %18 : vector<1x1x4x92xbf16> to vector<4x92xbf16>
    %c0_26 = arith.constant 0 : index
    %c0_27 = arith.constant 0 : index
    %c0_28 = arith.constant 0 : index
    %c14 = arith.constant 14 : index
    %20 = vector.load %arg2[%c0_26, %c0_27, %c0_28, %c14] : memref<1x1x4x144xbf16, #tpu.memory_space<vmem>>, vector<1x1x4x92xbf16>
    %21 = vector.shape_cast %20 : vector<1x1x4x92xbf16> to vector<4x92xbf16>
    %c0_29 = arith.constant 0 : index
    %c0_30 = arith.constant 0 : index
    %c0_31 = arith.constant 0 : index
    %c15 = arith.constant 15 : index
    %22 = vector.load %arg2[%c0_29, %c0_30, %c0_31, %c15] : memref<1x1x4x144xbf16, #tpu.memory_space<vmem>>, vector<1x1x4x92xbf16>
    %23 = vector.shape_cast %22 : vector<1x1x4x92xbf16> to vector<4x92xbf16>
    %c0_32 = arith.constant 0 : index
    %c0_33 = arith.constant 0 : index
    %c0_34 = arith.constant 0 : index
    %c16 = arith.constant 16 : index
    %24 = vector.load %arg2[%c0_32, %c0_33, %c0_34, %c16] : memref<1x1x4x144xbf16, #tpu.memory_space<vmem>>, vector<1x1x4x92xbf16>
    %25 = vector.shape_cast %24 : vector<1x1x4x92xbf16> to vector<4x92xbf16>
    %26 = tpu.concatenate %17, %19, %21, %23, %25 in 0 : vector<4x92xbf16>, vector<4x92xbf16>, vector<4x92xbf16>, vector<4x92xbf16>, vector<4x92xbf16> -> vector<20x92xbf16>
    %c0_35 = arith.constant 0 : index
    %c1_36 = arith.constant 1 : index
    %c0_37 = arith.constant 0 : index
    %c0_38 = arith.constant 0 : index
    %27 = vector.load %arg7[%c0_35, %c1_36, %c0_37, %c0_38] : memref<5x5x8x20xbf16, #tpu.memory_space<vmem>>, vector<1x1x8x20xbf16>
    %28 = vector.shape_cast %27 : vector<1x1x8x20xbf16> to vector<8x20xbf16>
    %cst_39 = arith.constant dense<0.000000e+00> : vector<8x92xf32>
    %29 = tpu.matmul %28, %26, %cst_39 {dimension_numbers = #tpu.dot_dimension_numbers<[1], [0], [0], [1], [0, 0, 1, 1], [], []>} : vector<8x20xbf16>, vector<20x92xbf16>, vector<8x92xf32> -> vector<8x92xf32>
    %30 = arith.addf %15, %29 : vector<8x92xf32>
    %c0_40 = arith.constant 0 : index
    %c0_41 = arith.constant 0 : index
    %c0_42 = arith.constant 0 : index
    %c24 = arith.constant 24 : index
    %31 = vector.load %arg2[%c0_40, %c0_41, %c0_42, %c24] : memref<1x1x4x144xbf16, #tpu.memory_space<vmem>>, vector<1x1x4x92xbf16>
    %32 = vector.shape_cast %31 : vector<1x1x4x92xbf16> to vector<4x92xbf16>
    %c0_43 = arith.constant 0 : index
    %c0_44 = arith.constant 0 : index
    %c0_45 = arith.constant 0 : index
    %c25 = arith.constant 25 : index
    %33 = vector.load %arg2[%c0_43, %c0_44, %c0_45, %c25] : memref<1x1x4x144xbf16, #tpu.memory_space<vmem>>, vector<1x1x4x92xbf16>
    %34 = vector.shape_cast %33 : vector<1x1x4x92xbf16> to vector<4x92xbf16>
    %c0_46 = arith.constant 0 : index
    %c0_47 = arith.constant 0 : index
    %c0_48 = arith.constant 0 : index
    %c26 = arith.constant 26 : index
    %35 = vector.load %arg2[%c0_46, %c0_47, %c0_48, %c26] : memref<1x1x4x144xbf16, #tpu.memory_space<vmem>>, vector<1x1x4x92xbf16>
    %36 = vector.shape_cast %35 : vector<1x1x4x92xbf16> to vector<4x92xbf16>
    %c0_49 = arith.constant 0 : index
    %c0_50 = arith.constant 0 : index
    %c0_51 = arith.constant 0 : index
    %c27 = arith.constant 27 : index
    %37 = vector.load %arg2[%c0_49, %c0_50, %c0_51, %c27] : memref<1x1x4x144xbf16, #tpu.memory_space<vmem>>, vector<1x1x4x92xbf16>
    %38 = vector.shape_cast %37 : vector<1x1x4x92xbf16> to vector<4x92xbf16>
    %c0_52 = arith.constant 0 : index
    %c0_53 = arith.constant 0 : index
    %c0_54 = arith.constant 0 : index
    %c28 = arith.constant 28 : index
    %39 = vector.load %arg2[%c0_52, %c0_53, %c0_54, %c28] : memref<1x1x4x144xbf16, #tpu.memory_space<vmem>>, vector<1x1x4x92xbf16>
    %40 = vector.shape_cast %39 : vector<1x1x4x92xbf16> to vector<4x92xbf16>
    %41 = tpu.concatenate %32, %34, %36, %38, %40 in 0 : vector<4x92xbf16>, vector<4x92xbf16>, vector<4x92xbf16>, vector<4x92xbf16>, vector<4x92xbf16> -> vector<20x92xbf16>
    %c0_55 = arith.constant 0 : index
    %c2_56 = arith.constant 2 : index
    %c0_57 = arith.constant 0 : index
    %c0_58 = arith.constant 0 : index
    %42 = vector.load %arg7[%c0_55, %c2_56, %c0_57, %c0_58] : memref<5x5x8x20xbf16, #tpu.memory_space<vmem>>, vector<1x1x8x20xbf16>
    %43 = vector.shape_cast %42 : vector<1x1x8x20xbf16> to vector<8x20xbf16>
    %cst_59 = arith.constant dense<0.000000e+00> : vector<8x92xf32>
    %44 = tpu.matmul %43, %41, %cst_59 {dimension_numbers = #tpu.dot_dimension_numbers<[1], [0], [0], [1], [0, 0, 1, 1], [], []>} : vector<8x20xbf16>, vector<20x92xbf16>, vector<8x92xf32> -> vector<8x92xf32>
    %45 = arith.addf %30, %44 : vector<8x92xf32>
    %c0_60 = arith.constant 0 : index
    %c0_61 = arith.constant 0 : index
    %c0_62 = arith.constant 0 : index
    %c36 = arith.constant 36 : index
    %46 = vector.load %arg2[%c0_60, %c0_61, %c0_62, %c36] : memref<1x1x4x144xbf16, #tpu.memory_space<vmem>>, vector<1x1x4x92xbf16>
    %47 = vector.shape_cast %46 : vector<1x1x4x92xbf16> to vector<4x92xbf16>
    %c0_63 = arith.constant 0 : index
    %c0_64 = arith.constant 0 : index
    %c0_65 = arith.constant 0 : index
    %c37 = arith.constant 37 : index
    %48 = vector.load %arg2[%c0_63, %c0_64, %c0_65, %c37] : memref<1x1x4x144xbf16, #tpu.memory_space<vmem>>, vector<1x1x4x92xbf16>
    %49 = vector.shape_cast %48 : vector<1x1x4x92xbf16> to vector<4x92xbf16>
    %c0_66 = arith.constant 0 : index
    %c0_67 = arith.constant 0 : index
    %c0_68 = arith.constant 0 : index
    %c38 = arith.constant 38 : index
    %50 = vector.load %arg2[%c0_66, %c0_67, %c0_68, %c38] : memref<1x1x4x144xbf16, #tpu.memory_space<vmem>>, vector<1x1x4x92xbf16>
    %51 = vector.shape_cast %50 : vector<1x1x4x92xbf16> to vector<4x92xbf16>
    %c0_69 = arith.constant 0 : index
    %c0_70 = arith.constant 0 : index
    %c0_71 = arith.constant 0 : index
    %c39 = arith.constant 39 : index
    %52 = vector.load %arg2[%c0_69, %c0_70, %c0_71, %c39] : memref<1x1x4x144xbf16, #tpu.memory_space<vmem>>, vector<1x1x4x92xbf16>
    %53 = vector.shape_cast %52 : vector<1x1x4x92xbf16> to vector<4x92xbf16>
    %c0_72 = arith.constant 0 : index
    %c0_73 = arith.constant 0 : index
    %c0_74 = arith.constant 0 : index
    %c40 = arith.constant 40 : index
    %54 = vector.load %arg2[%c0_72, %c0_73, %c0_74, %c40] : memref<1x1x4x144xbf16, #tpu.memory_space<vmem>>, vector<1x1x4x92xbf16>
    %55 = vector.shape_cast %54 : vector<1x1x4x92xbf16> to vector<4x92xbf16>
    %56 = tpu.concatenate %47, %49, %51, %53, %55 in 0 : vector<4x92xbf16>, vector<4x92xbf16>, vector<4x92xbf16>, vector<4x92xbf16>, vector<4x92xbf16> -> vector<20x92xbf16>
    %c0_75 = arith.constant 0 : index
    %c3_76 = arith.constant 3 : index
    %c0_77 = arith.constant 0 : index
    %c0_78 = arith.constant 0 : index
    %57 = vector.load %arg7[%c0_75, %c3_76, %c0_77, %c0_78] : memref<5x5x8x20xbf16, #tpu.memory_space<vmem>>, vector<1x1x8x20xbf16>
    %58 = vector.shape_cast %57 : vector<1x1x8x20xbf16> to vector<8x20xbf16>
    %cst_79 = arith.constant dense<0.000000e+00> : vector<8x92xf32>
    %59 = tpu.matmul %58, %56, %cst_79 {dimension_numbers = #tpu.dot_dimension_numbers<[1], [0], [0], [1], [0, 0, 1, 1], [], []>} : vector<8x20xbf16>, vector<20x92xbf16>, vector<8x92xf32> -> vector<8x92xf32>
    %60 = arith.addf %45, %59 : vector<8x92xf32>
    %c0_80 = arith.constant 0 : index
    %c0_81 = arith.constant 0 : index
    %c0_82 = arith.constant 0 : index
    %c48 = arith.constant 48 : index
    %61 = vector.load %arg2[%c0_80, %c0_81, %c0_82, %c48] : memref<1x1x4x144xbf16, #tpu.memory_space<vmem>>, vector<1x1x4x92xbf16>
    %62 = vector.shape_cast %61 : vector<1x1x4x92xbf16> to vector<4x92xbf16>
    %c0_83 = arith.constant 0 : index
    %c0_84 = arith.constant 0 : index
    %c0_85 = arith.constant 0 : index
    %c49 = arith.constant 49 : index
    %63 = vector.load %arg2[%c0_83, %c0_84, %c0_85, %c49] : memref<1x1x4x144xbf16, #tpu.memory_space<vmem>>, vector<1x1x4x92xbf16>
    %64 = vector.shape_cast %63 : vector<1x1x4x92xbf16> to vector<4x92xbf16>
    %c0_86 = arith.constant 0 : index
    %c0_87 = arith.constant 0 : index
    %c0_88 = arith.constant 0 : index
    %c50 = arith.constant 50 : index
    %65 = vector.load %arg2[%c0_86, %c0_87, %c0_88, %c50] : memref<1x1x4x144xbf16, #tpu.memory_space<vmem>>, vector<1x1x4x92xbf16>
    %66 = vector.shape_cast %65 : vector<1x1x4x92xbf16> to vector<4x92xbf16>
    %c0_89 = arith.constant 0 : index
    %c0_90 = arith.constant 0 : index
    %c0_91 = arith.constant 0 : index
    %c51 = arith.constant 51 : index
    %67 = vector.load %arg2[%c0_89, %c0_90, %c0_91, %c51] : memref<1x1x4x144xbf16, #tpu.memory_space<vmem>>, vector<1x1x4x92xbf16>
    %68 = vector.shape_cast %67 : vector<1x1x4x92xbf16> to vector<4x92xbf16>
    %c0_92 = arith.constant 0 : index
    %c0_93 = arith.constant 0 : index
    %c0_94 = arith.constant 0 : index
    %c52 = arith.constant 52 : index
    %69 = vector.load %arg2[%c0_92, %c0_93, %c0_94, %c52] : memref<1x1x4x144xbf16, #tpu.memory_space<vmem>>, vector<1x1x4x92xbf16>
    %70 = vector.shape_cast %69 : vector<1x1x4x92xbf16> to vector<4x92xbf16>
    %71 = tpu.concatenate %62, %64, %66, %68, %70 in 0 : vector<4x92xbf16>, vector<4x92xbf16>, vector<4x92xbf16>, vector<4x92xbf16>, vector<4x92xbf16> -> vector<20x92xbf16>
    %c0_95 = arith.constant 0 : index
    %c4_96 = arith.constant 4 : index
    %c0_97 = arith.constant 0 : index
    %c0_98 = arith.constant 0 : index
    %72 = vector.load %arg7[%c0_95, %c4_96, %c0_97, %c0_98] : memref<5x5x8x20xbf16, #tpu.memory_space<vmem>>, vector<1x1x8x20xbf16>
    %73 = vector.shape_cast %72 : vector<1x1x8x20xbf16> to vector<8x20xbf16>
    %cst_99 = arith.constant dense<0.000000e+00> : vector<8x92xf32>
    %74 = tpu.matmul %73, %71, %cst_99 {dimension_numbers = #tpu.dot_dimension_numbers<[1], [0], [0], [1], [0, 0, 1, 1], [], []>} : vector<8x20xbf16>, vector<20x92xbf16>, vector<8x92xf32> -> vector<8x92xf32>
    %75 = arith.addf %60, %74 : vector<8x92xf32>
    %c0_100 = arith.constant 0 : index
    %c0_101 = arith.constant 0 : index
    %c0_102 = arith.constant 0 : index
    %c0_103 = arith.constant 0 : index
    %76 = vector.load %arg3[%c0_100, %c0_101, %c0_102, %c0_103] : memref<1x1x4x144xbf16, #tpu.memory_space<vmem>>, vector<1x1x4x92xbf16>
    %77 = vector.shape_cast %76 : vector<1x1x4x92xbf16> to vector<4x92xbf16>
    %c0_104 = arith.constant 0 : index
    %c0_105 = arith.constant 0 : index
    %c0_106 = arith.constant 0 : index
    %c1_107 = arith.constant 1 : index
    %78 = vector.load %arg3[%c0_104, %c0_105, %c0_106, %c1_107] : memref<1x1x4x144xbf16, #tpu.memory_space<vmem>>, vector<1x1x4x92xbf16>
    %79 = vector.shape_cast %78 : vector<1x1x4x92xbf16> to vector<4x92xbf16>
    %c0_108 = arith.constant 0 : index
    %c0_109 = arith.constant 0 : index
    %c0_110 = arith.constant 0 : index
    %c2_111 = arith.constant 2 : index
    %80 = vector.load %arg3[%c0_108, %c0_109, %c0_110, %c2_111] : memref<1x1x4x144xbf16, #tpu.memory_space<vmem>>, vector<1x1x4x92xbf16>
    %81 = vector.shape_cast %80 : vector<1x1x4x92xbf16> to vector<4x92xbf16>
    %c0_112 = arith.constant 0 : index
    %c0_113 = arith.constant 0 : index
    %c0_114 = arith.constant 0 : index
    %c3_115 = arith.constant 3 : index
    %82 = vector.load %arg3[%c0_112, %c0_113, %c0_114, %c3_115] : memref<1x1x4x144xbf16, #tpu.memory_space<vmem>>, vector<1x1x4x92xbf16>
    %83 = vector.shape_cast %82 : vector<1x1x4x92xbf16> to vector<4x92xbf16>
    %c0_116 = arith.constant 0 : index
    %c0_117 = arith.constant 0 : index
    %c0_118 = arith.constant 0 : index
    %c4_119 = arith.constant 4 : index
    %84 = vector.load %arg3[%c0_116, %c0_117, %c0_118, %c4_119] : memref<1x1x4x144xbf16, #tpu.memory_space<vmem>>, vector<1x1x4x92xbf16>
    %85 = vector.shape_cast %84 : vector<1x1x4x92xbf16> to vector<4x92xbf16>
    %86 = tpu.concatenate %77, %79, %81, %83, %85 in 0 : vector<4x92xbf16>, vector<4x92xbf16>, vector<4x92xbf16>, vector<4x92xbf16>, vector<4x92xbf16> -> vector<20x92xbf16>
    %c1_120 = arith.constant 1 : index
    %c0_121 = arith.constant 0 : index
    %c0_122 = arith.constant 0 : index
    %c0_123 = arith.constant 0 : index
    %87 = vector.load %arg7[%c1_120, %c0_121, %c0_122, %c0_123] : memref<5x5x8x20xbf16, #tpu.memory_space<vmem>>, vector<1x1x8x20xbf16>
    %88 = vector.shape_cast %87 : vector<1x1x8x20xbf16> to vector<8x20xbf16>
    %cst_124 = arith.constant dense<0.000000e+00> : vector<8x92xf32>
    %89 = tpu.matmul %88, %86, %cst_124 {dimension_numbers = #tpu.dot_dimension_numbers<[1], [0], [0], [1], [0, 0, 1, 1], [], []>} : vector<8x20xbf16>, vector<20x92xbf16>, vector<8x92xf32> -> vector<8x92xf32>
    %90 = arith.addf %75, %89 : vector<8x92xf32>
    %c0_125 = arith.constant 0 : index
    %c0_126 = arith.constant 0 : index
    %c0_127 = arith.constant 0 : index
    %c12_128 = arith.constant 12 : index
    %91 = vector.load %arg3[%c0_125, %c0_126, %c0_127, %c12_128] : memref<1x1x4x144xbf16, #tpu.memory_space<vmem>>, vector<1x1x4x92xbf16>
    %92 = vector.shape_cast %91 : vector<1x1x4x92xbf16> to vector<4x92xbf16>
    %c0_129 = arith.constant 0 : index
    %c0_130 = arith.constant 0 : index
    %c0_131 = arith.constant 0 : index
    %c13_132 = arith.constant 13 : index
    %93 = vector.load %arg3[%c0_129, %c0_130, %c0_131, %c13_132] : memref<1x1x4x144xbf16, #tpu.memory_space<vmem>>, vector<1x1x4x92xbf16>
    %94 = vector.shape_cast %93 : vector<1x1x4x92xbf16> to vector<4x92xbf16>
    %c0_133 = arith.constant 0 : index
    %c0_134 = arith.constant 0 : index
    %c0_135 = arith.constant 0 : index
    %c14_136 = arith.constant 14 : index
    %95 = vector.load %arg3[%c0_133, %c0_134, %c0_135, %c14_136] : memref<1x1x4x144xbf16, #tpu.memory_space<vmem>>, vector<1x1x4x92xbf16>
    %96 = vector.shape_cast %95 : vector<1x1x4x92xbf16> to vector<4x92xbf16>
    %c0_137 = arith.constant 0 : index
    %c0_138 = arith.constant 0 : index
    %c0_139 = arith.constant 0 : index
    %c15_140 = arith.constant 15 : index
    %97 = vector.load %arg3[%c0_137, %c0_138, %c0_139, %c15_140] : memref<1x1x4x144xbf16, #tpu.memory_space<vmem>>, vector<1x1x4x92xbf16>
    %98 = vector.shape_cast %97 : vector<1x1x4x92xbf16> to vector<4x92xbf16>
    %c0_141 = arith.constant 0 : index
    %c0_142 = arith.constant 0 : index
    %c0_143 = arith.constant 0 : index
    %c16_144 = arith.constant 16 : index
    %99 = vector.load %arg3[%c0_141, %c0_142, %c0_143, %c16_144] : memref<1x1x4x144xbf16, #tpu.memory_space<vmem>>, vector<1x1x4x92xbf16>
    %100 = vector.shape_cast %99 : vector<1x1x4x92xbf16> to vector<4x92xbf16>
    %101 = tpu.concatenate %92, %94, %96, %98, %100 in 0 : vector<4x92xbf16>, vector<4x92xbf16>, vector<4x92xbf16>, vector<4x92xbf16>, vector<4x92xbf16> -> vector<20x92xbf16>
    %c1_145 = arith.constant 1 : index
    %c1_146 = arith.constant 1 : index
    %c0_147 = arith.constant 0 : index
    %c0_148 = arith.constant 0 : index
    %102 = vector.load %arg7[%c1_145, %c1_146, %c0_147, %c0_148] : memref<5x5x8x20xbf16, #tpu.memory_space<vmem>>, vector<1x1x8x20xbf16>
    %103 = vector.shape_cast %102 : vector<1x1x8x20xbf16> to vector<8x20xbf16>
    %cst_149 = arith.constant dense<0.000000e+00> : vector<8x92xf32>
    %104 = tpu.matmul %103, %101, %cst_149 {dimension_numbers = #tpu.dot_dimension_numbers<[1], [0], [0], [1], [0, 0, 1, 1], [], []>} : vector<8x20xbf16>, vector<20x92xbf16>, vector<8x92xf32> -> vector<8x92xf32>
    %105 = arith.addf %90, %104 : vector<8x92xf32>
    %c0_150 = arith.constant 0 : index
    %c0_151 = arith.constant 0 : index
    %c0_152 = arith.constant 0 : index
    %c24_153 = arith.constant 24 : index
    %106 = vector.load %arg3[%c0_150, %c0_151, %c0_152, %c24_153] : memref<1x1x4x144xbf16, #tpu.memory_space<vmem>>, vector<1x1x4x92xbf16>
    %107 = vector.shape_cast %106 : vector<1x1x4x92xbf16> to vector<4x92xbf16>
    %c0_154 = arith.constant 0 : index
    %c0_155 = arith.constant 0 : index
    %c0_156 = arith.constant 0 : index
    %c25_157 = arith.constant 25 : index
    %108 = vector.load %arg3[%c0_154, %c0_155, %c0_156, %c25_157] : memref<1x1x4x144xbf16, #tpu.memory_space<vmem>>, vector<1x1x4x92xbf16>
    %109 = vector.shape_cast %108 : vector<1x1x4x92xbf16> to vector<4x92xbf16>
    %c0_158 = arith.constant 0 : index
    %c0_159 = arith.constant 0 : index
    %c0_160 = arith.constant 0 : index
    %c26_161 = arith.constant 26 : index
    %110 = vector.load %arg3[%c0_158, %c0_159, %c0_160, %c26_161] : memref<1x1x4x144xbf16, #tpu.memory_space<vmem>>, vector<1x1x4x92xbf16>
    %111 = vector.shape_cast %110 : vector<1x1x4x92xbf16> to vector<4x92xbf16>
    %c0_162 = arith.constant 0 : index
    %c0_163 = arith.constant 0 : index
    %c0_164 = arith.constant 0 : index
    %c27_165 = arith.constant 27 : index
    %112 = vector.load %arg3[%c0_162, %c0_163, %c0_164, %c27_165] : memref<1x1x4x144xbf16, #tpu.memory_space<vmem>>, vector<1x1x4x92xbf16>
    %113 = vector.shape_cast %112 : vector<1x1x4x92xbf16> to vector<4x92xbf16>
    %c0_166 = arith.constant 0 : index
    %c0_167 = arith.constant 0 : index
    %c0_168 = arith.constant 0 : index
    %c28_169 = arith.constant 28 : index
    %114 = vector.load %arg3[%c0_166, %c0_167, %c0_168, %c28_169] : memref<1x1x4x144xbf16, #tpu.memory_space<vmem>>, vector<1x1x4x92xbf16>
    %115 = vector.shape_cast %114 : vector<1x1x4x92xbf16> to vector<4x92xbf16>
    %116 = tpu.concatenate %107, %109, %111, %113, %115 in 0 : vector<4x92xbf16>, vector<4x92xbf16>, vector<4x92xbf16>, vector<4x92xbf16>, vector<4x92xbf16> -> vector<20x92xbf16>
    %c1_170 = arith.constant 1 : index
    %c2_171 = arith.constant 2 : index
    %c0_172 = arith.constant 0 : index
    %c0_173 = arith.constant 0 : index
    %117 = vector.load %arg7[%c1_170, %c2_171, %c0_172, %c0_173] : memref<5x5x8x20xbf16, #tpu.memory_space<vmem>>, vector<1x1x8x20xbf16>
    %118 = vector.shape_cast %117 : vector<1x1x8x20xbf16> to vector<8x20xbf16>
    %cst_174 = arith.constant dense<0.000000e+00> : vector<8x92xf32>
    %119 = tpu.matmul %118, %116, %cst_174 {dimension_numbers = #tpu.dot_dimension_numbers<[1], [0], [0], [1], [0, 0, 1, 1], [], []>} : vector<8x20xbf16>, vector<20x92xbf16>, vector<8x92xf32> -> vector<8x92xf32>
    %120 = arith.addf %105, %119 : vector<8x92xf32>
    %c0_175 = arith.constant 0 : index
    %c0_176 = arith.constant 0 : index
    %c0_177 = arith.constant 0 : index
    %c36_178 = arith.constant 36 : index
    %121 = vector.load %arg3[%c0_175, %c0_176, %c0_177, %c36_178] : memref<1x1x4x144xbf16, #tpu.memory_space<vmem>>, vector<1x1x4x92xbf16>
    %122 = vector.shape_cast %121 : vector<1x1x4x92xbf16> to vector<4x92xbf16>
    %c0_179 = arith.constant 0 : index
    %c0_180 = arith.constant 0 : index
    %c0_181 = arith.constant 0 : index
    %c37_182 = arith.constant 37 : index
    %123 = vector.load %arg3[%c0_179, %c0_180, %c0_181, %c37_182] : memref<1x1x4x144xbf16, #tpu.memory_space<vmem>>, vector<1x1x4x92xbf16>
    %124 = vector.shape_cast %123 : vector<1x1x4x92xbf16> to vector<4x92xbf16>
    %c0_183 = arith.constant 0 : index
    %c0_184 = arith.constant 0 : index
    %c0_185 = arith.constant 0 : index
    %c38_186 = arith.constant 38 : index
    %125 = vector.load %arg3[%c0_183, %c0_184, %c0_185, %c38_186] : memref<1x1x4x144xbf16, #tpu.memory_space<vmem>>, vector<1x1x4x92xbf16>
    %126 = vector.shape_cast %125 : vector<1x1x4x92xbf16> to vector<4x92xbf16>
    %c0_187 = arith.constant 0 : index
    %c0_188 = arith.constant 0 : index
    %c0_189 = arith.constant 0 : index
    %c39_190 = arith.constant 39 : index
    %127 = vector.load %arg3[%c0_187, %c0_188, %c0_189, %c39_190] : memref<1x1x4x144xbf16, #tpu.memory_space<vmem>>, vector<1x1x4x92xbf16>
    %128 = vector.shape_cast %127 : vector<1x1x4x92xbf16> to vector<4x92xbf16>
    %c0_191 = arith.constant 0 : index
    %c0_192 = arith.constant 0 : index
    %c0_193 = arith.constant 0 : index
    %c40_194 = arith.constant 40 : index
    %129 = vector.load %arg3[%c0_191, %c0_192, %c0_193, %c40_194] : memref<1x1x4x144xbf16, #tpu.memory_space<vmem>>, vector<1x1x4x92xbf16>
    %130 = vector.shape_cast %129 : vector<1x1x4x92xbf16> to vector<4x92xbf16>
    %131 = tpu.concatenate %122, %124, %126, %128, %130 in 0 : vector<4x92xbf16>, vector<4x92xbf16>, vector<4x92xbf16>, vector<4x92xbf16>, vector<4x92xbf16> -> vector<20x92xbf16>
    %c1_195 = arith.constant 1 : index
    %c3_196 = arith.constant 3 : index
    %c0_197 = arith.constant 0 : index
    %c0_198 = arith.constant 0 : index
    %132 = vector.load %arg7[%c1_195, %c3_196, %c0_197, %c0_198] : memref<5x5x8x20xbf16, #tpu.memory_space<vmem>>, vector<1x1x8x20xbf16>
    %133 = vector.shape_cast %132 : vector<1x1x8x20xbf16> to vector<8x20xbf16>
    %cst_199 = arith.constant dense<0.000000e+00> : vector<8x92xf32>
    %134 = tpu.matmul %133, %131, %cst_199 {dimension_numbers = #tpu.dot_dimension_numbers<[1], [0], [0], [1], [0, 0, 1, 1], [], []>} : vector<8x20xbf16>, vector<20x92xbf16>, vector<8x92xf32> -> vector<8x92xf32>
    %135 = arith.addf %120, %134 : vector<8x92xf32>
    %c0_200 = arith.constant 0 : index
    %c0_201 = arith.constant 0 : index
    %c0_202 = arith.constant 0 : index
    %c48_203 = arith.constant 48 : index
    %136 = vector.load %arg3[%c0_200, %c0_201, %c0_202, %c48_203] : memref<1x1x4x144xbf16, #tpu.memory_space<vmem>>, vector<1x1x4x92xbf16>
    %137 = vector.shape_cast %136 : vector<1x1x4x92xbf16> to vector<4x92xbf16>
    %c0_204 = arith.constant 0 : index
    %c0_205 = arith.constant 0 : index
    %c0_206 = arith.constant 0 : index
    %c49_207 = arith.constant 49 : index
    %138 = vector.load %arg3[%c0_204, %c0_205, %c0_206, %c49_207] : memref<1x1x4x144xbf16, #tpu.memory_space<vmem>>, vector<1x1x4x92xbf16>
    %139 = vector.shape_cast %138 : vector<1x1x4x92xbf16> to vector<4x92xbf16>
    %c0_208 = arith.constant 0 : index
    %c0_209 = arith.constant 0 : index
    %c0_210 = arith.constant 0 : index
    %c50_211 = arith.constant 50 : index
    %140 = vector.load %arg3[%c0_208, %c0_209, %c0_210, %c50_211] : memref<1x1x4x144xbf16, #tpu.memory_space<vmem>>, vector<1x1x4x92xbf16>
    %141 = vector.shape_cast %140 : vector<1x1x4x92xbf16> to vector<4x92xbf16>
    %c0_212 = arith.constant 0 : index
    %c0_213 = arith.constant 0 : index
    %c0_214 = arith.constant 0 : index
    %c51_215 = arith.constant 51 : index
    %142 = vector.load %arg3[%c0_212, %c0_213, %c0_214, %c51_215] : memref<1x1x4x144xbf16, #tpu.memory_space<vmem>>, vector<1x1x4x92xbf16>
    %143 = vector.shape_cast %142 : vector<1x1x4x92xbf16> to vector<4x92xbf16>
    %c0_216 = arith.constant 0 : index
    %c0_217 = arith.constant 0 : index
    %c0_218 = arith.constant 0 : index
    %c52_219 = arith.constant 52 : index
    %144 = vector.load %arg3[%c0_216, %c0_217, %c0_218, %c52_219] : memref<1x1x4x144xbf16, #tpu.memory_space<vmem>>, vector<1x1x4x92xbf16>
    %145 = vector.shape_cast %144 : vector<1x1x4x92xbf16> to vector<4x92xbf16>
    %146 = tpu.concatenate %137, %139, %141, %143, %145 in 0 : vector<4x92xbf16>, vector<4x92xbf16>, vector<4x92xbf16>, vector<4x92xbf16>, vector<4x92xbf16> -> vector<20x92xbf16>
    %c1_220 = arith.constant 1 : index
    %c4_221 = arith.constant 4 : index
    %c0_222 = arith.constant 0 : index
    %c0_223 = arith.constant 0 : index
    %147 = vector.load %arg7[%c1_220, %c4_221, %c0_222, %c0_223] : memref<5x5x8x20xbf16, #tpu.memory_space<vmem>>, vector<1x1x8x20xbf16>
    %148 = vector.shape_cast %147 : vector<1x1x8x20xbf16> to vector<8x20xbf16>
    %cst_224 = arith.constant dense<0.000000e+00> : vector<8x92xf32>
    %149 = tpu.matmul %148, %146, %cst_224 {dimension_numbers = #tpu.dot_dimension_numbers<[1], [0], [0], [1], [0, 0, 1, 1], [], []>} : vector<8x20xbf16>, vector<20x92xbf16>, vector<8x92xf32> -> vector<8x92xf32>
    %150 = arith.addf %135, %149 : vector<8x92xf32>
    %c0_225 = arith.constant 0 : index
    %c0_226 = arith.constant 0 : index
    %c0_227 = arith.constant 0 : index
    %c0_228 = arith.constant 0 : index
    %151 = vector.load %arg4[%c0_225, %c0_226, %c0_227, %c0_228] : memref<1x1x4x144xbf16, #tpu.memory_space<vmem>>, vector<1x1x4x92xbf16>
    %152 = vector.shape_cast %151 : vector<1x1x4x92xbf16> to vector<4x92xbf16>
    %c0_229 = arith.constant 0 : index
    %c0_230 = arith.constant 0 : index
    %c0_231 = arith.constant 0 : index
    %c1_232 = arith.constant 1 : index
    %153 = vector.load %arg4[%c0_229, %c0_230, %c0_231, %c1_232] : memref<1x1x4x144xbf16, #tpu.memory_space<vmem>>, vector<1x1x4x92xbf16>
    %154 = vector.shape_cast %153 : vector<1x1x4x92xbf16> to vector<4x92xbf16>
    %c0_233 = arith.constant 0 : index
    %c0_234 = arith.constant 0 : index
    %c0_235 = arith.constant 0 : index
    %c2_236 = arith.constant 2 : index
    %155 = vector.load %arg4[%c0_233, %c0_234, %c0_235, %c2_236] : memref<1x1x4x144xbf16, #tpu.memory_space<vmem>>, vector<1x1x4x92xbf16>
    %156 = vector.shape_cast %155 : vector<1x1x4x92xbf16> to vector<4x92xbf16>
    %c0_237 = arith.constant 0 : index
    %c0_238 = arith.constant 0 : index
    %c0_239 = arith.constant 0 : index
    %c3_240 = arith.constant 3 : index
    %157 = vector.load %arg4[%c0_237, %c0_238, %c0_239, %c3_240] : memref<1x1x4x144xbf16, #tpu.memory_space<vmem>>, vector<1x1x4x92xbf16>
    %158 = vector.shape_cast %157 : vector<1x1x4x92xbf16> to vector<4x92xbf16>
    %c0_241 = arith.constant 0 : index
    %c0_242 = arith.constant 0 : index
    %c0_243 = arith.constant 0 : index
    %c4_244 = arith.constant 4 : index
    %159 = vector.load %arg4[%c0_241, %c0_242, %c0_243, %c4_244] : memref<1x1x4x144xbf16, #tpu.memory_space<vmem>>, vector<1x1x4x92xbf16>
    %160 = vector.shape_cast %159 : vector<1x1x4x92xbf16> to vector<4x92xbf16>
    %161 = tpu.concatenate %152, %154, %156, %158, %160 in 0 : vector<4x92xbf16>, vector<4x92xbf16>, vector<4x92xbf16>, vector<4x92xbf16>, vector<4x92xbf16> -> vector<20x92xbf16>
    %c2_245 = arith.constant 2 : index
    %c0_246 = arith.constant 0 : index
    %c0_247 = arith.constant 0 : index
    %c0_248 = arith.constant 0 : index
    %162 = vector.load %arg7[%c2_245, %c0_246, %c0_247, %c0_248] : memref<5x5x8x20xbf16, #tpu.memory_space<vmem>>, vector<1x1x8x20xbf16>
    %163 = vector.shape_cast %162 : vector<1x1x8x20xbf16> to vector<8x20xbf16>
    %cst_249 = arith.constant dense<0.000000e+00> : vector<8x92xf32>
    %164 = tpu.matmul %163, %161, %cst_249 {dimension_numbers = #tpu.dot_dimension_numbers<[1], [0], [0], [1], [0, 0, 1, 1], [], []>} : vector<8x20xbf16>, vector<20x92xbf16>, vector<8x92xf32> -> vector<8x92xf32>
    %165 = arith.addf %150, %164 : vector<8x92xf32>
    %c0_250 = arith.constant 0 : index
    %c0_251 = arith.constant 0 : index
    %c0_252 = arith.constant 0 : index
    %c12_253 = arith.constant 12 : index
    %166 = vector.load %arg4[%c0_250, %c0_251, %c0_252, %c12_253] : memref<1x1x4x144xbf16, #tpu.memory_space<vmem>>, vector<1x1x4x92xbf16>
    %167 = vector.shape_cast %166 : vector<1x1x4x92xbf16> to vector<4x92xbf16>
    %c0_254 = arith.constant 0 : index
    %c0_255 = arith.constant 0 : index
    %c0_256 = arith.constant 0 : index
    %c13_257 = arith.constant 13 : index
    %168 = vector.load %arg4[%c0_254, %c0_255, %c0_256, %c13_257] : memref<1x1x4x144xbf16, #tpu.memory_space<vmem>>, vector<1x1x4x92xbf16>
    %169 = vector.shape_cast %168 : vector<1x1x4x92xbf16> to vector<4x92xbf16>
    %c0_258 = arith.constant 0 : index
    %c0_259 = arith.constant 0 : index
    %c0_260 = arith.constant 0 : index
    %c14_261 = arith.constant 14 : index
    %170 = vector.load %arg4[%c0_258, %c0_259, %c0_260, %c14_261] : memref<1x1x4x144xbf16, #tpu.memory_space<vmem>>, vector<1x1x4x92xbf16>
    %171 = vector.shape_cast %170 : vector<1x1x4x92xbf16> to vector<4x92xbf16>
    %c0_262 = arith.constant 0 : index
    %c0_263 = arith.constant 0 : index
    %c0_264 = arith.constant 0 : index
    %c15_265 = arith.constant 15 : index
    %172 = vector.load %arg4[%c0_262, %c0_263, %c0_264, %c15_265] : memref<1x1x4x144xbf16, #tpu.memory_space<vmem>>, vector<1x1x4x92xbf16>
    %173 = vector.shape_cast %172 : vector<1x1x4x92xbf16> to vector<4x92xbf16>
    %c0_266 = arith.constant 0 : index
    %c0_267 = arith.constant 0 : index
    %c0_268 = arith.constant 0 : index
    %c16_269 = arith.constant 16 : index
    %174 = vector.load %arg4[%c0_266, %c0_267, %c0_268, %c16_269] : memref<1x1x4x144xbf16, #tpu.memory_space<vmem>>, vector<1x1x4x92xbf16>
    %175 = vector.shape_cast %174 : vector<1x1x4x92xbf16> to vector<4x92xbf16>
    %176 = tpu.concatenate %167, %169, %171, %173, %175 in 0 : vector<4x92xbf16>, vector<4x92xbf16>, vector<4x92xbf16>, vector<4x92xbf16>, vector<4x92xbf16> -> vector<20x92xbf16>
    %c2_270 = arith.constant 2 : index
    %c1_271 = arith.constant 1 : index
    %c0_272 = arith.constant 0 : index
    %c0_273 = arith.constant 0 : index
    %177 = vector.load %arg7[%c2_270, %c1_271, %c0_272, %c0_273] : memref<5x5x8x20xbf16, #tpu.memory_space<vmem>>, vector<1x1x8x20xbf16>
    %178 = vector.shape_cast %177 : vector<1x1x8x20xbf16> to vector<8x20xbf16>
    %cst_274 = arith.constant dense<0.000000e+00> : vector<8x92xf32>
    %179 = tpu.matmul %178, %176, %cst_274 {dimension_numbers = #tpu.dot_dimension_numbers<[1], [0], [0], [1], [0, 0, 1, 1], [], []>} : vector<8x20xbf16>, vector<20x92xbf16>, vector<8x92xf32> -> vector<8x92xf32>
    %180 = arith.addf %165, %179 : vector<8x92xf32>
    %c0_275 = arith.constant 0 : index
    %c0_276 = arith.constant 0 : index
    %c0_277 = arith.constant 0 : index
    %c24_278 = arith.constant 24 : index
    %181 = vector.load %arg4[%c0_275, %c0_276, %c0_277, %c24_278] : memref<1x1x4x144xbf16, #tpu.memory_space<vmem>>, vector<1x1x4x92xbf16>
    %182 = vector.shape_cast %181 : vector<1x1x4x92xbf16> to vector<4x92xbf16>
    %c0_279 = arith.constant 0 : index
    %c0_280 = arith.constant 0 : index
    %c0_281 = arith.constant 0 : index
    %c25_282 = arith.constant 25 : index
    %183 = vector.load %arg4[%c0_279, %c0_280, %c0_281, %c25_282] : memref<1x1x4x144xbf16, #tpu.memory_space<vmem>>, vector<1x1x4x92xbf16>
    %184 = vector.shape_cast %183 : vector<1x1x4x92xbf16> to vector<4x92xbf16>
    %c0_283 = arith.constant 0 : index
    %c0_284 = arith.constant 0 : index
    %c0_285 = arith.constant 0 : index
    %c26_286 = arith.constant 26 : index
    %185 = vector.load %arg4[%c0_283, %c0_284, %c0_285, %c26_286] : memref<1x1x4x144xbf16, #tpu.memory_space<vmem>>, vector<1x1x4x92xbf16>
    %186 = vector.shape_cast %185 : vector<1x1x4x92xbf16> to vector<4x92xbf16>
    %c0_287 = arith.constant 0 : index
    %c0_288 = arith.constant 0 : index
    %c0_289 = arith.constant 0 : index
    %c27_290 = arith.constant 27 : index
    %187 = vector.load %arg4[%c0_287, %c0_288, %c0_289, %c27_290] : memref<1x1x4x144xbf16, #tpu.memory_space<vmem>>, vector<1x1x4x92xbf16>
    %188 = vector.shape_cast %187 : vector<1x1x4x92xbf16> to vector<4x92xbf16>
    %c0_291 = arith.constant 0 : index
    %c0_292 = arith.constant 0 : index
    %c0_293 = arith.constant 0 : index
    %c28_294 = arith.constant 28 : index
    %189 = vector.load %arg4[%c0_291, %c0_292, %c0_293, %c28_294] : memref<1x1x4x144xbf16, #tpu.memory_space<vmem>>, vector<1x1x4x92xbf16>
    %190 = vector.shape_cast %189 : vector<1x1x4x92xbf16> to vector<4x92xbf16>
    %191 = tpu.concatenate %182, %184, %186, %188, %190 in 0 : vector<4x92xbf16>, vector<4x92xbf16>, vector<4x92xbf16>, vector<4x92xbf16>, vector<4x92xbf16> -> vector<20x92xbf16>
    %c2_295 = arith.constant 2 : index
    %c2_296 = arith.constant 2 : index
    %c0_297 = arith.constant 0 : index
    %c0_298 = arith.constant 0 : index
    %192 = vector.load %arg7[%c2_295, %c2_296, %c0_297, %c0_298] : memref<5x5x8x20xbf16, #tpu.memory_space<vmem>>, vector<1x1x8x20xbf16>
    %193 = vector.shape_cast %192 : vector<1x1x8x20xbf16> to vector<8x20xbf16>
    %cst_299 = arith.constant dense<0.000000e+00> : vector<8x92xf32>
    %194 = tpu.matmul %193, %191, %cst_299 {dimension_numbers = #tpu.dot_dimension_numbers<[1], [0], [0], [1], [0, 0, 1, 1], [], []>} : vector<8x20xbf16>, vector<20x92xbf16>, vector<8x92xf32> -> vector<8x92xf32>
    %195 = arith.addf %180, %194 : vector<8x92xf32>
    %c0_300 = arith.constant 0 : index
    %c0_301 = arith.constant 0 : index
    %c0_302 = arith.constant 0 : index
    %c36_303 = arith.constant 36 : index
    %196 = vector.load %arg4[%c0_300, %c0_301, %c0_302, %c36_303] : memref<1x1x4x144xbf16, #tpu.memory_space<vmem>>, vector<1x1x4x92xbf16>
    %197 = vector.shape_cast %196 : vector<1x1x4x92xbf16> to vector<4x92xbf16>
    %c0_304 = arith.constant 0 : index
    %c0_305 = arith.constant 0 : index
    %c0_306 = arith.constant 0 : index
    %c37_307 = arith.constant 37 : index
    %198 = vector.load %arg4[%c0_304, %c0_305, %c0_306, %c37_307] : memref<1x1x4x144xbf16, #tpu.memory_space<vmem>>, vector<1x1x4x92xbf16>
    %199 = vector.shape_cast %198 : vector<1x1x4x92xbf16> to vector<4x92xbf16>
    %c0_308 = arith.constant 0 : index
    %c0_309 = arith.constant 0 : index
    %c0_310 = arith.constant 0 : index
    %c38_311 = arith.constant 38 : index
    %200 = vector.load %arg4[%c0_308, %c0_309, %c0_310, %c38_311] : memref<1x1x4x144xbf16, #tpu.memory_space<vmem>>, vector<1x1x4x92xbf16>
    %201 = vector.shape_cast %200 : vector<1x1x4x92xbf16> to vector<4x92xbf16>
    %c0_312 = arith.constant 0 : index
    %c0_313 = arith.constant 0 : index
    %c0_314 = arith.constant 0 : index
    %c39_315 = arith.constant 39 : index
    %202 = vector.load %arg4[%c0_312, %c0_313, %c0_314, %c39_315] : memref<1x1x4x144xbf16, #tpu.memory_space<vmem>>, vector<1x1x4x92xbf16>
    %203 = vector.shape_cast %202 : vector<1x1x4x92xbf16> to vector<4x92xbf16>
    %c0_316 = arith.constant 0 : index
    %c0_317 = arith.constant 0 : index
    %c0_318 = arith.constant 0 : index
    %c40_319 = arith.constant 40 : index
    %204 = vector.load %arg4[%c0_316, %c0_317, %c0_318, %c40_319] : memref<1x1x4x144xbf16, #tpu.memory_space<vmem>>, vector<1x1x4x92xbf16>
    %205 = vector.shape_cast %204 : vector<1x1x4x92xbf16> to vector<4x92xbf16>
    %206 = tpu.concatenate %197, %199, %201, %203, %205 in 0 : vector<4x92xbf16>, vector<4x92xbf16>, vector<4x92xbf16>, vector<4x92xbf16>, vector<4x92xbf16> -> vector<20x92xbf16>
    %c2_320 = arith.constant 2 : index
    %c3_321 = arith.constant 3 : index
    %c0_322 = arith.constant 0 : index
    %c0_323 = arith.constant 0 : index
    %207 = vector.load %arg7[%c2_320, %c3_321, %c0_322, %c0_323] : memref<5x5x8x20xbf16, #tpu.memory_space<vmem>>, vector<1x1x8x20xbf16>
    %208 = vector.shape_cast %207 : vector<1x1x8x20xbf16> to vector<8x20xbf16>
    %cst_324 = arith.constant dense<0.000000e+00> : vector<8x92xf32>
    %209 = tpu.matmul %208, %206, %cst_324 {dimension_numbers = #tpu.dot_dimension_numbers<[1], [0], [0], [1], [0, 0, 1, 1], [], []>} : vector<8x20xbf16>, vector<20x92xbf16>, vector<8x92xf32> -> vector<8x92xf32>
    %210 = arith.addf %195, %209 : vector<8x92xf32>
    %c0_325 = arith.constant 0 : index
    %c0_326 = arith.constant 0 : index
    %c0_327 = arith.constant 0 : index
    %c48_328 = arith.constant 48 : index
    %211 = vector.load %arg4[%c0_325, %c0_326, %c0_327, %c48_328] : memref<1x1x4x144xbf16, #tpu.memory_space<vmem>>, vector<1x1x4x92xbf16>
    %212 = vector.shape_cast %211 : vector<1x1x4x92xbf16> to vector<4x92xbf16>
    %c0_329 = arith.constant 0 : index
    %c0_330 = arith.constant 0 : index
    %c0_331 = arith.constant 0 : index
    %c49_332 = arith.constant 49 : index
    %213 = vector.load %arg4[%c0_329, %c0_330, %c0_331, %c49_332] : memref<1x1x4x144xbf16, #tpu.memory_space<vmem>>, vector<1x1x4x92xbf16>
    %214 = vector.shape_cast %213 : vector<1x1x4x92xbf16> to vector<4x92xbf16>
    %c0_333 = arith.constant 0 : index
    %c0_334 = arith.constant 0 : index
    %c0_335 = arith.constant 0 : index
    %c50_336 = arith.constant 50 : index
    %215 = vector.load %arg4[%c0_333, %c0_334, %c0_335, %c50_336] : memref<1x1x4x144xbf16, #tpu.memory_space<vmem>>, vector<1x1x4x92xbf16>
    %216 = vector.shape_cast %215 : vector<1x1x4x92xbf16> to vector<4x92xbf16>
    %c0_337 = arith.constant 0 : index
    %c0_338 = arith.constant 0 : index
    %c0_339 = arith.constant 0 : index
    %c51_340 = arith.constant 51 : index
    %217 = vector.load %arg4[%c0_337, %c0_338, %c0_339, %c51_340] : memref<1x1x4x144xbf16, #tpu.memory_space<vmem>>, vector<1x1x4x92xbf16>
    %218 = vector.shape_cast %217 : vector<1x1x4x92xbf16> to vector<4x92xbf16>
    %c0_341 = arith.constant 0 : index
    %c0_342 = arith.constant 0 : index
    %c0_343 = arith.constant 0 : index
    %c52_344 = arith.constant 52 : index
    %219 = vector.load %arg4[%c0_341, %c0_342, %c0_343, %c52_344] : memref<1x1x4x144xbf16, #tpu.memory_space<vmem>>, vector<1x1x4x92xbf16>
    %220 = vector.shape_cast %219 : vector<1x1x4x92xbf16> to vector<4x92xbf16>
    %221 = tpu.concatenate %212, %214, %216, %218, %220 in 0 : vector<4x92xbf16>, vector<4x92xbf16>, vector<4x92xbf16>, vector<4x92xbf16>, vector<4x92xbf16> -> vector<20x92xbf16>
    %c2_345 = arith.constant 2 : index
    %c4_346 = arith.constant 4 : index
    %c0_347 = arith.constant 0 : index
    %c0_348 = arith.constant 0 : index
    %222 = vector.load %arg7[%c2_345, %c4_346, %c0_347, %c0_348] : memref<5x5x8x20xbf16, #tpu.memory_space<vmem>>, vector<1x1x8x20xbf16>
    %223 = vector.shape_cast %222 : vector<1x1x8x20xbf16> to vector<8x20xbf16>
    %cst_349 = arith.constant dense<0.000000e+00> : vector<8x92xf32>
    %224 = tpu.matmul %223, %221, %cst_349 {dimension_numbers = #tpu.dot_dimension_numbers<[1], [0], [0], [1], [0, 0, 1, 1], [], []>} : vector<8x20xbf16>, vector<20x92xbf16>, vector<8x92xf32> -> vector<8x92xf32>
    %225 = arith.addf %210, %224 : vector<8x92xf32>
    %c0_350 = arith.constant 0 : index
    %c0_351 = arith.constant 0 : index
    %c0_352 = arith.constant 0 : index
    %c0_353 = arith.constant 0 : index
    %226 = vector.load %arg5[%c0_350, %c0_351, %c0_352, %c0_353] : memref<1x1x4x144xbf16, #tpu.memory_space<vmem>>, vector<1x1x4x92xbf16>
    %227 = vector.shape_cast %226 : vector<1x1x4x92xbf16> to vector<4x92xbf16>
    %c0_354 = arith.constant 0 : index
    %c0_355 = arith.constant 0 : index
    %c0_356 = arith.constant 0 : index
    %c1_357 = arith.constant 1 : index
    %228 = vector.load %arg5[%c0_354, %c0_355, %c0_356, %c1_357] : memref<1x1x4x144xbf16, #tpu.memory_space<vmem>>, vector<1x1x4x92xbf16>
    %229 = vector.shape_cast %228 : vector<1x1x4x92xbf16> to vector<4x92xbf16>
    %c0_358 = arith.constant 0 : index
    %c0_359 = arith.constant 0 : index
    %c0_360 = arith.constant 0 : index
    %c2_361 = arith.constant 2 : index
    %230 = vector.load %arg5[%c0_358, %c0_359, %c0_360, %c2_361] : memref<1x1x4x144xbf16, #tpu.memory_space<vmem>>, vector<1x1x4x92xbf16>
    %231 = vector.shape_cast %230 : vector<1x1x4x92xbf16> to vector<4x92xbf16>
    %c0_362 = arith.constant 0 : index
    %c0_363 = arith.constant 0 : index
    %c0_364 = arith.constant 0 : index
    %c3_365 = arith.constant 3 : index
    %232 = vector.load %arg5[%c0_362, %c0_363, %c0_364, %c3_365] : memref<1x1x4x144xbf16, #tpu.memory_space<vmem>>, vector<1x1x4x92xbf16>
    %233 = vector.shape_cast %232 : vector<1x1x4x92xbf16> to vector<4x92xbf16>
    %c0_366 = arith.constant 0 : index
    %c0_367 = arith.constant 0 : index
    %c0_368 = arith.constant 0 : index
    %c4_369 = arith.constant 4 : index
    %234 = vector.load %arg5[%c0_366, %c0_367, %c0_368, %c4_369] : memref<1x1x4x144xbf16, #tpu.memory_space<vmem>>, vector<1x1x4x92xbf16>
    %235 = vector.shape_cast %234 : vector<1x1x4x92xbf16> to vector<4x92xbf16>
    %236 = tpu.concatenate %227, %229, %231, %233, %235 in 0 : vector<4x92xbf16>, vector<4x92xbf16>, vector<4x92xbf16>, vector<4x92xbf16>, vector<4x92xbf16> -> vector<20x92xbf16>
    %c3_370 = arith.constant 3 : index
    %c0_371 = arith.constant 0 : index
    %c0_372 = arith.constant 0 : index
    %c0_373 = arith.constant 0 : index
    %237 = vector.load %arg7[%c3_370, %c0_371, %c0_372, %c0_373] : memref<5x5x8x20xbf16, #tpu.memory_space<vmem>>, vector<1x1x8x20xbf16>
    %238 = vector.shape_cast %237 : vector<1x1x8x20xbf16> to vector<8x20xbf16>
    %cst_374 = arith.constant dense<0.000000e+00> : vector<8x92xf32>
    %239 = tpu.matmul %238, %236, %cst_374 {dimension_numbers = #tpu.dot_dimension_numbers<[1], [0], [0], [1], [0, 0, 1, 1], [], []>} : vector<8x20xbf16>, vector<20x92xbf16>, vector<8x92xf32> -> vector<8x92xf32>
    %240 = arith.addf %225, %239 : vector<8x92xf32>
    %c0_375 = arith.constant 0 : index
    %c0_376 = arith.constant 0 : index
    %c0_377 = arith.constant 0 : index
    %c12_378 = arith.constant 12 : index
    %241 = vector.load %arg5[%c0_375, %c0_376, %c0_377, %c12_378] : memref<1x1x4x144xbf16, #tpu.memory_space<vmem>>, vector<1x1x4x92xbf16>
    %242 = vector.shape_cast %241 : vector<1x1x4x92xbf16> to vector<4x92xbf16>
    %c0_379 = arith.constant 0 : index
    %c0_380 = arith.constant 0 : index
    %c0_381 = arith.constant 0 : index
    %c13_382 = arith.constant 13 : index
    %243 = vector.load %arg5[%c0_379, %c0_380, %c0_381, %c13_382] : memref<1x1x4x144xbf16, #tpu.memory_space<vmem>>, vector<1x1x4x92xbf16>
    %244 = vector.shape_cast %243 : vector<1x1x4x92xbf16> to vector<4x92xbf16>
    %c0_383 = arith.constant 0 : index
    %c0_384 = arith.constant 0 : index
    %c0_385 = arith.constant 0 : index
    %c14_386 = arith.constant 14 : index
    %245 = vector.load %arg5[%c0_383, %c0_384, %c0_385, %c14_386] : memref<1x1x4x144xbf16, #tpu.memory_space<vmem>>, vector<1x1x4x92xbf16>
    %246 = vector.shape_cast %245 : vector<1x1x4x92xbf16> to vector<4x92xbf16>
    %c0_387 = arith.constant 0 : index
    %c0_388 = arith.constant 0 : index
    %c0_389 = arith.constant 0 : index
    %c15_390 = arith.constant 15 : index
    %247 = vector.load %arg5[%c0_387, %c0_388, %c0_389, %c15_390] : memref<1x1x4x144xbf16, #tpu.memory_space<vmem>>, vector<1x1x4x92xbf16>
    %248 = vector.shape_cast %247 : vector<1x1x4x92xbf16> to vector<4x92xbf16>
    %c0_391 = arith.constant 0 : index
    %c0_392 = arith.constant 0 : index
    %c0_393 = arith.constant 0 : index
    %c16_394 = arith.constant 16 : index
    %249 = vector.load %arg5[%c0_391, %c0_392, %c0_393, %c16_394] : memref<1x1x4x144xbf16, #tpu.memory_space<vmem>>, vector<1x1x4x92xbf16>
    %250 = vector.shape_cast %249 : vector<1x1x4x92xbf16> to vector<4x92xbf16>
    %251 = tpu.concatenate %242, %244, %246, %248, %250 in 0 : vector<4x92xbf16>, vector<4x92xbf16>, vector<4x92xbf16>, vector<4x92xbf16>, vector<4x92xbf16> -> vector<20x92xbf16>
    %c3_395 = arith.constant 3 : index
    %c1_396 = arith.constant 1 : index
    %c0_397 = arith.constant 0 : index
    %c0_398 = arith.constant 0 : index
    %252 = vector.load %arg7[%c3_395, %c1_396, %c0_397, %c0_398] : memref<5x5x8x20xbf16, #tpu.memory_space<vmem>>, vector<1x1x8x20xbf16>
    %253 = vector.shape_cast %252 : vector<1x1x8x20xbf16> to vector<8x20xbf16>
    %cst_399 = arith.constant dense<0.000000e+00> : vector<8x92xf32>
    %254 = tpu.matmul %253, %251, %cst_399 {dimension_numbers = #tpu.dot_dimension_numbers<[1], [0], [0], [1], [0, 0, 1, 1], [], []>} : vector<8x20xbf16>, vector<20x92xbf16>, vector<8x92xf32> -> vector<8x92xf32>
    %255 = arith.addf %240, %254 : vector<8x92xf32>
    %c0_400 = arith.constant 0 : index
    %c0_401 = arith.constant 0 : index
    %c0_402 = arith.constant 0 : index
    %c24_403 = arith.constant 24 : index
    %256 = vector.load %arg5[%c0_400, %c0_401, %c0_402, %c24_403] : memref<1x1x4x144xbf16, #tpu.memory_space<vmem>>, vector<1x1x4x92xbf16>
    %257 = vector.shape_cast %256 : vector<1x1x4x92xbf16> to vector<4x92xbf16>
    %c0_404 = arith.constant 0 : index
    %c0_405 = arith.constant 0 : index
    %c0_406 = arith.constant 0 : index
    %c25_407 = arith.constant 25 : index
    %258 = vector.load %arg5[%c0_404, %c0_405, %c0_406, %c25_407] : memref<1x1x4x144xbf16, #tpu.memory_space<vmem>>, vector<1x1x4x92xbf16>
    %259 = vector.shape_cast %258 : vector<1x1x4x92xbf16> to vector<4x92xbf16>
    %c0_408 = arith.constant 0 : index
    %c0_409 = arith.constant 0 : index
    %c0_410 = arith.constant 0 : index
    %c26_411 = arith.constant 26 : index
    %260 = vector.load %arg5[%c0_408, %c0_409, %c0_410, %c26_411] : memref<1x1x4x144xbf16, #tpu.memory_space<vmem>>, vector<1x1x4x92xbf16>
    %261 = vector.shape_cast %260 : vector<1x1x4x92xbf16> to vector<4x92xbf16>
    %c0_412 = arith.constant 0 : index
    %c0_413 = arith.constant 0 : index
    %c0_414 = arith.constant 0 : index
    %c27_415 = arith.constant 27 : index
    %262 = vector.load %arg5[%c0_412, %c0_413, %c0_414, %c27_415] : memref<1x1x4x144xbf16, #tpu.memory_space<vmem>>, vector<1x1x4x92xbf16>
    %263 = vector.shape_cast %262 : vector<1x1x4x92xbf16> to vector<4x92xbf16>
    %c0_416 = arith.constant 0 : index
    %c0_417 = arith.constant 0 : index
    %c0_418 = arith.constant 0 : index
    %c28_419 = arith.constant 28 : index
    %264 = vector.load %arg5[%c0_416, %c0_417, %c0_418, %c28_419] : memref<1x1x4x144xbf16, #tpu.memory_space<vmem>>, vector<1x1x4x92xbf16>
    %265 = vector.shape_cast %264 : vector<1x1x4x92xbf16> to vector<4x92xbf16>
    %266 = tpu.concatenate %257, %259, %261, %263, %265 in 0 : vector<4x92xbf16>, vector<4x92xbf16>, vector<4x92xbf16>, vector<4x92xbf16>, vector<4x92xbf16> -> vector<20x92xbf16>
    %c3_420 = arith.constant 3 : index
    %c2_421 = arith.constant 2 : index
    %c0_422 = arith.constant 0 : index
    %c0_423 = arith.constant 0 : index
    %267 = vector.load %arg7[%c3_420, %c2_421, %c0_422, %c0_423] : memref<5x5x8x20xbf16, #tpu.memory_space<vmem>>, vector<1x1x8x20xbf16>
    %268 = vector.shape_cast %267 : vector<1x1x8x20xbf16> to vector<8x20xbf16>
    %cst_424 = arith.constant dense<0.000000e+00> : vector<8x92xf32>
    %269 = tpu.matmul %268, %266, %cst_424 {dimension_numbers = #tpu.dot_dimension_numbers<[1], [0], [0], [1], [0, 0, 1, 1], [], []>} : vector<8x20xbf16>, vector<20x92xbf16>, vector<8x92xf32> -> vector<8x92xf32>
    %270 = arith.addf %255, %269 : vector<8x92xf32>
    %c0_425 = arith.constant 0 : index
    %c0_426 = arith.constant 0 : index
    %c0_427 = arith.constant 0 : index
    %c36_428 = arith.constant 36 : index
    %271 = vector.load %arg5[%c0_425, %c0_426, %c0_427, %c36_428] : memref<1x1x4x144xbf16, #tpu.memory_space<vmem>>, vector<1x1x4x92xbf16>
    %272 = vector.shape_cast %271 : vector<1x1x4x92xbf16> to vector<4x92xbf16>
    %c0_429 = arith.constant 0 : index
    %c0_430 = arith.constant 0 : index
    %c0_431 = arith.constant 0 : index
    %c37_432 = arith.constant 37 : index
    %273 = vector.load %arg5[%c0_429, %c0_430, %c0_431, %c37_432] : memref<1x1x4x144xbf16, #tpu.memory_space<vmem>>, vector<1x1x4x92xbf16>
    %274 = vector.shape_cast %273 : vector<1x1x4x92xbf16> to vector<4x92xbf16>
    %c0_433 = arith.constant 0 : index
    %c0_434 = arith.constant 0 : index
    %c0_435 = arith.constant 0 : index
    %c38_436 = arith.constant 38 : index
    %275 = vector.load %arg5[%c0_433, %c0_434, %c0_435, %c38_436] : memref<1x1x4x144xbf16, #tpu.memory_space<vmem>>, vector<1x1x4x92xbf16>
    %276 = vector.shape_cast %275 : vector<1x1x4x92xbf16> to vector<4x92xbf16>
    %c0_437 = arith.constant 0 : index
    %c0_438 = arith.constant 0 : index
    %c0_439 = arith.constant 0 : index
    %c39_440 = arith.constant 39 : index
    %277 = vector.load %arg5[%c0_437, %c0_438, %c0_439, %c39_440] : memref<1x1x4x144xbf16, #tpu.memory_space<vmem>>, vector<1x1x4x92xbf16>
    %278 = vector.shape_cast %277 : vector<1x1x4x92xbf16> to vector<4x92xbf16>
    %c0_441 = arith.constant 0 : index
    %c0_442 = arith.constant 0 : index
    %c0_443 = arith.constant 0 : index
    %c40_444 = arith.constant 40 : index
    %279 = vector.load %arg5[%c0_441, %c0_442, %c0_443, %c40_444] : memref<1x1x4x144xbf16, #tpu.memory_space<vmem>>, vector<1x1x4x92xbf16>
    %280 = vector.shape_cast %279 : vector<1x1x4x92xbf16> to vector<4x92xbf16>
    %281 = tpu.concatenate %272, %274, %276, %278, %280 in 0 : vector<4x92xbf16>, vector<4x92xbf16>, vector<4x92xbf16>, vector<4x92xbf16>, vector<4x92xbf16> -> vector<20x92xbf16>
    %c3_445 = arith.constant 3 : index
    %c3_446 = arith.constant 3 : index
    %c0_447 = arith.constant 0 : index
    %c0_448 = arith.constant 0 : index
    %282 = vector.load %arg7[%c3_445, %c3_446, %c0_447, %c0_448] : memref<5x5x8x20xbf16, #tpu.memory_space<vmem>>, vector<1x1x8x20xbf16>
    %283 = vector.shape_cast %282 : vector<1x1x8x20xbf16> to vector<8x20xbf16>
    %cst_449 = arith.constant dense<0.000000e+00> : vector<8x92xf32>
    %284 = tpu.matmul %283, %281, %cst_449 {dimension_numbers = #tpu.dot_dimension_numbers<[1], [0], [0], [1], [0, 0, 1, 1], [], []>} : vector<8x20xbf16>, vector<20x92xbf16>, vector<8x92xf32> -> vector<8x92xf32>
    %285 = arith.addf %270, %284 : vector<8x92xf32>
    %c0_450 = arith.constant 0 : index
    %c0_451 = arith.constant 0 : index
    %c0_452 = arith.constant 0 : index
    %c48_453 = arith.constant 48 : index
    %286 = vector.load %arg5[%c0_450, %c0_451, %c0_452, %c48_453] : memref<1x1x4x144xbf16, #tpu.memory_space<vmem>>, vector<1x1x4x92xbf16>
    %287 = vector.shape_cast %286 : vector<1x1x4x92xbf16> to vector<4x92xbf16>
    %c0_454 = arith.constant 0 : index
    %c0_455 = arith.constant 0 : index
    %c0_456 = arith.constant 0 : index
    %c49_457 = arith.constant 49 : index
    %288 = vector.load %arg5[%c0_454, %c0_455, %c0_456, %c49_457] : memref<1x1x4x144xbf16, #tpu.memory_space<vmem>>, vector<1x1x4x92xbf16>
    %289 = vector.shape_cast %288 : vector<1x1x4x92xbf16> to vector<4x92xbf16>
    %c0_458 = arith.constant 0 : index
    %c0_459 = arith.constant 0 : index
    %c0_460 = arith.constant 0 : index
    %c50_461 = arith.constant 50 : index
    %290 = vector.load %arg5[%c0_458, %c0_459, %c0_460, %c50_461] : memref<1x1x4x144xbf16, #tpu.memory_space<vmem>>, vector<1x1x4x92xbf16>
    %291 = vector.shape_cast %290 : vector<1x1x4x92xbf16> to vector<4x92xbf16>
    %c0_462 = arith.constant 0 : index
    %c0_463 = arith.constant 0 : index
    %c0_464 = arith.constant 0 : index
    %c51_465 = arith.constant 51 : index
    %292 = vector.load %arg5[%c0_462, %c0_463, %c0_464, %c51_465] : memref<1x1x4x144xbf16, #tpu.memory_space<vmem>>, vector<1x1x4x92xbf16>
    %293 = vector.shape_cast %292 : vector<1x1x4x92xbf16> to vector<4x92xbf16>
    %c0_466 = arith.constant 0 : index
    %c0_467 = arith.constant 0 : index
    %c0_468 = arith.constant 0 : index
    %c52_469 = arith.constant 52 : index
    %294 = vector.load %arg5[%c0_466, %c0_467, %c0_468, %c52_469] : memref<1x1x4x144xbf16, #tpu.memory_space<vmem>>, vector<1x1x4x92xbf16>
    %295 = vector.shape_cast %294 : vector<1x1x4x92xbf16> to vector<4x92xbf16>
    %296 = tpu.concatenate %287, %289, %291, %293, %295 in 0 : vector<4x92xbf16>, vector<4x92xbf16>, vector<4x92xbf16>, vector<4x92xbf16>, vector<4x92xbf16> -> vector<20x92xbf16>
    %c3_470 = arith.constant 3 : index
    %c4_471 = arith.constant 4 : index
    %c0_472 = arith.constant 0 : index
    %c0_473 = arith.constant 0 : index
    %297 = vector.load %arg7[%c3_470, %c4_471, %c0_472, %c0_473] : memref<5x5x8x20xbf16, #tpu.memory_space<vmem>>, vector<1x1x8x20xbf16>
    %298 = vector.shape_cast %297 : vector<1x1x8x20xbf16> to vector<8x20xbf16>
    %cst_474 = arith.constant dense<0.000000e+00> : vector<8x92xf32>
    %299 = tpu.matmul %298, %296, %cst_474 {dimension_numbers = #tpu.dot_dimension_numbers<[1], [0], [0], [1], [0, 0, 1, 1], [], []>} : vector<8x20xbf16>, vector<20x92xbf16>, vector<8x92xf32> -> vector<8x92xf32>
    %300 = arith.addf %285, %299 : vector<8x92xf32>
    %c0_475 = arith.constant 0 : index
    %c0_476 = arith.constant 0 : index
    %c0_477 = arith.constant 0 : index
    %c0_478 = arith.constant 0 : index
    %301 = vector.load %arg6[%c0_475, %c0_476, %c0_477, %c0_478] : memref<1x1x4x144xbf16, #tpu.memory_space<vmem>>, vector<1x1x4x92xbf16>
    %302 = vector.shape_cast %301 : vector<1x1x4x92xbf16> to vector<4x92xbf16>
    %c0_479 = arith.constant 0 : index
    %c0_480 = arith.constant 0 : index
    %c0_481 = arith.constant 0 : index
    %c1_482 = arith.constant 1 : index
    %303 = vector.load %arg6[%c0_479, %c0_480, %c0_481, %c1_482] : memref<1x1x4x144xbf16, #tpu.memory_space<vmem>>, vector<1x1x4x92xbf16>
    %304 = vector.shape_cast %303 : vector<1x1x4x92xbf16> to vector<4x92xbf16>
    %c0_483 = arith.constant 0 : index
    %c0_484 = arith.constant 0 : index
    %c0_485 = arith.constant 0 : index
    %c2_486 = arith.constant 2 : index
    %305 = vector.load %arg6[%c0_483, %c0_484, %c0_485, %c2_486] : memref<1x1x4x144xbf16, #tpu.memory_space<vmem>>, vector<1x1x4x92xbf16>
    %306 = vector.shape_cast %305 : vector<1x1x4x92xbf16> to vector<4x92xbf16>
    %c0_487 = arith.constant 0 : index
    %c0_488 = arith.constant 0 : index
    %c0_489 = arith.constant 0 : index
    %c3_490 = arith.constant 3 : index
    %307 = vector.load %arg6[%c0_487, %c0_488, %c0_489, %c3_490] : memref<1x1x4x144xbf16, #tpu.memory_space<vmem>>, vector<1x1x4x92xbf16>
    %308 = vector.shape_cast %307 : vector<1x1x4x92xbf16> to vector<4x92xbf16>
    %c0_491 = arith.constant 0 : index
    %c0_492 = arith.constant 0 : index
    %c0_493 = arith.constant 0 : index
    %c4_494 = arith.constant 4 : index
    %309 = vector.load %arg6[%c0_491, %c0_492, %c0_493, %c4_494] : memref<1x1x4x144xbf16, #tpu.memory_space<vmem>>, vector<1x1x4x92xbf16>
    %310 = vector.shape_cast %309 : vector<1x1x4x92xbf16> to vector<4x92xbf16>
    %311 = tpu.concatenate %302, %304, %306, %308, %310 in 0 : vector<4x92xbf16>, vector<4x92xbf16>, vector<4x92xbf16>, vector<4x92xbf16>, vector<4x92xbf16> -> vector<20x92xbf16>
    %c4_495 = arith.constant 4 : index
    %c0_496 = arith.constant 0 : index
    %c0_497 = arith.constant 0 : index
    %c0_498 = arith.constant 0 : index
    %312 = vector.load %arg7[%c4_495, %c0_496, %c0_497, %c0_498] : memref<5x5x8x20xbf16, #tpu.memory_space<vmem>>, vector<1x1x8x20xbf16>
    %313 = vector.shape_cast %312 : vector<1x1x8x20xbf16> to vector<8x20xbf16>
    %cst_499 = arith.constant dense<0.000000e+00> : vector<8x92xf32>
    %314 = tpu.matmul %313, %311, %cst_499 {dimension_numbers = #tpu.dot_dimension_numbers<[1], [0], [0], [1], [0, 0, 1, 1], [], []>} : vector<8x20xbf16>, vector<20x92xbf16>, vector<8x92xf32> -> vector<8x92xf32>
    %315 = arith.addf %300, %314 : vector<8x92xf32>
    %c0_500 = arith.constant 0 : index
    %c0_501 = arith.constant 0 : index
    %c0_502 = arith.constant 0 : index
    %c12_503 = arith.constant 12 : index
    %316 = vector.load %arg6[%c0_500, %c0_501, %c0_502, %c12_503] : memref<1x1x4x144xbf16, #tpu.memory_space<vmem>>, vector<1x1x4x92xbf16>
    %317 = vector.shape_cast %316 : vector<1x1x4x92xbf16> to vector<4x92xbf16>
    %c0_504 = arith.constant 0 : index
    %c0_505 = arith.constant 0 : index
    %c0_506 = arith.constant 0 : index
    %c13_507 = arith.constant 13 : index
    %318 = vector.load %arg6[%c0_504, %c0_505, %c0_506, %c13_507] : memref<1x1x4x144xbf16, #tpu.memory_space<vmem>>, vector<1x1x4x92xbf16>
    %319 = vector.shape_cast %318 : vector<1x1x4x92xbf16> to vector<4x92xbf16>
    %c0_508 = arith.constant 0 : index
    %c0_509 = arith.constant 0 : index
    %c0_510 = arith.constant 0 : index
    %c14_511 = arith.constant 14 : index
    %320 = vector.load %arg6[%c0_508, %c0_509, %c0_510, %c14_511] : memref<1x1x4x144xbf16, #tpu.memory_space<vmem>>, vector<1x1x4x92xbf16>
    %321 = vector.shape_cast %320 : vector<1x1x4x92xbf16> to vector<4x92xbf16>
    %c0_512 = arith.constant 0 : index
    %c0_513 = arith.constant 0 : index
    %c0_514 = arith.constant 0 : index
    %c15_515 = arith.constant 15 : index
    %322 = vector.load %arg6[%c0_512, %c0_513, %c0_514, %c15_515] : memref<1x1x4x144xbf16, #tpu.memory_space<vmem>>, vector<1x1x4x92xbf16>
    %323 = vector.shape_cast %322 : vector<1x1x4x92xbf16> to vector<4x92xbf16>
    %c0_516 = arith.constant 0 : index
    %c0_517 = arith.constant 0 : index
    %c0_518 = arith.constant 0 : index
    %c16_519 = arith.constant 16 : index
    %324 = vector.load %arg6[%c0_516, %c0_517, %c0_518, %c16_519] : memref<1x1x4x144xbf16, #tpu.memory_space<vmem>>, vector<1x1x4x92xbf16>
    %325 = vector.shape_cast %324 : vector<1x1x4x92xbf16> to vector<4x92xbf16>
    %326 = tpu.concatenate %317, %319, %321, %323, %325 in 0 : vector<4x92xbf16>, vector<4x92xbf16>, vector<4x92xbf16>, vector<4x92xbf16>, vector<4x92xbf16> -> vector<20x92xbf16>
    %c4_520 = arith.constant 4 : index
    %c1_521 = arith.constant 1 : index
    %c0_522 = arith.constant 0 : index
    %c0_523 = arith.constant 0 : index
    %327 = vector.load %arg7[%c4_520, %c1_521, %c0_522, %c0_523] : memref<5x5x8x20xbf16, #tpu.memory_space<vmem>>, vector<1x1x8x20xbf16>
    %328 = vector.shape_cast %327 : vector<1x1x8x20xbf16> to vector<8x20xbf16>
    %cst_524 = arith.constant dense<0.000000e+00> : vector<8x92xf32>
    %329 = tpu.matmul %328, %326, %cst_524 {dimension_numbers = #tpu.dot_dimension_numbers<[1], [0], [0], [1], [0, 0, 1, 1], [], []>} : vector<8x20xbf16>, vector<20x92xbf16>, vector<8x92xf32> -> vector<8x92xf32>
    %330 = arith.addf %315, %329 : vector<8x92xf32>
    %c0_525 = arith.constant 0 : index
    %c0_526 = arith.constant 0 : index
    %c0_527 = arith.constant 0 : index
    %c24_528 = arith.constant 24 : index
    %331 = vector.load %arg6[%c0_525, %c0_526, %c0_527, %c24_528] : memref<1x1x4x144xbf16, #tpu.memory_space<vmem>>, vector<1x1x4x92xbf16>
    %332 = vector.shape_cast %331 : vector<1x1x4x92xbf16> to vector<4x92xbf16>
    %c0_529 = arith.constant 0 : index
    %c0_530 = arith.constant 0 : index
    %c0_531 = arith.constant 0 : index
    %c25_532 = arith.constant 25 : index
    %333 = vector.load %arg6[%c0_529, %c0_530, %c0_531, %c25_532] : memref<1x1x4x144xbf16, #tpu.memory_space<vmem>>, vector<1x1x4x92xbf16>
    %334 = vector.shape_cast %333 : vector<1x1x4x92xbf16> to vector<4x92xbf16>
    %c0_533 = arith.constant 0 : index
    %c0_534 = arith.constant 0 : index
    %c0_535 = arith.constant 0 : index
    %c26_536 = arith.constant 26 : index
    %335 = vector.load %arg6[%c0_533, %c0_534, %c0_535, %c26_536] : memref<1x1x4x144xbf16, #tpu.memory_space<vmem>>, vector<1x1x4x92xbf16>
    %336 = vector.shape_cast %335 : vector<1x1x4x92xbf16> to vector<4x92xbf16>
    %c0_537 = arith.constant 0 : index
    %c0_538 = arith.constant 0 : index
    %c0_539 = arith.constant 0 : index
    %c27_540 = arith.constant 27 : index
    %337 = vector.load %arg6[%c0_537, %c0_538, %c0_539, %c27_540] : memref<1x1x4x144xbf16, #tpu.memory_space<vmem>>, vector<1x1x4x92xbf16>
    %338 = vector.shape_cast %337 : vector<1x1x4x92xbf16> to vector<4x92xbf16>
    %c0_541 = arith.constant 0 : index
    %c0_542 = arith.constant 0 : index
    %c0_543 = arith.constant 0 : index
    %c28_544 = arith.constant 28 : index
    %339 = vector.load %arg6[%c0_541, %c0_542, %c0_543, %c28_544] : memref<1x1x4x144xbf16, #tpu.memory_space<vmem>>, vector<1x1x4x92xbf16>
    %340 = vector.shape_cast %339 : vector<1x1x4x92xbf16> to vector<4x92xbf16>
    %341 = tpu.concatenate %332, %334, %336, %338, %340 in 0 : vector<4x92xbf16>, vector<4x92xbf16>, vector<4x92xbf16>, vector<4x92xbf16>, vector<4x92xbf16> -> vector<20x92xbf16>
    %c4_545 = arith.constant 4 : index
    %c2_546 = arith.constant 2 : index
    %c0_547 = arith.constant 0 : index
    %c0_548 = arith.constant 0 : index
    %342 = vector.load %arg7[%c4_545, %c2_546, %c0_547, %c0_548] : memref<5x5x8x20xbf16, #tpu.memory_space<vmem>>, vector<1x1x8x20xbf16>
    %343 = vector.shape_cast %342 : vector<1x1x8x20xbf16> to vector<8x20xbf16>
    %cst_549 = arith.constant dense<0.000000e+00> : vector<8x92xf32>
    %344 = tpu.matmul %343, %341, %cst_549 {dimension_numbers = #tpu.dot_dimension_numbers<[1], [0], [0], [1], [0, 0, 1, 1], [], []>} : vector<8x20xbf16>, vector<20x92xbf16>, vector<8x92xf32> -> vector<8x92xf32>
    %345 = arith.addf %330, %344 : vector<8x92xf32>
    %c0_550 = arith.constant 0 : index
    %c0_551 = arith.constant 0 : index
    %c0_552 = arith.constant 0 : index
    %c36_553 = arith.constant 36 : index
    %346 = vector.load %arg6[%c0_550, %c0_551, %c0_552, %c36_553] : memref<1x1x4x144xbf16, #tpu.memory_space<vmem>>, vector<1x1x4x92xbf16>
    %347 = vector.shape_cast %346 : vector<1x1x4x92xbf16> to vector<4x92xbf16>
    %c0_554 = arith.constant 0 : index
    %c0_555 = arith.constant 0 : index
    %c0_556 = arith.constant 0 : index
    %c37_557 = arith.constant 37 : index
    %348 = vector.load %arg6[%c0_554, %c0_555, %c0_556, %c37_557] : memref<1x1x4x144xbf16, #tpu.memory_space<vmem>>, vector<1x1x4x92xbf16>
    %349 = vector.shape_cast %348 : vector<1x1x4x92xbf16> to vector<4x92xbf16>
    %c0_558 = arith.constant 0 : index
    %c0_559 = arith.constant 0 : index
    %c0_560 = arith.constant 0 : index
    %c38_561 = arith.constant 38 : index
    %350 = vector.load %arg6[%c0_558, %c0_559, %c0_560, %c38_561] : memref<1x1x4x144xbf16, #tpu.memory_space<vmem>>, vector<1x1x4x92xbf16>
    %351 = vector.shape_cast %350 : vector<1x1x4x92xbf16> to vector<4x92xbf16>
    %c0_562 = arith.constant 0 : index
    %c0_563 = arith.constant 0 : index
    %c0_564 = arith.constant 0 : index
    %c39_565 = arith.constant 39 : index
    %352 = vector.load %arg6[%c0_562, %c0_563, %c0_564, %c39_565] : memref<1x1x4x144xbf16, #tpu.memory_space<vmem>>, vector<1x1x4x92xbf16>
    %353 = vector.shape_cast %352 : vector<1x1x4x92xbf16> to vector<4x92xbf16>
    %c0_566 = arith.constant 0 : index
    %c0_567 = arith.constant 0 : index
    %c0_568 = arith.constant 0 : index
    %c40_569 = arith.constant 40 : index
    %354 = vector.load %arg6[%c0_566, %c0_567, %c0_568, %c40_569] : memref<1x1x4x144xbf16, #tpu.memory_space<vmem>>, vector<1x1x4x92xbf16>
    %355 = vector.shape_cast %354 : vector<1x1x4x92xbf16> to vector<4x92xbf16>
    %356 = tpu.concatenate %347, %349, %351, %353, %355 in 0 : vector<4x92xbf16>, vector<4x92xbf16>, vector<4x92xbf16>, vector<4x92xbf16>, vector<4x92xbf16> -> vector<20x92xbf16>
    %c4_570 = arith.constant 4 : index
    %c3_571 = arith.constant 3 : index
    %c0_572 = arith.constant 0 : index
    %c0_573 = arith.constant 0 : index
    %357 = vector.load %arg7[%c4_570, %c3_571, %c0_572, %c0_573] : memref<5x5x8x20xbf16, #tpu.memory_space<vmem>>, vector<1x1x8x20xbf16>
    %358 = vector.shape_cast %357 : vector<1x1x8x20xbf16> to vector<8x20xbf16>
    %cst_574 = arith.constant dense<0.000000e+00> : vector<8x92xf32>
    %359 = tpu.matmul %358, %356, %cst_574 {dimension_numbers = #tpu.dot_dimension_numbers<[1], [0], [0], [1], [0, 0, 1, 1], [], []>} : vector<8x20xbf16>, vector<20x92xbf16>, vector<8x92xf32> -> vector<8x92xf32>
    %360 = arith.addf %345, %359 : vector<8x92xf32>
    %c0_575 = arith.constant 0 : index
    %c0_576 = arith.constant 0 : index
    %c0_577 = arith.constant 0 : index
    %c48_578 = arith.constant 48 : index
    %361 = vector.load %arg6[%c0_575, %c0_576, %c0_577, %c48_578] : memref<1x1x4x144xbf16, #tpu.memory_space<vmem>>, vector<1x1x4x92xbf16>
    %362 = vector.shape_cast %361 : vector<1x1x4x92xbf16> to vector<4x92xbf16>
    %c0_579 = arith.constant 0 : index
    %c0_580 = arith.constant 0 : index
    %c0_581 = arith.constant 0 : index
    %c49_582 = arith.constant 49 : index
    %363 = vector.load %arg6[%c0_579, %c0_580, %c0_581, %c49_582] : memref<1x1x4x144xbf16, #tpu.memory_space<vmem>>, vector<1x1x4x92xbf16>
    %364 = vector.shape_cast %363 : vector<1x1x4x92xbf16> to vector<4x92xbf16>
    %c0_583 = arith.constant 0 : index
    %c0_584 = arith.constant 0 : index
    %c0_585 = arith.constant 0 : index
    %c50_586 = arith.constant 50 : index
    %365 = vector.load %arg6[%c0_583, %c0_584, %c0_585, %c50_586] : memref<1x1x4x144xbf16, #tpu.memory_space<vmem>>, vector<1x1x4x92xbf16>
    %366 = vector.shape_cast %365 : vector<1x1x4x92xbf16> to vector<4x92xbf16>
    %c0_587 = arith.constant 0 : index
    %c0_588 = arith.constant 0 : index
    %c0_589 = arith.constant 0 : index
    %c51_590 = arith.constant 51 : index
    %367 = vector.load %arg6[%c0_587, %c0_588, %c0_589, %c51_590] : memref<1x1x4x144xbf16, #tpu.memory_space<vmem>>, vector<1x1x4x92xbf16>
    %368 = vector.shape_cast %367 : vector<1x1x4x92xbf16> to vector<4x92xbf16>
    %c0_591 = arith.constant 0 : index
    %c0_592 = arith.constant 0 : index
    %c0_593 = arith.constant 0 : index
    %c52_594 = arith.constant 52 : index
    %369 = vector.load %arg6[%c0_591, %c0_592, %c0_593, %c52_594] : memref<1x1x4x144xbf16, #tpu.memory_space<vmem>>, vector<1x1x4x92xbf16>
    %370 = vector.shape_cast %369 : vector<1x1x4x92xbf16> to vector<4x92xbf16>
    %371 = tpu.concatenate %362, %364, %366, %368, %370 in 0 : vector<4x92xbf16>, vector<4x92xbf16>, vector<4x92xbf16>, vector<4x92xbf16>, vector<4x92xbf16> -> vector<20x92xbf16>
    %c4_595 = arith.constant 4 : index
    %c4_596 = arith.constant 4 : index
    %c0_597 = arith.constant 0 : index
    %c0_598 = arith.constant 0 : index
    %372 = vector.load %arg7[%c4_595, %c4_596, %c0_597, %c0_598] : memref<5x5x8x20xbf16, #tpu.memory_space<vmem>>, vector<1x1x8x20xbf16>
    %373 = vector.shape_cast %372 : vector<1x1x8x20xbf16> to vector<8x20xbf16>
    %cst_599 = arith.constant dense<0.000000e+00> : vector<8x92xf32>
    %374 = tpu.matmul %373, %371, %cst_599 {dimension_numbers = #tpu.dot_dimension_numbers<[1], [0], [0], [1], [0, 0, 1, 1], [], []>} : vector<8x20xbf16>, vector<20x92xbf16>, vector<8x92xf32> -> vector<8x92xf32>
    %375 = arith.addf %360, %374 : vector<8x92xf32>
    %376 = vector.extract_strided_slice %375 {offsets = [0, 0], sizes = [2, 92], strides = [1, 1]} : vector<8x92xf32> to vector<2x92xf32>
    %377 = arith.truncf %376 : vector<2x92xf32> to vector<2x92xbf16>
    %c0_600 = arith.constant 0 : index
    %c0_601 = arith.constant 0 : index
    %c0_602 = arith.constant 0 : index
    %c0_603 = arith.constant 0 : index
    %378 = vector.load %arg9[%c0_600, %c0_601, %c0_602, %c0_603] : memref<1x1x2x92xbf16, #tpu.memory_space<vmem>>, vector<1x1x2x92xbf16>
    %379 = vector.shape_cast %378 : vector<1x1x2x92xbf16> to vector<2x92xbf16>
    %380 = vector.shape_cast %377 : vector<2x92xbf16> to vector<1x1x2x92xbf16>
    tpu.vector_store %arg9[%c0_600, %c0_601, %c0_602, %c0_603], %380 {strides = array<i32>} : memref<1x1x2x92xbf16, #tpu.memory_space<vmem>>, vector<1x1x2x92xbf16>,
    %c0_604 = arith.constant 0 : index
    %c0_605 = arith.constant 0 : index
    %381 = vector.load %arg8[%c0_604, %c0_605] : memref<1x92xf32, #tpu.memory_space<vmem>>, vector<1x92xf32>
    %382 = vector.broadcast %381 : vector<1x92xf32> to vector<2x92xf32>
    %383 = arith.mulf %376, %382 : vector<2x92xf32>
    %cst_606 = arith.constant dense<0.000000e+00> : vector<2xf32>
    %384 = vector.multi_reduction <add>, %383, %cst_606 [1] : vector<2x92xf32> to vector<2xf32>
    %385 = vector.shape_cast %384 : vector<2xf32> to vector<2x1xf32>
    %c0_607 = arith.constant 0 : index
    %c0_608 = arith.constant 0 : index
    %c0_609 = arith.constant 0 : index
    %c0_610 = arith.constant 0 : index
    %386 = vector.load %arg10[%c0_607, %c0_608, %c0_609, %c0_610] : memref<1x1x2x1xf32, #tpu.memory_space<vmem>>, vector<1x1x2x1xf32>
    %387 = vector.shape_cast %386 : vector<1x1x2x1xf32> to vector<2x1xf32>
    %388 = vector.shape_cast %385 : vector<2x1xf32> to vector<1x1x2x1xf32>
    tpu.vector_store %arg10[%c0_607, %c0_608, %c0_609, %c0_610], %388 {strides = array<i32>} : memref<1x1x2x1xf32, #tpu.memory_space<vmem>>, vector<1x1x2x1xf32>,
    %389 = arith.mulf %383, %376 : vector<2x92xf32>
    %cst_611 = arith.constant dense<0.000000e+00> : vector<2xf32>
    %390 = vector.multi_reduction <add>, %389, %cst_611 [1] : vector<2x92xf32> to vector<2xf32>
    %391 = vector.shape_cast %390 : vector<2xf32> to vector<2x1xf32>
    %c0_612 = arith.constant 0 : index
    %c0_613 = arith.constant 0 : index
    %c0_614 = arith.constant 0 : index
    %c0_615 = arith.constant 0 : index
    %392 = vector.load %arg11[%c0_612, %c0_613, %c0_614, %c0_615] : memref<1x1x2x1xf32, #tpu.memory_space<vmem>>, vector<1x1x2x1xf32>
    %393 = vector.shape_cast %392 : vector<1x1x2x1xf32> to vector<2x1xf32>
    %394 = vector.shape_cast %391 : vector<2x1xf32> to vector<1x1x2x1xf32>
    tpu.vector_store %arg11[%c0_612, %c0_613, %c0_614, %c0_615], %394 {strides = array<i32>} : memref<1x1x2x1xf32, #tpu.memory_space<vmem>>, vector<1x1x2x1xf32>,
    return
  }
  func.func @transform_0(%arg0: i32, %arg1: i32) -> (i32, i32, i32, i32) {
    %c0_i32 = arith.constant 0 : i32
    %0 = arith.addi %arg1, %c0_i32 : i32
    %c0_i32_0 = arith.constant 0 : i32
    %c0_i32_1 = arith.constant 0 : i32
    %c0_i32_2 = arith.constant 0 : i32
    return %arg0, %0, %c0_i32_0, %c0_i32_1 : i32, i32, i32, i32
  }
  func.func @transform_1(%arg0: i32, %arg1: i32) -> (i32, i32, i32, i32) {
    %c1_i32 = arith.constant 1 : i32
    %0 = arith.addi %arg1, %c1_i32 : i32
    %c0_i32 = arith.constant 0 : i32
    %c0_i32_0 = arith.constant 0 : i32
    %c0_i32_1 = arith.constant 0 : i32
    return %arg0, %0, %c0_i32, %c0_i32_0 : i32, i32, i32, i32
  }
  func.func @transform_2(%arg0: i32, %arg1: i32) -> (i32, i32, i32, i32) {
    %c2_i32 = arith.constant 2 : i32
    %0 = arith.addi %arg1, %c2_i32 : i32
    %c0_i32 = arith.constant 0 : i32
    %c0_i32_0 = arith.constant 0 : i32
    %c0_i32_1 = arith.constant 0 : i32
    return %arg0, %0, %c0_i32, %c0_i32_0 : i32, i32, i32, i32
  }
  func.func @transform_3(%arg0: i32, %arg1: i32) -> (i32, i32, i32, i32) {
    %c3_i32 = arith.constant 3 : i32
    %0 = arith.addi %arg1, %c3_i32 : i32
    %c0_i32 = arith.constant 0 : i32
    %c0_i32_0 = arith.constant 0 : i32
    %c0_i32_1 = arith.constant 0 : i32
    return %arg0, %0, %c0_i32, %c0_i32_0 : i32, i32, i32, i32
  }
  func.func @transform_4(%arg0: i32, %arg1: i32) -> (i32, i32, i32, i32) {
    %c4_i32 = arith.constant 4 : i32
    %0 = arith.addi %arg1, %c4_i32 : i32
    %c0_i32 = arith.constant 0 : i32
    %c0_i32_0 = arith.constant 0 : i32
    %c0_i32_1 = arith.constant 0 : i32
    return %arg0, %0, %c0_i32, %c0_i32_0 : i32, i32, i32, i32
  }
  func.func @transform_5(%arg0: i32, %arg1: i32) -> (i32, i32, i32, i32) {
    %c0_i32 = arith.constant 0 : i32
    %c0_i32_0 = arith.constant 0 : i32
    %c0_i32_1 = arith.constant 0 : i32
    %c0_i32_2 = arith.constant 0 : i32
    %c0_i32_3 = arith.constant 0 : i32
    return %c0_i32, %c0_i32_0, %c0_i32_1, %c0_i32_2 : i32, i32, i32, i32
  }
  func.func @transform_6(%arg0: i32, %arg1: i32) -> (i32, i32) {
    %c0_i32 = arith.constant 0 : i32
    %c0_i32_0 = arith.constant 0 : i32
    %c0_i32_1 = arith.constant 0 : i32
    return %c0_i32, %c0_i32_0 : i32, i32
  }
  func.func @transform_7(%arg0: i32, %arg1: i32) -> (i32, i32, i32, i32) {
    %c0_i32 = arith.constant 0 : i32
    %c0_i32_0 = arith.constant 0 : i32
    %c0_i32_1 = arith.constant 0 : i32
    return %arg0, %arg1, %c0_i32, %c0_i32_0 : i32, i32, i32, i32
  }
  func.func @transform_8(%arg0: i32, %arg1: i32) -> (i32, i32, i32, i32) {
    %c0_i32 = arith.constant 0 : i32
    %c0_i32_0 = arith.constant 0 : i32
    %c0_i32_1 = arith.constant 0 : i32
    return %arg0, %arg1, %c0_i32, %c0_i32_0 : i32, i32, i32, i32
  }
  func.func @transform_9(%arg0: i32, %arg1: i32) -> (i32, i32, i32, i32) {
    %c0_i32 = arith.constant 0 : i32
    %c0_i32_0 = arith.constant 0 : i32
    %c0_i32_1 = arith.constant 0 : i32
    return %arg0, %arg1, %c0_i32, %c0_i32_0 : i32, i32, i32, i32
  }
}

module attributes {stable_mosaic.version = 11 : i64} {
  func.func @_bn_sigmoid_kernel(%arg0: i32, %arg1: i32, %arg2: memref<1x8x2x92xbf16, #tpu.memory_space<vmem>>, %arg3: memref<2x1xf32, #tpu.memory_space<vmem>>, %arg4: memref<2x1xf32, #tpu.memory_space<vmem>>, %arg5: memref<1x8x2x92xf32, #tpu.memory_space<vmem>>) attributes {dimension_semantics = [#tpu.dimension_semantics<parallel>, #tpu.dimension_semantics<parallel>], iteration_bounds = array<i64: 2, 1>, scalar_prefetch = 0 : i64, scratch_operands = 0 : i64, tpu.core_type = #tpu.core_type<tc>, window_params = [{transform_indices = @transform_0, window_bounds = array<i64: 1, 8, 2, 92>}, {pipeline_mode = #tpu.pipeline_mode<synchronous>, transform_indices = @transform_1, window_bounds = array<i64: 2, 1>}, {pipeline_mode = #tpu.pipeline_mode<synchronous>, transform_indices = @transform_2, window_bounds = array<i64: 2, 1>}, {transform_indices = @transform_3, window_bounds = array<i64: 1, 8, 2, 92>}]} {
    %c0 = arith.constant 0 : index
    %c0_0 = arith.constant 0 : index
    %c0_1 = arith.constant 0 : index
    %c0_2 = arith.constant 0 : index
    %0 = vector.load %arg2[%c0, %c0_0, %c0_1, %c0_2] : memref<1x8x2x92xbf16, #tpu.memory_space<vmem>>, vector<1x8x2x92xbf16>
    %1 = vector.shape_cast %0 : vector<1x8x2x92xbf16> to vector<8x2x92xbf16>
    %2 = arith.extf %1 : vector<8x2x92xbf16> to vector<8x2x92xf32>
    %c0_3 = arith.constant 0 : index
    %c0_4 = arith.constant 0 : index
    %3 = vector.load %arg3[%c0_3, %c0_4] : memref<2x1xf32, #tpu.memory_space<vmem>>, vector<2x1xf32>
    %4 = vector.shape_cast %3 : vector<2x1xf32> to vector<1x2x1xf32>
    %5 = vector.broadcast %4 : vector<1x2x1xf32> to vector<8x2x92xf32>
    %6 = arith.mulf %2, %5 : vector<8x2x92xf32>
    %c0_5 = arith.constant 0 : index
    %c0_6 = arith.constant 0 : index
    %7 = vector.load %arg4[%c0_5, %c0_6] : memref<2x1xf32, #tpu.memory_space<vmem>>, vector<2x1xf32>
    %8 = vector.shape_cast %7 : vector<2x1xf32> to vector<1x2x1xf32>
    %9 = vector.broadcast %8 : vector<1x2x1xf32> to vector<8x2x92xf32>
    %10 = arith.addf %6, %9 : vector<8x2x92xf32>
    %cst = arith.constant 0.000000e+00 : f32
    %11 = vector.broadcast %cst : f32 to vector<8x2x92xf32>
    %12 = arith.subf %11, %10 : vector<8x2x92xf32>
    %13 = math.exp %12 : vector<8x2x92xf32>
    %cst_7 = arith.constant 1.000000e+00 : f32
    %14 = vector.broadcast %cst_7 : f32 to vector<8x2x92xf32>
    %15 = arith.addf %14, %13 : vector<8x2x92xf32>
    %16 = tpu.reciprocal %15 {approx = true} : vector<8x2x92xf32> -> vector<8x2x92xf32>
    %c0_8 = arith.constant 0 : index
    %c0_9 = arith.constant 0 : index
    %c0_10 = arith.constant 0 : index
    %c0_11 = arith.constant 0 : index
    %17 = vector.load %arg5[%c0_8, %c0_9, %c0_10, %c0_11] : memref<1x8x2x92xf32, #tpu.memory_space<vmem>>, vector<1x8x2x92xf32>
    %18 = vector.shape_cast %17 : vector<1x8x2x92xf32> to vector<8x2x92xf32>
    %19 = vector.shape_cast %16 : vector<8x2x92xf32> to vector<1x8x2x92xf32>
    tpu.vector_store %arg5[%c0_8, %c0_9, %c0_10, %c0_11], %19 {strides = array<i32>} : memref<1x8x2x92xf32, #tpu.memory_space<vmem>>, vector<1x8x2x92xf32>,
    return
  }
  func.func @transform_0(%arg0: i32, %arg1: i32) -> (i32, i32, i32, i32) {
    %c0_i32 = arith.constant 0 : i32
    %c0_i32_0 = arith.constant 0 : i32
    %c0_i32_1 = arith.constant 0 : i32
    return %arg0, %arg1, %c0_i32, %c0_i32_0 : i32, i32, i32, i32
  }
  func.func @transform_1(%arg0: i32, %arg1: i32) -> (i32, i32) {
    %c0_i32 = arith.constant 0 : i32
    %c0_i32_0 = arith.constant 0 : i32
    %c0_i32_1 = arith.constant 0 : i32
    return %c0_i32, %c0_i32_0 : i32, i32
  }
  func.func @transform_2(%arg0: i32, %arg1: i32) -> (i32, i32) {
    %c0_i32 = arith.constant 0 : i32
    %c0_i32_0 = arith.constant 0 : i32
    %c0_i32_1 = arith.constant 0 : i32
    return %c0_i32, %c0_i32_0 : i32, i32
  }
  func.func @transform_3(%arg0: i32, %arg1: i32) -> (i32, i32, i32, i32) {
    %c0_i32 = arith.constant 0 : i32
    %c0_i32_0 = arith.constant 0 : i32
    %c0_i32_1 = arith.constant 0 : i32
    return %arg0, %arg1, %c0_i32, %c0_i32_0 : i32, i32, i32, i32
  }
}

</mosaic_0001>

<bundles_post_ra>
// kernel: vnet_output_transition.3
= control target key start
LH: loop header
LB: loop body
LE: loop exit
PB: predicated region body
PF: predicated region fallthrough
CT: control target
= control target key end

     0   :  { %s498_s12 = smov 0   ;;  %s500_s13 = smov 0   ;;  %s549_s0 = inlined_call_operand.vmem [shape: bf16[2,8,2,92], index: 0, kind: input, shape index: {}]   ;;  %s550_s1 = inlined_call_operand.vmem [shape: f32[2,1], index: 1, kind: input, shape index: {}]   ;;  %s551_s2 = inlined_call_operand.vmem [shape: f32[2,1], index: 2, kind: input, shape index: {}]   ;;  %s552_s3 = inlined_call_operand.vmem [shape: f32[2,8,2,92], index: 3, kind: output, shape index: {}]  }
   0x1   :  { %s502_s14 = smov 0  }
   0x2 LB: > { %s25_s15 = sadd.s32 1, %s471_s13  ;;  %p388_p0 = scmp.ge.s32.totalorder %s475_s14, 1  ;;  %s475_s14 = sphi %s502_s14, %s13_s14   ;;  %s471_s13 = sphi %s500_s13, %s554_s13   ;;  %s467_s12 = sphi %s498_s12, %s553_s12  }
   0x3   : > { %p27_p1 = scmp.ge.s32.totalorder %s25_s15, 2  ;;  %p157_p2 = scmp.lt.s32.totalorder %s475_s14, 3 }
   0x5   : > { %s556_s15 = smov (%p27_p1, %s25_s15), 0  ;;  %p158_p3 = pnand %p388_p0, %p157_p2 }
   0x6   : > { %v223_v0 = vld [vmem:[%s550_s1] sm:$0x3] (!%p158_p3)  ;;  %v477_v1 = vmov (!%p158_p3), 0   ;;  %p189_p4 = scmp.lt.s32.totalorder (!%p158_p3), %s467_s12, 1  ;;  %vm291_vm0 = vcmask (!%p158_p3), 746496  }
   0x7   : > { %161 = sbr.rel (%p158_p3) target bundleno = 178 (0xb2), region = 32  ;;  %420 = vset.pattern.permute.xlu0 (!%p158_p3), %v477_v1  ;;  %v237_v2 = vld [vmem:[%s551_s2] sm:$0x3] (!%p158_p3) }
   0x8   : > { %226 = vperm.xlu0 (!%p158_p3), %420, %v223_v0  }
   0xc   : > { %240 = vperm.xlu0 (!%p158_p3), %420, %v237_v2  }
   0xe   : > { %s558_s12 = smov (!%p189_p4, %s467_s12), 1 }
   0xf   : > { %s389_s20 = sshll.u32 %s558_s12, 3  ;;  %s394_s24 = sshll.u32 %s558_s12, 4 }
  0x10   : > { %s195_s23 = scalar_lea.vmem %s549_s0, %s389_s20  ;;  %s205_s27 = scalar_lea.vmem %s552_s3, %s394_s24 }
  0x11   : > { %v207_v3 = vld [vmem:[%s195_s23] sm:$0x1]  ;;  %v208_v4 = vld [vmem:[%s195_s23 + $0x1] sm:$0x1]  ;;  %v209_v5 = vld [vmem:[%s195_s23 + $0x2] sm:$0x1] }
  0x12   : > { %v210_v6 = vld [vmem:[%s195_s23 + $0x3] sm:$0x1]  ;;  %v211_v7 = vld [vmem:[%s195_s23 + $0x4] sm:$0x1]  ;;  %v212_v8 = vld [vmem:[%s195_s23 + $0x5] sm:$0x1]  ;;  %v215_v11 = vunpack.c.l.bf16 %v207_v3  ;;  %v216_v12 = vunpack.c.l.bf16 %v208_v4  ;;  %v217_v13 = vunpack.c.l.bf16 %v209_v5 }
  0x13   : > { %v213_v9 = vld [vmem:[%s195_s23 + $0x6] sm:$0x1]  ;;  %v214_v10 = vld [vmem:[%s195_s23 + $0x7] sm:$0x1]  ;;  %v218_v14 = vunpack.c.l.bf16 %v210_v6  ;;  %v219_v16 = vunpack.c.l.bf16 %v211_v7  ;;  %v220_v17 = vunpack.c.l.bf16 %v212_v8 }
  0x14   : > { %v221_v18 = vunpack.c.l.bf16 %v213_v9  ;;  %v222_v19 = vunpack.c.l.bf16 %v214_v10 }
  0x87   : > { %v227_v15 = vpop.permute.xlu0 %226 }
  0x88   : > { %v229_v20 = vmul.f32 %v227_v15, %v215_v11  ;;  %v230_v21 = vmul.f32 %v227_v15, %v216_v12  ;;  %v231_v22 = vmul.f32 %v227_v15, %v217_v13  ;;  %v232_v23 = vmul.f32 %v227_v15, %v218_v14 }
  0x89   : > { %v233_v25 = vmul.f32 %v227_v15, %v219_v16  ;;  %v234_v26 = vmul.f32 %v227_v15, %v220_v17  ;;  %v235_v27 = vmul.f32 %v227_v15, %v221_v18  ;;  %v236_v28 = vmul.f32 %v227_v15, %v222_v19 }
  0x8b   : > { %v241_v24 = vpop.permute.xlu0 %240 }
  0x8c   : > { %v243_v29 = vadd.f32 %v241_v24, %v229_v20  ;;  %v244_v30 = vadd.f32 %v241_v24, %v230_v21  ;;  %v245_v31 = vadd.f32 %v241_v24, %v231_v22  ;;  %v246_v32 = vadd.f32 %v241_v24, %v232_v23 }
  0x8d   : > { %v247_v33 = vadd.f32 %v241_v24, %v233_v25  ;;  %v248_v34 = vadd.f32 %v241_v24, %v234_v26  ;;  %v249_v35 = vadd.f32 %v241_v24, %v235_v27  ;;  %v250_v36 = vadd.f32 %v241_v24, %v236_v28 }
  0x8e   : > { %v251_v37 = vsub.f32 0.0, %v243_v29  ;;  %v252_v38 = vsub.f32 0.0, %v244_v30  ;;  %v253_v39 = vsub.f32 0.0, %v245_v31  ;;  %v254_v40 = vsub.f32 0.0, %v246_v32 }
  0x8f   : > { %v255_v41 = vsub.f32 0.0, %v247_v33  ;;  %v256_v42 = vsub.f32 0.0, %v248_v34  ;;  %v257_v43 = vsub.f32 0.0, %v249_v35  ;;  %v258_v47 = vsub.f32 0.0, %v250_v36 }
  0x90   : > { %v259_v44 = vmul.f32 1.442695, %v251_v37  ;;  %v261_v45 = vmul.f32 1.442695, %v252_v38  ;;  %v263_v46 = vmul.f32 1.442695, %v253_v39 }
  0x91   : > { %v265_v48 = vmul.f32 1.442695, %v254_v40  ;;  %v267_v49 = vmul.f32 1.442695, %v255_v41  ;;  %v269_v50 = vmul.f32 1.442695, %v256_v42 }
  0x92   : > { %421 = vpow2.f32 %v259_v44  ;;  %v271_v51 = vmul.f32 1.442695, %v257_v43  ;;  %v273_v52 = vmul.f32 1.442695, %v258_v47 }
  0x93   : > { %423 = vpow2.f32 %v261_v45 }
  0x94   : > { %425 = vpow2.f32 %v263_v46 }
  0x95   : > { %427 = vpow2.f32 %v265_v48 }
  0x96   : > { %429 = vpow2.f32 %v267_v49 }
  0x97   : > { %431 = vpow2.f32 %v269_v50 }
  0x98   : > { %433 = vpow2.f32 %v271_v51 }
  0x99   : > { %435 = vpow2.f32 %v273_v52 }
  0x9c   : > { %v422_v53 = vpop.eup %421 }
  0x9d   : > { %v424_v54 = vpop.eup %423  ;;  %v275_v55 = vadd.f32 1.0, %v422_v53 }
  0x9e   : > { %v426_v56 = vpop.eup %425  ;;  %v276_v57 = vadd.f32 1.0, %v424_v54 }
  0x9f   : > { %v428_v58 = vpop.eup %427  ;;  %v277_v59 = vadd.f32 1.0, %v426_v56  ;;  %437 = vrcp.f32 %v275_v55 }
  0xa0   : > { %v430_v60 = vpop.eup %429  ;;  %v278_v61 = vadd.f32 1.0, %v428_v58  ;;  %439 = vrcp.f32 %v276_v57 }
  0xa1   : > { %v432_v62 = vpop.eup %431  ;;  %v279_v63 = vadd.f32 1.0, %v430_v60  ;;  %441 = vrcp.f32 %v277_v59 }
  0xa2   : > { %v434_v0 = vpop.eup %433  ;;  %v280_v1 = vadd.f32 1.0, %v432_v62  ;;  %443 = vrcp.f32 %v278_v61 }
  0xa3   : > { %v436_v2 = vpop.eup %435  ;;  %v281_v3 = vadd.f32 1.0, %v434_v0  ;;  %445 = vrcp.f32 %v279_v63 }
  0xa4   : > { %v282_v4 = vadd.f32 1.0, %v436_v2  ;;  %447 = vrcp.f32 %v280_v1 }
  0xa5   : > { %449 = vrcp.f32 %v281_v3 }
  0xa6   : > { %451 = vrcp.f32 %v282_v4 }
  0xa9   : > { %v438_v5 = vpop.eup %437 }
  0xaa   : > { %v440_v6 = vpop.eup %439  ;;  %292 = vst.msk [vmem:[%s205_s27] sm:$0x3] %vm291_vm0, %v438_v5 }
  0xab   : > { %v442_v7 = vpop.eup %441  ;;  %293 = vst.msk [vmem:[%s205_s27 + $0x2] sm:$0x3] %vm291_vm0, %v440_v6 }
  0xac   : > { %v444_v8 = vpop.eup %443  ;;  %294 = vst.msk [vmem:[%s205_s27 + $0x4] sm:$0x3] %vm291_vm0, %v442_v7 }
  0xad   : > { %v446_v9 = vpop.eup %445  ;;  %295 = vst.msk [vmem:[%s205_s27 + $0x6] sm:$0x3] %vm291_vm0, %v444_v8 }
  0xae   : > { %v448_v10 = vpop.eup %447  ;;  %296 = vst.msk [vmem:[%s205_s27 + $0x8] sm:$0x3] %vm291_vm0, %v446_v9 }
  0xaf   : > { %v450_v11 = vpop.eup %449  ;;  %297 = vst.msk [vmem:[%s205_s27 + $0xa] sm:$0x3] %vm291_vm0, %v448_v10 }
  0xb0   : > { %v452_v12 = vpop.eup %451  ;;  %298 = vst.msk [vmem:[%s205_s27 + $0xc] sm:$0x3] %vm291_vm0, %v450_v11 }
  0xb1   : > { %299 = vst.msk [vmem:[%s205_s27 + $0xe] sm:$0x3] %vm291_vm0, %v452_v12 }
  0xb2 PF: > { %s13_s14 = sadd.s32 1, %s475_s14   ;;  %s553_s12 = smov %s471_s13 }
  0xb3   : > { %p10_p5 = scmp.ge.s32.totalorder %s13_s14, 4   ;;  %s554_s13 = smov %s556_s15 }
  0xb5   :  { %12 = sbr.rel (!%p10_p5) target bundleno = 2 (0x2), region = 62 }

// kernel: vnet_output_transition.2
= control target key start
LH: loop header
LB: loop body
LE: loop exit
PB: predicated region body
PF: predicated region fallthrough
CT: control target
= control target key end

     0   :  { %s3858_s30 = smov 0   ;;  %s3860_s10 = smov 0   ;;  %s4867_s0 = inlined_call_operand.vmem [shape: bf16[2,12,4,144], index: 0, kind: input, shape index: {}, may-alias: {0,1,2,3,4}]   ;;  %s4868_s1 = inlined_call_operand.vmem [shape: bf16[2,12,4,144], index: 1, kind: input, shape index: {}, may-alias: {0,1,2,3,4}]   ;;  %s4869_s2 = inlined_call_operand.vmem [shape: bf16[2,12,4,144], index: 2, kind: input, shape index: {}, may-alias: {0,1,2,3,4}]   ;;  %s4870_s3 = inlined_call_operand.vmem [shape: bf16[2,12,4,144], index: 3, kind: input, shape index: {}, may-alias: {0,1,2,3,4}]   ;;  %s4871_s4 = inlined_call_operand.vmem [shape: bf16[2,12,4,144], index: 4, kind: input, shape index: {}, may-alias: {0,1,2,3,4}]   ;;  %s4872_s5 = inlined_call_operand.vmem [shape: bf16[5,5,8,20], index: 5, kind: input, shape index: {}]   ;;  %s4873_s6 = inlined_call_operand.vmem [shape: f32[1,92], index: 6, kind: input, shape index: {}]   ;;  %s4874_s7 = inlined_call_operand.vmem [shape: bf16[2,8,2,92], index: 7, kind: output, shape index: {0}]   ;;  %s4875_s8 = inlined_call_operand.vmem [shape: f32[2,8,2,1], index: 8, kind: output, shape index: {1}]   ;;  %s4876_s9 = inlined_call_operand.vmem [shape: f32[2,8,2,1], index: 9, kind: output, shape index: {2}]  }
   0x1   :  { %4889 = sst [smem:[#allocation2_spill]] %s4867_s0  ;;  %s3862_s11 = smov 0  }
   0x2   :  { %s3864_s12 = smov 0   ;;  %s3866_s13 = smov 0  }
   0x3 LB: > { %s29_s14 = sadd.s32 1, %s3787_s11  ;;  %s32_s15 = sadd.s32 1, %s3791_s12  ;;  %s3795_s13 = sphi %s3866_s13, %s20_s13   ;;  %s3791_s12 = sphi %s3864_s12, %s4900_s12   ;;  %s3787_s11 = sphi %s3862_s11, %s4899_s11   ;;  %s3783_s10 = sphi %s3860_s10, %s4898_s10   ;;  %s3779_s30 = sphi %s3858_s30, %s4897_s30  }
   0x4   : > { %p30_p0 = scmp.ge.s32.totalorder %s29_s14, 8  ;;  %p3245_p1 = scmp.ge.s32.totalorder %s3795_s13, 1 }
   0x5   : > { %p396_p2 = scmp.lt.s32.totalorder %s3795_s13, 17 }
   0x6   : > { %s4902_s14 = smov (%p30_p0, %s29_s14), 0  ;;  %s4904_s15 = smov (!%p30_p0, %s32_s15), %s3791_s12 }
   0x7   : > { %p397_p3 = pnand %p3245_p1, %p396_p2  ;;  %p34_p4 = scmp.ge.s32.totalorder %s4904_s15, 2 }
   0x8   : > { %p494_p5 = scmp.lt.s32.totalorder (!%p397_p3), %s3783_s10, 1  ;;  %s514_s16 = sadd.s32 (!%p397_p3), 2, %s3779_s30  ;;  %v577_v0 = vlaneseq (!%p397_p3)  ;;  %v3797_v1 = vmov (!%p397_p3), 1983009808   ;;  %vm844_vm0 = vcmask (!%p397_p3), 1014784   ;;  %vm823_vm1 = vcmask (!%p397_p3), 1039360  }
   0x9   : > { %s4906_s15 = smov (%p34_p4, %s4904_s15), 0  ;;  %400 = sbr.rel (%p397_p3) target bundleno = 957 (0x3bd), region = 48 }
   0xa   : > { %p517_p6 = scmp.lt.s32.totalorder (!%p397_p3), %s514_s16, 11  ;;  %v575_v2 = vunpack.c.l.s4 (!%p397_p3), %v3797_v1  ;;  %v578_v3 = vshrl.u32 (!%p397_p3), %v577_v0, 7  ;;  %p496_p7 = scmp.lt.s32.totalorder (!%p397_p3), %s3779_s30, 11  ;;  %vm3805_vm2 = vmmov (!%p397_p3), 0   ;;  %vm598_vm3 = vcmask (!%p397_p3), 1041408  }
   0xb   : > { %s4877_s26 = smov (!%p397_p3), 124   ;;  %s4885_s29 = smov (!%p397_p3), 127   ;;  %vm602_vm4 = vcmask (!%p397_p3), 1043456   ;;  %vm830_vm5 = vcmask (!%p397_p3), 1031168   ;;  %vm605_vm6 = vcmask (!%p397_p3), 1045504   ;;  %vm837_vm7 = vcmask (!%p397_p3), 1022976  }
   0xc   : > { %v576_v4 = vunpack.c.0.s8 (!%p397_p3), %v575_v2  ;;  %s4890_s0 = sld [smem:[#allocation2_spill]] (!%p397_p3)  ;;  %s3801_s21 = smov (!%p397_p3), 125   ;;  %vm618_vm8 = vcmask (!%p397_p3), 162816   ;;  %vm975_vm9 = vcmask (!%p397_p3), 654336   ;;  %vm2969_vm10 = vcmask (!%p397_p3), 746496  }
   0xd   : > { %s525_s22 = sadd.s32 (!%p397_p3), 3, %s3779_s30  ;;  %p549_p11 = scmp.lt.s32.totalorder (!%p397_p3), %s3779_s30, 7  ;;  %vm2959_vm11 = vcmask (!%p397_p3), 745472   ;;  %vm2973_vm12 = vcmask (!%p397_p3), 1024  }
   0xe   : > { %v3897_v5 = vsub.s32 (!%p397_p3), %v576_v4, %v578_v3  ;;  %p528_p8 = scmp.lt.s32.totalorder (!%p397_p3), %s525_s22, 11 }
  0x10   : > { %s4908_s10 = smov (!%p494_p5, %s3783_s10), 1  ;;  %s4910_s16 = smov (!%p517_p6, %s514_s16), 11 }
  0x11   : > { %s3894_s17 = smul.u32 24, %s4908_s10  ;;  %s3250_s18 = sshll.u32 %s4910_s16, 1 }
  0x12   : > { %s497_s24 = scalar_select %p496_p7, %s3779_s30, 11 }
  0x13   : > { %s521_s19 = sadd.s32 %s3894_s17, %s3250_s18  ;;  %s4912_s22 = smov (!%p528_p8, %s525_s22), 11 }
  0x14   : > { %s3251_s20 = sshll.u32 %s521_s19, 1  ;;  %s3246_s25 = sshll.u32 %s497_s24, 1 }
  0x15   : > { %s3903_s23 = scalar_lea.vmem %s4869_s2, %s3251_s20  ;;  %s500_s27 = sadd.s32 %s3894_s17, %s3246_s25 }
  0x16   : > { %v3906_v6 = vld [vmem:[%s3903_s23] sm:$0x3]  ;;  %s3247_s28 = sshll.u32 %s500_s27, 1  ;;  %s3800_s20 = smov 126  }
  0x17   : > { %v1772_v7 = vld [vmem:[%s3903_s23] sm:$0xf]  ;;  %v1698_v8 = vrot.slane %v3906_v6, %v3897_v5  ;;  %v1684_v9 = vcombine.low %v3906_v6, %v3906_v6  ;;  %s3922_s19 = scalar_lea.vmem %s4890_s0, %s3247_s28  ;;  %s3252_s24 = sshll.u32 %s4912_s22, 1 }
  0x18   : > { %v1788_v10 = vrot.slane %v1772_v7, %v3897_v5  ;;  %v1774_v14 = vcombine.low %v1772_v7, %v1772_v7  ;;  %v3925_v15 = vld [vmem:[%s3922_s19] sm:$0x3]  ;;  %s532_s25 = sadd.s32 %s3894_s17, %s3252_s24  ;;  %s4887_s22 = smov 104  }
  0x19   : > { %1707 = vrot.lane.b32.xlu1 %v1698_v8, %s4877_s26  ;;  %v1691_v11 = vrot.slane %v1684_v9, %v3897_v5  ;;  %v1701_v13 = vcombine.low %v1698_v8, %v1698_v8  ;;  %v587_v16 = vrot.slane %v3925_v15, %v3897_v5  ;;  %v573_v19 = vcombine.low %v3925_v15, %v3925_v15  ;;  %v1875_v23 = vld [vmem:[%s3903_s23] sm:$0xf]  ;;  %s3253_s27 = sshll.u32 %s532_s25, 1  ;;  %s503_s24 = sadd.s32 1, %s3779_s30 }
  0x1a   : > { %v1795_v12 = vcombine.low %v1788_v10, %v1788_v10  ;;  %v1781_v18 = vrot.slane %v1774_v14, %v3897_v5  ;;  %v1885_v25 = vcombine.low %v1875_v23, %v1875_v23  ;;  %v1807_v28 = vcombine.high %v1788_v10, %v1788_v10  ;;  %v3961_v33 = vld [vmem:[%s3922_s19] sm:$0x3]  ;;  %s3987_s18 = scalar_lea.vmem %s4870_s3, %s3253_s27  ;;  %p506_p9 = scmp.lt.s32.totalorder %s503_s24, 11 }
  0x1b   : > { %1699 = vrot.lane.b32.xlu0 %v1691_v11, %s4885_s29  ;;  %v590_v17 = vcombine.low %v587_v16, %v587_v16  ;;  %v1704_v20 = vcombine.low %v1691_v11, %v1691_v11  ;;  %v580_v21 = vrot.slane %v573_v19, %v3897_v5  ;;  %v3950_v30 = vrot.slane %v1875_v23, %v3897_v5  ;;  %v801_v37 = vld [vmem:[%s3922_s19] sm:$0xf]  ;;  %s4881_s16 = smov 116  }
  0x1c   : > { %v1789_v22 = vcombine.high %v1781_v18, %v1781_v18  ;;  %v1801_v24 = vcombine.low %v1781_v18, %v1781_v18  ;;  %v1892_v27 = vrot.slane %v1885_v25, %v3897_v5  ;;  %v727_v35 = vrot.slane %v3961_v33, %v3897_v5  ;;  %v3992_v45 = vld [vmem:[%s3987_s18] sm:$0x3]  ;;  %s4914_s24 = smov (!%p506_p9, %s503_s24), 11 }
  0x1d   : > { %1796 = vrot.lane.b32.xlu1 %v1795_v12, %s3800_s20  ;;  %v593_v26 = vcombine.low %v580_v21, %v580_v21  ;;  %v1899_v31 = vcombine.low %v3950_v30, %v3950_v30  ;;  %v3966_v34 = vcombine.high %v3950_v30, %v3950_v30  ;;  %v713_v36 = vcombine.low %v3961_v33, %v3961_v33  ;;  %v908_v52 = vld [vmem:[%s3922_s19] sm:$0xf]  ;;  %s3248_s25 = sshll.u32 %s4914_s24, 1  ;;  %s536_s24 = sadd.s32 4, %s3779_s30 }
  0x1e   : > { %v1893_v29 = vcombine.high %v1892_v27, %v1892_v27  ;;  %v1905_v32 = vcombine.low %v1892_v27, %v1892_v27  ;;  %v730_v38 = vcombine.low %v727_v35, %v727_v35  ;;  %v803_v40 = vcombine.low %v801_v37, %v801_v37  ;;  %v4017_v59 = vld [vmem:[%s3987_s18] sm:$0x3]  ;;  %s510_s27 = sadd.s32 %s3894_s17, %s3248_s25  ;;  %s4891_s25 = smov 124  }
  0x1f   : > { %1702 = vrot.lane.b32.xlu0 %v1701_v13, %s3800_s20  ;;  %v720_v39 = vrot.slane %v713_v36, %v3897_v5  ;;  %v817_v44 = vrot.slane %v801_v37, %v3897_v5  ;;  %v2078_v47 = vcombine.low %v3992_v45, %v3992_v45  ;;  %v2092_v49 = vrot.slane %v3992_v45, %v3897_v5  ;;  %v2255_v2 = vld [vmem:[%s3987_s18] sm:$0xf]  ;;  %s3249_s28 = sshll.u32 %s510_s27, 1  ;;  %p539_p10 = scmp.lt.s32.totalorder %s536_s24, 11 }
  0x20   : > { %v810_v42 = vrot.slane %v803_v40, %v3897_v5  ;;  %v918_v54 = vcombine.low %v908_v52, %v908_v52  ;;  %v4014_v58 = vrot.slane %v908_v52, %v3897_v5  ;;  %v2167_v61 = vcombine.low %v4017_v59, %v4017_v59  ;;  %v4050_v11 = vld [vmem:[%s3987_s18] sm:$0xf]  ;;  %s4084_s27 = scalar_lea.vmem %s4868_s1, %s3249_s28  ;;  %s4879_s28 = smov 80  }
  0x21   : > { %591 = vrot.lane.b32.xlu1 %v590_v17, %s3800_s20  ;;  %v733_v41 = vcombine.low %v720_v39, %v720_v39  ;;  %v825_v46 = vcombine.low %v817_v44, %v817_v44  ;;  %v2085_v50 = vrot.slane %v2078_v47, %v3897_v5  ;;  %v2095_v51 = vcombine.low %v2092_v49, %v2092_v49  ;;  %s4916_s24 = smov (!%p539_p10, %s536_s24), 11  ;;  %s4918_s30 = smov (!%p549_p11, %s3779_s30), 7 }
  0x22   : > { %v818_v43 = vcombine.high %v810_v42, %v810_v42  ;;  %v832_v48 = vcombine.low %v810_v42, %v810_v42  ;;  %v839_v55 = vcombine.high %v817_v44, %v817_v44  ;;  %v925_v56 = vrot.slane %v918_v54, %v3897_v5 }
  0x23   : > { %1790 = vrot.lane.b32.xlu0 %v1781_v18, %s4885_s29  ;;  %v2098_v53 = vcombine.low %v2085_v50, %v2085_v50  ;;  %v932_v60 = vcombine.low %v4014_v58, %v4014_v58  ;;  %v2174_v63 = vrot.slane %v2167_v61, %v3897_v5  ;;  %v2181_v1 = vrot.slane %v4017_v59, %v3897_v5 }
  0x24   : > { %v926_v57 = vcombine.high %v925_v56, %v925_v56  ;;  %v938_v62 = vcombine.low %v925_v56, %v925_v56  ;;  %v4037_v3 = vcombine.high %v4014_v58, %v4014_v58  ;;  %v2257_v7 = vcombine.low %v2255_v2, %v2255_v2 }
  0x25   : > { %1705 = vrot.lane.b32.xlu1 %v1704_v20, %s3801_s21  ;;  %v2187_v0 = vcombine.low %v2174_v63, %v2174_v63  ;;  %v2184_v4 = vcombine.low %v2181_v1, %v2181_v1  ;;  %v2368_v13 = vcombine.low %v4050_v11, %v4050_v11 }
  0x26   : > { %v2264_v8 = vrot.slane %v2257_v7, %v3897_v5 }
  0x27   : > { %588 = vrot.lane.b32.xlu0 %v580_v21, %s4885_s29  ;;  %v4059_v17 = vrot.slane %v2368_v13, %v3897_v5 }
  0x28   : > { %v2272_v9 = vcombine.high %v2264_v8, %v2264_v8  ;;  %v2284_v14 = vcombine.low %v2264_v8, %v2264_v8 }
  0x29   : > { %1792 = vrot.lane.b32.xlu1 %v1789_v22, %s4885_s29  ;;  %v2376_v20 = vcombine.high %v4059_v17, %v4059_v17  ;;  %v2388_v13 = vcombine.low %v4059_v17, %v4059_v17 }
  0x2b   : > { %1798 = vrot.lane.b32.xlu0 %v1788_v10, %s3800_s20 }
  0x2d   : > { %1804 = vrot.lane.b32.xlu1 %v1781_v18, %s3801_s21 }
  0x2f   : > { %1802 = vrot.lane.b32.xlu0 %v1801_v24, %s3801_s21 }
  0x31   : > { %1808 = vrot.lane.b32.xlu1 %v1788_v10, %s4877_s26  ;;  %v2271_v10 = vrot.slane %v2255_v2, %v3897_v5 }
  0x33   : > { %594 = vrot.lane.b32.xlu0 %v593_v26, %s3801_s21  ;;  %v2278_v12 = vcombine.low %v2271_v10, %v2271_v10 }
  0x35   : > { %596 = vrot.lane.b32.xlu1 %v587_v16, %s4877_s26  ;;  %v2290_v16 = vcombine.high %v2271_v10, %v2271_v10 }
  0x37   : > { %1810 = vrot.lane.b32.xlu0 %v1807_v28, %s4877_s26 }
  0x39   : > { %1896 = vrot.lane.b32.xlu1 %v1893_v29, %s4885_s29 }
  0x3b   : > { %1894 = vrot.lane.b32.xlu0 %v1892_v27, %s4885_s29 }
  0x3d   : > { %1902 = vrot.lane.b32.xlu1 %v3950_v30, %s3800_s20 }
  0x3f   : > { %1900 = vrot.lane.b32.xlu0 %v1899_v31, %s3800_s20 }
  0x41   : > { %1908 = vrot.lane.b32.xlu1 %v1892_v27, %s3801_s21 }
  0x43   : > { %1906 = vrot.lane.b32.xlu0 %v1905_v32, %s3801_s21  ;;  %v3803_v32 = vmov 0.0  }
  0x44   : > { %3484 = vmatprep.subr.bf16.mxu0 %v3803_v32  ;;  %3388 = vmatprep.subr.bf16.mxu1 %v3803_v32 }
  0x45   : > { %1913 = vrot.lane.b32.xlu1 %v3966_v34, %s4877_s26  ;;  %3488 = vmatprep.mubr.msk.bf16.mxu0 %vm3805_vm2, %v3803_v32 }
  0x46   : > { %3392 = vmatprep.mubr.msk.bf16.mxu1 %vm3805_vm2, %v3803_v32 }
  0x47   : > { %1911 = vrot.lane.b32.xlu0 %v3950_v30, %s4877_s26 }
  0x49   : > { %731 = vrot.lane.b32.xlu1 %v730_v38, %s3800_s20 }
  0x4b   : > { %728 = vrot.lane.b32.xlu0 %v720_v39, %s4885_s29 }
  0x4d   : > { %736 = vrot.lane.b32.xlu1 %v727_v35, %s4877_s26 }
  0x4f   : > { %734 = vrot.lane.b32.xlu0 %v733_v41, %s3801_s21  ;;  %v1771_v41 = vld [vmem:[%s3903_s23] sm:$0x3] }
  0x51   : > { %821 = vrot.lane.b32.xlu1 %v818_v43, %s4885_s29 }
  0x53   : > { %819 = vrot.lane.b32.xlu0 %v810_v42, %s4885_s29 }
  0x55   : > { %828 = vrot.lane.b32.xlu1 %v817_v44, %s3800_s20 }
  0x57   : > { %826 = vrot.lane.b32.xlu0 %v825_v46, %s3800_s20  ;;  %v4095_v46 = vrot.slane %v4050_v11, %v3897_v5 }
  0x59   : > { %833 = vrot.lane.b32.xlu1 %v832_v48, %s3801_s21  ;;  %v4101_v48 = vld [vmem:[%s4084_s27] sm:$0x3] }
  0x5b   : > { %2093 = vrot.lane.b32.xlu0 %v2085_v50, %s4885_s29 }
  0x5d   : > { %2096 = vrot.lane.b32.xlu1 %v2095_v51, %s3800_s20 }
  0x5f   : > { %835 = vrot.lane.b32.xlu0 %v810_v42, %s3801_s21 }
  0x61   : > { %840 = vrot.lane.b32.xlu1 %v817_v44, %s4877_s26 }
  0x63   : > { %2099 = vrot.lane.b32.xlu0 %v2098_v53, %s3801_s21 }
  0x65   : > { %2101 = vrot.lane.b32.xlu1 %v2092_v49, %s4877_s26 }
  0x67   : > { %842 = vrot.lane.b32.xlu0 %v839_v55, %s4877_s26  ;;  %v2382_v55 = vcombine.low %v4095_v46, %v4095_v46 }
  0x69   : > { %929 = vrot.lane.b32.xlu1 %v926_v57, %s4885_s29 }
  0x6b   : > { %927 = vrot.lane.b32.xlu0 %v925_v56, %s4885_s29 }
  0x6d   : > { %935 = vrot.lane.b32.xlu1 %v4014_v58, %s3800_s20 }
  0x6f   : > { %933 = vrot.lane.b32.xlu0 %v932_v60, %s3800_s20 }
  0x71   : > { %941 = vrot.lane.b32.xlu1 %v925_v56, %s3801_s21  ;;  %v1112_v56 = vcombine.low %v4101_v48, %v4101_v48 }
  0x73   : > { %939 = vrot.lane.b32.xlu0 %v938_v62, %s3801_s21 }
  0x75   : > { %2188 = vrot.lane.b32.xlu1 %v2187_v0, %s3801_s21  ;;  %v1119_v0 = vrot.slane %v1112_v56, %v3897_v5 }
  0x77   : > { %2182 = vrot.lane.b32.xlu0 %v2174_v63, %s4885_s29 }
  0x79   : > { %946 = vrot.lane.b32.xlu1 %v4037_v3, %s4877_s26 }
  0x7b   : > { %2185 = vrot.lane.b32.xlu0 %v2184_v4, %s3800_s20 }
  0x7d   : > { %2190 = vrot.lane.b32.xlu1 %v2181_v1, %s4877_s26 }
  0x7f   : > { %944 = vrot.lane.b32.xlu0 %v4014_v58, %s4877_s26 }
  0x81   : > { %2275 = vrot.lane.b32.xlu1 %v2272_v9, %s4885_s29 }
  0x83   : > { %2273 = vrot.lane.b32.xlu0 %v2264_v8, %s4885_s29 }
  0x85   : > { %2281 = vrot.lane.b32.xlu1 %v2271_v10, %s3800_s20 }
  0x87   : > { %2279 = vrot.lane.b32.xlu0 %v2278_v12, %s3800_s20 }
  0x89   : > { %2287 = vrot.lane.b32.xlu1 %v2264_v8, %s3801_s21 }
  0x8b   : > { %v1708_v18 = vpop.permute.xlu1 %1707  ;;  %2285 = vrot.lane.b32.xlu0 %v2284_v14, %s3801_s21  ;;  %v1126_v14 = vrot.slane %v4101_v48, %v3897_v5 }
  0x8d   : > { %v1700_v19 = vpop.permute.xlu0 %1699  ;;  %2293 = vrot.lane.b32.xlu1 %v2290_v16, %s4877_s26 }
  0x8e   : > { %v1711_v44 = vsel %vm598_vm3, %v3906_v6, %v1700_v19  ;;  %v1129_v19 = vcombine.low %v1126_v14, %v1126_v14 }
  0x8f   : > { %v1797_v21 = vpop.permute.xlu1 %1796  ;;  %2291 = vrot.lane.b32.xlu0 %v2271_v10, %s4877_s26  ;;  %s4883_s26 = smov 92  }
  0x91   : > { %v1703_v22 = vpop.permute.xlu0 %1702  ;;  %2379 = vrot.lane.b32.xlu1 %v2376_v20, %s4885_s29 }
  0x93   : > { %v592_v23 = vpop.permute.xlu1 %591  ;;  %1721 = vrot.lane.b32.xlu0 %v1708_v18, %s4887_s22 }
  0x95   : > { %v1791_v24 = vpop.permute.xlu0 %1790 }
  0x97   : > { %v1706_v25 = vpop.permute.xlu1 %1705 }
  0x99   : > { %v589_v26 = vpop.permute.xlu0 %588 }
  0x9a   : > { %v601_v40 = vsel %vm598_vm3, %v3925_v15, %v589_v26  ;;  %v1713_v15 = vsel %vm602_vm4, %v1711_v44, %v1703_v22  ;;  %v4154_v26 = vld [vmem:[%s3987_s18] sm:$0x3] }
  0x9b   : > { %v1793_v27 = vpop.permute.xlu1 %1792  ;;  %v1715_v51 = vsel %vm605_vm6, %v1713_v15, %v1706_v25  ;;  %v604_v6 = vsel %vm602_vm4, %v601_v40, %v592_v23 }
  0x9c   : > { %v1794_v42 = vsel %vm823_vm1, %v1791_v24, %v1793_v27 }
  0x9d   : > { %v1799_v28 = vpop.permute.xlu0 %1798  ;;  %v1815_v49 = vsel %vm598_vm3, %v1771_v41, %v1794_v42 }
  0x9e   : > { %v1800_v50 = vsel %vm830_vm5, %v1797_v21, %v1799_v28  ;;  %v1132_v21 = vcombine.low %v1119_v0, %v1119_v0  ;;  %v1994_v28 = vcombine.low %v4154_v26, %v4154_v26 }
  0x9f   : > { %v1805_v29 = vpop.permute.xlu1 %1804  ;;  %v1817_v60 = vsel %vm602_vm4, %v1815_v49, %v1800_v50 }
  0xa1   : > { %v1803_v31 = vpop.permute.xlu0 %1802 }
  0xa2   : > { %v1806_v52 = vsel %vm837_vm7, %v1803_v31, %v1805_v29  ;;  %v4167_v31 = vld [vmem:[%s4084_s27] sm:$0x3] }
  0xa3   : > { %v1809_v35 = vpop.permute.xlu1 %1808  ;;  %v1819_v61 = vsel %vm605_vm6, %v1817_v60, %v1806_v52  ;;  %v1215_v49 = vrot.slane %v4167_v31, %v3897_v5 }
  0xa5   : > { %v595_v36 = vpop.permute.xlu0 %594  ;;  %v1218_v52 = vcombine.low %v1215_v49, %v1215_v49 }
  0xa6   : > { %v4110_v54 = vsel %vm605_vm6, %v604_v6, %v595_v36 }
  0xa7   : > { %v4072_v37 = vpop.permute.xlu1 %596 }
  0xa8   : > { %615 = vrot.lane.b32.xlu0 %v4072_v37, %s4881_s16 }
  0xa9   : > { %v1811_v38 = vpop.permute.xlu0 %1810 }
  0xaa   : > { %v1812_v39 = vsel %vm844_vm0, %v1809_v35, %v1811_v38  ;;  %v2008_v35 = vrot.slane %v4154_v26, %v3897_v5  ;;  %v2001_v38 = vrot.slane %v1994_v28, %v3897_v5 }
  0xab   : > { %v1897_v43 = vpop.permute.xlu1 %1896  ;;  %1825 = vrot.lane.b32.xlu1 %v1812_v39, %s4883_s26  ;;  %v1201_v39 = vcombine.low %v4167_v31, %v4167_v31 }
  0xac   : > { %2377 = vrot.lane.b32.xlu0 %v4059_v17, %s4885_s29  ;;  %v1921_v1 = vsel %vm598_vm3, %v3966_v34, %v1897_v43  ;;  %v2011_v41 = vcombine.low %v2008_v35, %v2008_v35 }
  0xad   : > { %v1895_v47 = vpop.permute.xlu0 %1894 }
  0xae   : > { %v1898_v62 = vsel %vm823_vm1, %v1895_v47, %v1897_v43  ;;  %v1208_v43 = vrot.slane %v1201_v39, %v3897_v5  ;;  %v2014_v47 = vcombine.low %v2001_v38, %v2001_v38 }
  0xaf   : > { %v1903_v53 = vpop.permute.xlu1 %1902  ;;  %1719 = vrot.lane.b32.xlu1 %v1715_v51, %s4887_s22  ;;  %v1918_v4 = vsel %vm598_vm3, %v3950_v30, %v1898_v62 }
  0xb0   : > { %613 = vrot.lane.b32.xlu0 %v4110_v54, %s4881_s16  ;;  %v1925_v10 = vsel %vm602_vm4, %v1921_v1, %v1903_v53 }
  0xb1   : > { %v1901_v57 = vpop.permute.xlu0 %1900 }
  0xb2   : > { %v1904_v7 = vsel %vm830_vm5, %v1901_v57, %v1903_v53  ;;  %v1221_v53 = vcombine.low %v1208_v43, %v1208_v43 }
  0xb3   : > { %v1909_v63 = vpop.permute.xlu1 %1908  ;;  %1823 = vrot.lane.b32.xlu1 %v1819_v61, %s4883_s26  ;;  %v1923_v12 = vsel %vm602_vm4, %v1918_v4, %v1904_v7 }
  0xb4   : > { %2383 = vrot.lane.b32.xlu0 %v2382_v55, %s3800_s20  ;;  %v1929_v30 = vsel %vm605_vm6, %v1925_v10, %v1909_v63  ;;  %v1289_v55 = vld [vmem:[%s4084_s27] sm:$0xf] }
  0xb5   : > { %v1907_v2 = vpop.permute.xlu0 %1906  ;;  %v1291_v60 = vcombine.low %v1289_v55, %v1289_v55 }
  0xb6   : > { %v1910_v8 = vsel %vm837_vm7, %v1907_v2, %v1909_v63 }
  0xb7   : > { %2385 = vrot.lane.b32.xlu1 %v4095_v46, %s3800_s20  ;;  %v1914_v9 = vpop.permute.xlu1 %1913  ;;  %v1927_v34 = vsel %vm605_vm6, %v1923_v12, %v1910_v8  ;;  %v1298_v62 = vrot.slane %v1291_v60, %v3897_v5 }
  0xb8   : > { %1127 = vrot.lane.b32.xlu0 %v1119_v0, %s4885_s29  ;;  %v1305_v0 = vrot.slane %v1289_v55, %v3897_v5 }
  0xb9   : > { %v1912_v11 = vpop.permute.xlu0 %1911  ;;  %v1306_v4 = vcombine.high %v1298_v62, %v1298_v62 }
  0xba   : > { %v1915_v24 = vsel %vm844_vm0, %v1912_v11, %v1914_v9  ;;  %v1312_v7 = vcombine.low %v1305_v0, %v1305_v0 }
  0xbb   : > { %1934 = vrot.lane.b32.xlu1 %v1927_v34, %s4879_s28  ;;  %v732_v16 = vpop.permute.xlu1 %731 }
  0xbc   : > { %1936 = vrot.lane.b32.xlu0 %v1929_v30, %s4879_s28 }
  0xbd   : > { %v729_v18 = vpop.permute.xlu0 %728 }
  0xbe   : > { %v740_v44 = vsel %vm598_vm3, %v3961_v33, %v729_v18 }
  0xbf   : > { %2389 = vrot.lane.b32.xlu1 %v2388_v13, %s3801_s21  ;;  %v737_v20 = vpop.permute.xlu1 %736  ;;  %v742_v51 = vsel %vm602_vm4, %v740_v44, %v732_v16 }
  0xc0   : > { %2391 = vrot.lane.b32.xlu0 %v4059_v17, %s3801_s21  ;;  %v4162_v17 = vcombine.high %v4095_v46, %v4095_v46 }
  0xc1   : > { %v735_v22 = vpop.permute.xlu0 %734 }
  0xc2   : > { %v744_v33 = vsel %vm605_vm6, %v742_v51, %v735_v22 }
  0xc3   : > { %1130 = vrot.lane.b32.xlu1 %v1129_v19, %s3800_s20  ;;  %v4147_v23 = vpop.permute.xlu1 %821 }
  0xc4   : > { %1133 = vrot.lane.b32.xlu0 %v1132_v21, %s3801_s21 }
  0xc5   : > { %v4151_v25 = vpop.permute.xlu0 %819 }
  0xc6   : > { %v824_v10 = vsel %vm823_vm1, %v4151_v25, %v4147_v23 }
  0xc7   : > { %1938 = vrot.lane.b32.xlu1 %v1915_v24, %s4879_s28  ;;  %v4157_v27 = vpop.permute.xlu1 %828 }
  0xc8   : > { %1940 = vrot.lane.b32.xlu0 %v1914_v9, %s4879_s28  ;;  %s3254_s28 = sshll.u32 %s4916_s24, 1  ;;  %v800_v9 = vld [vmem:[%s3922_s19] sm:$0x3]  ;;  %s4895_s19 = smov 80  }
  0xc9   : > { %v827_v29 = vpop.permute.xlu0 %826  ;;  %s543_s16 = sadd.s32 %s3894_s17, %s3254_s28  ;;  %s4892_s17 = smov 127   ;;  %v848_v34 = vsel %vm598_vm3, %v800_v9, %v824_v10 }
  0xca   : > { %s3255_s26 = sshll.u32 %s543_s16, 1  ;;  %v831_v30 = vsel %vm830_vm5, %v827_v29, %v4157_v27 }
  0xcb   : > { %2394 = vrot.lane.b32.xlu1 %v4095_v46, %s4891_s25  ;;  %v834_v36 = vpop.permute.xlu1 %833  ;;  %s4201_s0 = scalar_lea.vmem %s4871_s4, %s3255_s26  ;;  %v850_v16 = vsel %vm602_vm4, %v848_v34, %v831_v30  ;;  %s4893_s26 = smov 92  }
  0xcc   : > { %2396 = vrot.lane.b32.xlu0 %v4162_v17, %s4891_s25  ;;  %v4210_v2 = vld [vmem:[%s4201_s0] sm:$0x3] }
  0xcd   : > { %v2094_v40 = vpop.permute.xlu0 %2093  ;;  %v2561_v8 = vcombine.low %v4210_v2, %v4210_v2  ;;  %v2575_v23 = vrot.slane %v4210_v2, %v3897_v5  ;;  %v4283_v60 = vld [vmem:[%s4201_s0] sm:$0x3] }
  0xce   : > { %v2105_v21 = vsel %vm598_vm3, %v3992_v45, %v2094_v40  ;;  %v2664_v9 = vrot.slane %v4283_v60, %v3897_v5 }
  0xcf   : > { %1135 = vrot.lane.b32.xlu1 %v1126_v14, %s4891_s25  ;;  %v2097_v42 = vpop.permute.xlu1 %2096  ;;  %v2568_v13 = vrot.slane %v2561_v8, %v3897_v5  ;;  %v2578_v29 = vcombine.low %v2575_v23, %v2575_v23 }
  0xd0   : > { %2009 = vrot.lane.b32.xlu0 %v2001_v38, %s4885_s29  ;;  %v2107_v24 = vsel %vm602_vm4, %v2105_v21, %v2097_v42  ;;  %v1392_v38 = vld [vmem:[%s4084_s27] sm:$0xf] }
  0xd1   : > { %v836_v15 = vpop.permute.xlu0 %835  ;;  %v2581_v45 = vcombine.low %v2568_v13, %v2568_v13  ;;  %v1402_v40 = vcombine.low %v1392_v38, %v1392_v38 }
  0xd2   : > { %v838_v14 = vsel %vm837_vm7, %v834_v36, %v836_v15  ;;  %v4258_v15 = vrot.slane %v1392_v38, %v3897_v5 }
  0xd3   : > { %2012 = vrot.lane.b32.xlu1 %v2011_v41, %s3800_s20  ;;  %v4187_v50 = vpop.permute.xlu1 %840  ;;  %v852_v22 = vsel %vm605_vm6, %v850_v16, %v838_v14  ;;  %v1324_v41 = vcombine.high %v1305_v0, %v1305_v0  ;;  %v1409_v44 = vrot.slane %v1402_v40, %v3897_v5 }
  0xd4   : > { %1216 = vrot.lane.b32.xlu0 %v1208_v43, %s4885_s29  ;;  %s4894_s29 = smov 116   ;;  %v4329_v21 = vcombine.high %v4258_v15, %v4258_v15 }
  0xd5   : > { %v2100_v6 = vpop.permute.xlu0 %2099 }
  0xd6   : > { %v2109_v28 = vsel %vm605_vm6, %v2107_v24, %v2100_v6  ;;  %v1416_v6 = vcombine.low %v4258_v15, %v4258_v15 }
  0xd7   : > { %2015 = vrot.lane.b32.xlu1 %v2014_v47, %s3801_s21  ;;  %v2102_v57 = vpop.permute.xlu1 %2101 }
  0xd8   : > { %748 = vrot.lane.b32.xlu0 %v744_v33, %s4887_s22 }
  0xd9   : > { %v843_v56 = vpop.permute.xlu0 %842 }
  0xda   : > { %v845_v39 = vsel %vm844_vm0, %v4187_v50, %v843_v56  ;;  %v1410_v50 = vcombine.high %v1409_v44, %v1409_v44 }
  0xdb   : > { %1219 = vrot.lane.b32.xlu1 %v1218_v52, %s3800_s20  ;;  %v4205_v63 = vpop.permute.xlu1 %929 }
  0xdc   : > { %1222 = vrot.lane.b32.xlu0 %v1221_v53, %s3801_s21  ;;  %v954_v53 = vsel %vm598_vm3, %v4037_v3, %v4205_v63  ;;  %v1422_v3 = vcombine.low %v1409_v44, %v1409_v44 }
  0xdd   : > { %v928_v61 = vpop.permute.xlu0 %927 }
  0xde   : > { %v931_v47 = vsel %vm823_vm1, %v928_v61, %v4205_v63  ;;  %v2650_v63 = vcombine.low %v4283_v60, %v4283_v60 }
  0xdf   : > { %750 = vrot.lane.b32.xlu1 %v737_v20, %s4887_s22  ;;  %v936_v11 = vpop.permute.xlu1 %935  ;;  %v1318_v20 = vcombine.low %v1298_v62, %v1298_v62  ;;  %v951_v33 = vsel %vm598_vm3, %v4014_v58, %v931_v47 }
  0xe0   : > { %2017 = vrot.lane.b32.xlu0 %v2008_v35, %s4891_s25  ;;  %v958_v58 = vsel %vm602_vm4, %v954_v53, %v936_v11  ;;  %v2657_v8 = vrot.slane %v2650_v63, %v3897_v5  ;;  %v3286_v63 = vld [vmem:[%s4872_s5 + $0x34] sm:$0xf] }
  0xe1   : > { %v934_v1 = vpop.permute.xlu0 %933 }
  0xe2   : > { %v937_v52 = vsel %vm830_vm5, %v934_v1, %v936_v11 }
  0xe3   : > { %1224 = vrot.lane.b32.xlu1 %v1215_v49, %s4891_s25  ;;  %v942_v18 = vpop.permute.xlu1 %941  ;;  %v956_v56 = vsel %vm602_vm4, %v951_v33, %v937_v52  ;;  %v2254_v52 = vld [vmem:[%s3987_s18] sm:$0x3]  ;;  %s4896_s18 = smov 104  }
  0xe4   : > { %1307 = vrot.lane.b32.xlu0 %v1298_v62, %s4892_s17 }
  0xe5   : > { %v940_v12 = vpop.permute.xlu0 %939 }
  0xe6   : > { %v943_v55 = vsel %vm837_vm7, %v940_v12, %v942_v18  ;;  %v2667_v12 = vcombine.low %v2664_v9, %v2664_v9 }
  0xe7   : > { %1309 = vrot.lane.b32.xlu1 %v1306_v4, %s4892_s17  ;;  %v2189_v25 = vpop.permute.xlu1 %2188 }
  0xe8   : > { %1313 = vrot.lane.b32.xlu0 %v1312_v7, %s3800_s20 }
  0xe9   : > { %v2183_v19 = vpop.permute.xlu0 %2182 }
  0xea   : > { %v2194_v4 = vsel %vm598_vm3, %v4017_v59, %v2183_v19  ;;  %v4321_v19 = vld [vmem:[%s4084_s27] sm:$0x3] }
  0xeb   : > { %1315 = vrot.lane.b32.xlu1 %v1305_v0, %s3800_s20  ;;  %v4242_v35 = vpop.permute.xlu1 %946 }
  0xec   : > { %2576 = vrot.lane.b32.xlu0 %v2568_v13, %s4892_s17  ;;  %v2670_v13 = vcombine.low %v2657_v8, %v2657_v8 }
  0xed   : > { %v2186_v27 = vpop.permute.xlu0 %2185 }
  0xee   : > { %v2196_v10 = vsel %vm602_vm4, %v2194_v4, %v2186_v27  ;;  %v4340_v27 = vrot.slane %v4321_v19, %v3897_v5 }
  0xef   : > { %856 = vrot.lane.b32.xlu1 %v852_v22, %s4893_s26  ;;  %v4250_v42 = vpop.permute.xlu1 %2190  ;;  %v2198_v59 = vsel %vm605_vm6, %v2196_v10, %v2189_v25  ;;  %v1028_v22 = vcombine.low %v4321_v19, %v4321_v19 }
  0xf0   : > { %1319 = vrot.lane.b32.xlu0 %v1318_v20, %s3801_s21  ;;  %v1045_v40 = vcombine.low %v4340_v27, %v4340_v27 }
  0xf1   : > { %v945_v36 = vpop.permute.xlu0 %944 }
  0xf2   : > { %v948_v16 = vsel %vm844_vm0, %v945_v36, %v4242_v35 }
  0xf3   : > { %1321 = vrot.lane.b32.xlu1 %v1298_v62, %s3801_s21  ;;  %v4262_v49 = vpop.permute.xlu1 %2275  ;;  %v960_v62 = vsel %vm605_vm6, %v956_v56, %v943_v55 }
  0xf4   : > { %2113 = vrot.lane.b32.xlu0 %v2109_v28, %s4894_s29 }
  0xf5   : > { %v4252_v43 = vpop.permute.xlu0 %2273 }
  0xf6   : > { %v2277_v53 = vsel %vm823_vm1, %v4252_v43, %v4262_v49 }
  0xf7   : > { %2579 = vrot.lane.b32.xlu1 %v2578_v29, %s3800_s20  ;;  %v1035_v29 = vrot.slane %v1028_v22, %v3897_v5  ;;  %v2298_v49 = vsel %vm598_vm3, %v2254_v52, %v2277_v53 }
  0xf8   : > { %2582 = vrot.lane.b32.xlu0 %v2581_v45, %s3801_s21 }
  0xf9   : > { %v4265_v51 = vpop.permute.xlu0 %2279  ;;  %v1048_v33 = vcombine.low %v1035_v29, %v1035_v29 }
  0xfb   : > { %858 = vrot.lane.b32.xlu1 %v845_v39, %s4893_s26  ;;  %v3284_v39 = vld [vmem:[%s4872_s5 + $0x30] sm:$0xf] }
  0xfc   : > { %2115 = vrot.lane.b32.xlu0 %v2102_v57, %s4894_s29  ;;  %v4280_v57 = vpop.permute.xlu1 %2281 }
  0xfd   : > { %v4285_v61 = vpop.permute.xlu0 %2285 }
  0xff   : > { %1325 = vrot.lane.b32.xlu1 %v1305_v0, %s4891_s25  ;;  %v962_v0 = vsel %vm605_vm6, %v958_v58, %v942_v18  ;;  %v669_v58 = vsel %vm598_vm3, %v4072_v37, 0 }
 0x100   : > { %1327 = vrot.lane.b32.xlu0 %v1324_v41, %s4891_s25  ;;  %v4295_v1 = vpop.permute.xlu1 %2287  ;;  %v3261_v41 = vld [vmem:[%s4872_s5 + $0x4] sm:$0xf] }
 0x101   : > { %v4300_v7 = vpop.permute.xlu0 %2291 }
 0x103   : > { %2584 = vrot.lane.b32.xlu1 %v2575_v23, %s4891_s25  ;;  %v2738_v23 = vld [vmem:[%s4201_s0] sm:$0xf] }
 0x104   : > { %1411 = vrot.lane.b32.xlu0 %v1409_v44, %s4892_s17  ;;  %v4307_v11 = vpop.permute.xlu1 %2293  ;;  %v2740_v28 = vcombine.low %v2738_v23, %v2738_v23 }
 0x105   : > { %v1722_v34 = vpop.permute.xlu0 %1721 }
 0x107   : > { %1413 = vrot.lane.b32.xlu1 %v1410_v50, %s4892_s17  ;;  %v4373_v50 = vrot.slane %v2738_v23, %v3897_v5  ;;  %v3288_v23 = vld [vmem:[%s4872_s5 + $0x38] sm:$0xf] }
 0x108   : > { %1417 = vrot.lane.b32.xlu0 %v1416_v6, %s3800_s20  ;;  %v4313_v30 = vpop.permute.xlu1 %2379 }
 0x109   : > { %v2761_v43 = vcombine.low %v4373_v50, %v4373_v50 }
 0x10b   : > { %1419 = vrot.lane.b32.xlu1 %v4258_v15, %s3800_s20 }
 0x10c   : > { %967 = vrot.lane.b32.xlu0 %v960_v62, %s4895_s19  ;;  %v2283_v62 = vsel %vm830_vm5, %v4265_v51, %v4280_v57  ;;  %v2289_v51 = vsel %vm837_vm7, %v4285_v61, %v4295_v1  ;;  %v2841_v1 = vld [vmem:[%s4201_s0] sm:$0xf] }
 0x10f   : > { %969 = vrot.lane.b32.xlu1 %v962_v0, %s4895_s19  ;;  %v2300_v0 = vsel %vm602_vm4, %v2298_v49, %v2283_v62 }
 0x110   : > { %1423 = vrot.lane.b32.xlu0 %v1422_v3, %s3801_s21  ;;  %v2302_v61 = vsel %vm605_vm6, %v2300_v0, %v2289_v51 }
 0x113   : > { %1425 = vrot.lane.b32.xlu1 %v1409_v44, %s3801_s21 }
 0x114   : > { %2665 = vrot.lane.b32.xlu0 %v2657_v8, %s4892_s17 }
 0x117   : > { %2202 = vrot.lane.b32.xlu1 %v2198_v59, %s4887_s22 }
 0x118   : > { %2668 = vrot.lane.b32.xlu0 %v2667_v12, %s3800_s20 }
 0x11a   : > { %v616_v14 = vpop.permute.xlu0 %615 }
 0x11b   : > { %2671 = vrot.lane.b32.xlu1 %v2670_v13, %s3801_s21  ;;  %v623_v38 = vsel %vm598_vm3, %v616_v14, 0  ;;  %v2851_v13 = vcombine.low %v2841_v1, %v2841_v1 }
 0x11c   : > { %971 = vrot.lane.b32.xlu0 %v948_v16, %s4895_s19 }
 0x11d   : > { %v1826_v18 = vpop.permute.xlu1 %1825 }
 0x11e   : > { %v4323_v20 = vpop.permute.xlu0 %2377  ;;  %v1832_v55 = vsel %vm598_vm3, %v1826_v18, 0  ;;  %v2295_v18 = vsel %vm844_vm0, %v4300_v7, %v4307_v11  ;;  %v4455_v7 = vrot.slane %v2841_v1, %v3897_v5 }
 0x11f   : > { %973 = vrot.lane.b32.xlu1 %v4242_v35, %s4895_s19  ;;  %v1728_v35 = vsel %vm598_vm3, %v1722_v34, 0 }
 0x120   : > { %1428 = vrot.lane.b32.xlu0 %v4258_v15, %s4891_s25 }
 0x121   : > { %v1720_v24 = vpop.permute.xlu1 %1719 }
 0x122   : > { %3485 = vmatpush3.bf16.msra.mxu0 %v1720_v24  ;;  %v614_v25 = vpop.permute.xlu0 %613  ;;  %v2773_v24 = vcombine.high %v4373_v50, %v4373_v50 }
 0x123   : > { %1430 = vrot.lane.b32.xlu1 %v4329_v21, %s4891_s25  ;;  %3389 = vmatpush3.bf16.msra.mxu1 %v614_v25  ;;  %v2858_v25 = vrot.slane %v2851_v13, %v3897_v5 }
 0x124   : > { %2204 = vrot.lane.b32.xlu0 %v4250_v42, %s4887_s22  ;;  %3486 = vmatprep.subr.bf16.mxu0 %v3803_v32  ;;  %v2747_v42 = vrot.slane %v2740_v28, %v3897_v5 }
 0x125   : > { %v1824_v45 = vpop.permute.xlu1 %1823  ;;  %3390 = vmatprep.subr.bf16.mxu1 %v3803_v32 }
 0x126   : > { %3487 = vmatpush3.bf16.msra.mxu0 %v1728_v35  ;;  %v4348_v36 = vpop.permute.xlu0 %2383  ;;  %v2755_v6 = vcombine.high %v2747_v42, %v2747_v42  ;;  %v2767_v57 = vcombine.low %v2747_v42, %v2747_v42 }
 0x127   : > { %2673 = vrot.lane.b32.xlu1 %v2664_v9, %s4891_s25  ;;  %3391 = vmatpush3.bf16.msra.mxu1 %v623_v38  ;;  %v609_v9 = vld [vmem:[%s4872_s5] sm:$0xf] }
 0x128   : > { %1043 = vrot.lane.b32.xlu0 %v1035_v29, %s4892_s17  ;;  %3492 = vmatprep.subr.bf16.mxu0 %v3803_v32  ;;  %v2859_v29 = vcombine.high %v2858_v25, %v2858_v25 }
 0x129   : > { %v4363_v44 = vpop.permute.xlu1 %2385  ;;  %3489 = vmatmul.mubr.msk.bf16.vlgmr.msra.gmra.mrb[0].mxu0 %vm618_vm8, %v3284_v39  ;;  %3396 = vmatprep.subr.bf16.mxu1 %v3803_v32 }
 0x12a   : > { %3493 = vmatpush3.bf16.msra.mxu0 %v1824_v45  ;;  %v4367_v47 = vpop.permute.xlu0 %1127  ;;  %3393 = vmatmul.mubr.msk.bf16.vlgmr.msra.gmra.mrb[0].mxu1 %vm618_vm8, %v3261_v41  ;;  %v2865_v45 = vcombine.low %v4455_v7, %v4455_v7 }
 0x12b   : > { %1046 = vrot.lane.b32.xlu1 %v1045_v40, %s3800_s20  ;;  %3397 = vmatpush3.bf16.msra.mxu1 %v4110_v54 }
 0x12c   : > { %2756 = vrot.lane.b32.xlu0 %v2747_v42, %s4892_s17  ;;  %3494 = vmatprep.subr.bf16.mxu0 %v3803_v32 }
 0x12d   : > { %v1935_v56 = vpop.permute.xlu1 %1934  ;;  %3398 = vmatprep.subr.bf16.mxu1 %v3803_v32  ;;  %3496 = vmatprep.mubr.msk.bf16.mxu0 %vm3805_vm2, %v3803_v32 }
 0x12e   : > { %3495 = vmatpush3.bf16.msra.mxu0 %v1832_v55  ;;  %v1937_v54 = vpop.permute.xlu0 %1936  ;;  %3400 = vmatprep.mubr.msk.bf16.mxu1 %vm3805_vm2, %v3803_v32 }
 0x12f   : > { %2758 = vrot.lane.b32.xlu1 %v2755_v6, %s4892_s17  ;;  %3399 = vmatpush3.bf16.msra.mxu1 %v669_v58  ;;  %v1942_v4 = vsel %vm975_vm9, %v1935_v56, %v1937_v54 }
 0x130   : > { %1049 = vrot.lane.b32.xlu0 %v1048_v33, %s3801_s21  ;;  %3500 = vmatprep.subr.bf16.mxu0 %v3803_v32  ;;  %v2387_v33 = vsel %vm830_vm5, %v4348_v36, %v4363_v44  ;;  %v2404_v36 = vsel %vm598_vm3, %v4162_v17, %v4313_v30 }
 0x131   : > { %v4398_v37 = vpop.permute.xlu1 %2389  ;;  %3404 = vmatprep.subr.bf16.mxu1 %v3803_v32  ;;  %v2408_v54 = vsel %vm602_vm4, %v2404_v36, %v4363_v44  ;;  %v1139_v44 = vsel %vm598_vm3, %v4101_v48, %v4367_v47  ;;  %v3290_v48 = vld [vmem:[%s4872_s5 + $0x3c] sm:$0xf] }
 0x132   : > { %v4401_v3 = vpop.permute.xlu0 %2391 }
 0x133   : > { %2762 = vrot.lane.b32.xlu1 %v2761_v43, %s3800_s20  ;;  %v2412_v17 = vsel %vm605_vm6, %v2408_v54, %v4401_v3 }
 0x134   : > { %2764 = vrot.lane.b32.xlu0 %v4373_v50, %s3800_s20 }
 0x135   : > { %v4414_v8 = vpop.permute.xlu1 %1130  ;;  %3497 = vmatmul.mubr.msk.bf16.vlgmr.msra.gmra.mrb[0].mxu0 %vm618_vm8, %v3286_v63 }
 0x136   : > { %3501 = vmatpush3.bf16.msra.mxu0 %v1942_v4  ;;  %v4420_v10 = vpop.permute.xlu0 %1133  ;;  %3504 = vmatprep.mubr.msk.bf16.mxu0 %vm3805_vm2, %v3803_v32  ;;  %v1141_v63 = vsel %vm602_vm4, %v1139_v44, %v4414_v8 }
 0x137   : > { %2306 = vrot.lane.b32.xlu1 %v2302_v61, %s4893_s26  ;;  %3502 = vmatprep.subr.bf16.mxu0 %v3803_v32 }
 0x138   : > { %2768 = vrot.lane.b32.xlu0 %v2767_v57, %s3801_s21  ;;  %3401 = vmatmul.mubr.msk.bf16.vlgmr.msra.gmra.mrb[0].mxu1 %vm618_vm8, %v609_v9  ;;  %v1143_v57 = vsel %vm605_vm6, %v1141_v63, %v4420_v10 }
 0x139   : > { %v1939_v12 = vpop.permute.xlu1 %1938  ;;  %3408 = vmatprep.mubr.msk.bf16.mxu1 %vm3805_vm2, %v3803_v32 }
 0x13a   : > { %v1941_v59 = vpop.permute.xlu0 %1940 }
 0x13b   : > { %v1943_v34 = vsel %vm975_vm9, %v1939_v12, %v1941_v59  ;;  %2770 = vrot.lane.b32.xlu1 %v2747_v42, %s3801_s21  ;;  %v2381_v42 = vsel %vm823_vm1, %v4323_v20, %v4313_v30  ;;  %v2871_v30 = vcombine.low %v2858_v25, %v2858_v25  ;;  %v4546_v12 = vld [vmem:[%s4201_s0] sm:$0x3] }
 0x13c   : > { %v1949_v14 = vsel %vm598_vm3, %v1943_v34, 0  ;;  %1051 = vrot.lane.b32.xlu0 %v4340_v27, %s4891_s25  ;;  %v4461_v27 = vld [vmem:[%s3903_s23] sm:$0x3]  ;;  %v2401_v20 = vsel %vm598_vm3, %v4095_v46, %v2381_v42  ;;  %v4554_v34 = vcombine.high %v4455_v7, %v4455_v7  ;;  %v2477_v13 = vcombine.low %v4546_v12, %v4546_v12 }
 0x13d   : > { %v4437_v16 = vpop.permute.xlu1 %2394  ;;  %3503 = vmatpush3.bf16.msra.mxu0 %v1949_v14  ;;  %v1595_v35 = vcombine.low %v4461_v27, %v4461_v27  ;;  %v2406_v56 = vsel %vm602_vm4, %v2401_v20, %v2387_v33  ;;  %v1609_v43 = vrot.slane %v4461_v27, %v3897_v5  ;;  %v3266_v33 = vld [vmem:[%s4872_s5 + $0xc] sm:$0xf] }
 0x13e   : > { %v4442_v22 = vpop.permute.xlu0 %2396  ;;  %3508 = vmatprep.subr.bf16.mxu0 %v3803_v32 }
 0x13f   : > { %2308 = vrot.lane.b32.xlu1 %v2295_v18, %s4893_s26  ;;  %v1602_v41 = vrot.slane %v1595_v35, %v3897_v5  ;;  %v1612_v51 = vcombine.low %v1609_v43, %v1609_v43  ;;  %v2398_v10 = vsel %vm844_vm0, %v4437_v16, %v4442_v22  ;;  %v2491_v18 = vrot.slane %v4546_v12, %v3897_v5 }
 0x140   : > { %2774 = vrot.lane.b32.xlu0 %v4373_v50, %s4891_s25 }
 0x141   : > { %v4457_v11 = vpop.permute.xlu1 %1135  ;;  %3505 = vmatmul.mubr.msk.bf16.vlgmr.msra.gmra.mrb[0].mxu0 %vm618_vm8, %v3288_v23  ;;  %v1615_v8 = vcombine.low %v1602_v41, %v1602_v41 }
 0x142   : > { %v2010_v28 = vpop.permute.xlu0 %2009  ;;  %3512 = vmatprep.mubr.msk.bf16.mxu0 %vm3805_vm2, %v3803_v32 }
 0x143   : > { %2776 = vrot.lane.b32.xlu1 %v2773_v24, %s4891_s25  ;;  %v2021_v40 = vsel %vm598_vm3, %v4154_v26, %v2010_v28  ;;  %v2393_v26 = vsel %vm837_vm7, %v4398_v37, %v4401_v3  ;;  %v3264_v3 = vld [vmem:[%s4872_s5 + $0x8] sm:$0xf] }
 0x144   : > { %2860 = vrot.lane.b32.xlu0 %v2858_v25, %s4892_s17  ;;  %v2410_v46 = vsel %vm605_vm6, %v2406_v56, %v2393_v26 }
 0x145   : > { %v2013_v38 = vpop.permute.xlu1 %2012 }
 0x146   : > { %v4471_v39 = vpop.permute.xlu0 %1216  ;;  %v2023_v50 = vsel %vm602_vm4, %v2021_v40, %v2013_v38 }
 0x147   : > { %2862 = vrot.lane.b32.xlu1 %v2859_v29, %s4892_s17  ;;  %v1228_v29 = vsel %vm598_vm3, %v4167_v31, %v4471_v39 }
 0x148   : > { %2866 = vrot.lane.b32.xlu0 %v2865_v45, %s3800_s20 }
 0x149   : > { %v2016_v6 = vpop.permute.xlu1 %2015 }
 0x14a   : > { %v2025_v52 = vsel %vm605_vm6, %v2023_v50, %v2016_v6  ;;  %v749_v53 = vpop.permute.xlu0 %748 }
 0x14b   : > { %2868 = vrot.lane.b32.xlu1 %v4455_v7, %s3800_s20  ;;  %3405 = vmatpush3.bf16.msra.mxu1 %v749_v53  ;;  %v3292_v53 = vld [vmem:[%s4872_s5 + $0x40] sm:$0xf] }
 0x14c   : > { %3509 = vmatpush3.bf16.msra.mxu0 %v2025_v52  ;;  %1610 = vrot.lane.b32.xlu0 %v1602_v41, %s4892_s17  ;;  %v1288_v41 = vld [vmem:[%s4084_s27] sm:$0x3] }
 0x14d   : > { %v4497_v55 = vpop.permute.xlu1 %1219  ;;  %3406 = vmatprep.subr.bf16.mxu1 %v3803_v32  ;;  %3510 = vmatprep.subr.bf16.mxu0 %v3803_v32 }
 0x14e   : > { %v4504_v58 = vpop.permute.xlu0 %1222  ;;  %v1230_v35 = vsel %vm602_vm4, %v1228_v29, %v4497_v55 }
 0x14f   : > { %2417 = vrot.lane.b32.xlu1 %v2410_v46, %s4895_s19  ;;  %v1232_v40 = vsel %vm605_vm6, %v1230_v35, %v4504_v58 }
 0x150   : > { %2419 = vrot.lane.b32.xlu0 %v2412_v17, %s4895_s19 }
 0x151   : > { %v751_v49 = vpop.permute.xlu1 %750 }
 0x152   : > { %v757_v62 = vsel %vm598_vm3, %v751_v49, 0  ;;  %v2018_v37 = vpop.permute.xlu0 %2017 }
 0x153   : > { %v2033_v0 = vsel %vm598_vm3, %v2018_v37, 0  ;;  %2872 = vrot.lane.b32.xlu1 %v2871_v30, %s3801_s21  ;;  %3407 = vmatpush3.bf16.msra.mxu1 %v757_v62 }
 0x154   : > { %2874 = vrot.lane.b32.xlu0 %v2858_v25, %s3801_s21  ;;  %3511 = vmatpush3.bf16.msra.mxu0 %v2033_v0  ;;  %v2494_v25 = vcombine.low %v2491_v18, %v2491_v18 }
 0x155   : > { %v1225_v47 = vpop.permute.xlu1 %1224  ;;  %3412 = vmatprep.subr.bf16.mxu1 %v3803_v32  ;;  %3516 = vmatprep.subr.bf16.mxu0 %v3803_v32 }
 0x156   : > { %v1308_v4 = vpop.permute.xlu0 %1307  ;;  %3409 = vmatmul.mubr.msk.bf16.vlgmr.msra.gmra.mrb[0].mxu1 %vm618_vm8, %v3264_v3 }
 0x157   : > { %1147 = vrot.lane.b32.xlu1 %v1143_v57, %s4894_s29  ;;  %3513 = vmatmul.mubr.msk.bf16.vlgmr.msra.gmra.mrb[0].mxu0 %vm618_vm8, %v3290_v48 }
 0x158   : > { %1613 = vrot.lane.b32.xlu0 %v1612_v51, %s3800_s20  ;;  %3416 = vmatprep.mubr.msk.bf16.mxu1 %vm3805_vm2, %v3803_v32 }
 0x159   : > { %v1310_v9 = vpop.permute.xlu1 %1309  ;;  %3520 = vmatprep.mubr.msk.bf16.mxu0 %vm3805_vm2, %v3803_v32 }
 0x15a   : > { %v1314_v61 = vpop.permute.xlu0 %1313  ;;  %v1311_v42 = vsel %vm823_vm1, %v1308_v4, %v1310_v9 }
 0x15b   : > { %1616 = vrot.lane.b32.xlu1 %v1615_v8, %s3801_s21  ;;  %v1332_v26 = vsel %vm598_vm3, %v1288_v41, %v1311_v42  ;;  %v3294_v42 = vld [vmem:[%s4872_s5 + $0x44] sm:$0xf] }
 0x15c   : > { %2421 = vrot.lane.b32.xlu0 %v2398_v10, %s4895_s19 }
 0x15d   : > { %v1316_v1 = vpop.permute.xlu1 %1315 }
 0x15e   : > { %v2577_v59 = vpop.permute.xlu0 %2576  ;;  %v1317_v31 = vsel %vm830_vm5, %v1314_v61, %v1316_v1 }
 0x15f   : > { %2423 = vrot.lane.b32.xlu1 %v4442_v22, %s4895_s19  ;;  %v2484_v22 = vrot.slane %v2477_v13, %v3897_v5  ;;  %v1334_v36 = vsel %vm602_vm4, %v1332_v26, %v1317_v31  ;;  %v2588_v55 = vsel %vm598_vm3, %v4210_v2, %v2577_v59 }
 0x160   : > { %1149 = vrot.lane.b32.xlu0 %v4457_v11, %s4894_s29 }
 0x161   : > { %v857_v14 = vpop.permute.xlu1 %856  ;;  %v2497_v11 = vcombine.low %v2484_v22, %v2484_v22 }
 0x162   : > { %3413 = vmatpush3.bf16.msra.mxu1 %v857_v14  ;;  %v1320_v16 = vpop.permute.xlu0 %1319 }
 0x163   : > { %2877 = vrot.lane.b32.xlu1 %v4455_v7, %s4891_s25  ;;  %3414 = vmatprep.subr.bf16.mxu1 %v3803_v32 }
 0x164   : > { %2879 = vrot.lane.b32.xlu0 %v4554_v34, %s4891_s25 }
 0x165   : > { %v1322_v23 = vpop.permute.xlu1 %1321 }
 0x166   : > { %v2114_v24 = vpop.permute.xlu0 %2113  ;;  %v1323_v52 = vsel %vm837_vm7, %v1320_v16, %v1322_v23  ;;  %v4635_v23 = vld [vmem:[%s3903_s23] sm:$0x3]  ;;  %s3256_s23 = sshll.u32 %s4908_s10, 3 }
 0x167   : > { %1618 = vrot.lane.b32.xlu1 %v1609_v43, %s4891_s25  ;;  %3517 = vmatpush3.bf16.msra.mxu0 %v2114_v24  ;;  %v1336_v58 = vsel %vm605_vm6, %v1334_v36, %v1323_v52  ;;  %v1525_v41 = vrot.slane %v4635_v23, %v3897_v5  ;;  %s552_s16 = sadd.s32 %s3256_s23, %s4918_s30 }
 0x168   : > { %2492 = vrot.lane.b32.xlu0 %v2484_v22, %s4892_s17  ;;  %3518 = vmatprep.subr.bf16.mxu0 %v3803_v32  ;;  %s3258_s30 = sshll.u32 %s552_s16, 1 }
 0x169   : > { %v2580_v28 = vpop.permute.xlu1 %2579 }
 0x16a   : > { %v2583_v45 = vpop.permute.xlu0 %2582  ;;  %v2590_v54 = vsel %vm602_vm4, %v2588_v55, %v2580_v28 }
 0x16b   : > { %2495 = vrot.lane.b32.xlu1 %v2494_v25, %s3800_s20  ;;  %v2592_v2 = vsel %vm605_vm6, %v2590_v54, %v2583_v45 }
 0x16c   : > { %2498 = vrot.lane.b32.xlu0 %v2497_v11, %s3801_s21  ;;  %v1511_v11 = vcombine.low %v4635_v23, %v4635_v23 }
 0x16d   : > { %v859_v38 = vpop.permute.xlu1 %858 }
 0x16e   : > { %v865_v50 = vsel %vm598_vm3, %v859_v38, 0  ;;  %v2116_v6 = vpop.permute.xlu0 %2115  ;;  %v1518_v38 = vrot.slane %v1511_v11, %v3897_v5  ;;  %v1528_v5 = vcombine.low %v1525_v41, %v1525_v41 }
 0x16f   : > { %v2122_v39 = vsel %vm598_vm3, %v2116_v6, 0  ;;  %3415 = vmatpush3.bf16.msra.mxu1 %v865_v50  ;;  %1236 = vrot.lane.b32.xlu1 %v1232_v40, %s4896_s18 }
 0x170   : > { %1238 = vrot.lane.b32.xlu0 %v1225_v47, %s4896_s18  ;;  %3519 = vmatpush3.bf16.msra.mxu0 %v2122_v39  ;;  %v1531_v31 = vcombine.low %v1518_v38, %v1518_v38 }
 0x171   : > { %v1326_v20 = vpop.permute.xlu1 %1325  ;;  %3420 = vmatprep.subr.bf16.mxu1 %v3803_v32  ;;  %3524 = vmatprep.subr.bf16.mxu0 %v3803_v32 }
 0x172   : > { %v1328_v56 = vpop.permute.xlu0 %1327  ;;  %3417 = vmatmul.mubr.msk.bf16.vlgmr.msra.gmra.mrb[0].mxu1 %vm618_vm8, %v3266_v33 }
 0x173   : > { %2500 = vrot.lane.b32.xlu1 %v2491_v18, %s4891_s25  ;;  %3521 = vmatmul.mubr.msk.bf16.vlgmr.msra.gmra.mrb[0].mxu0 %vm618_vm8, %v3292_v53  ;;  %v1329_v30 = vsel %vm844_vm0, %v1326_v20, %v1328_v56 }
 0x174   : > { %1340 = vrot.lane.b32.xlu0 %v1336_v58, %s4893_s26  ;;  %3424 = vmatprep.mubr.msk.bf16.mxu1 %vm3805_vm2, %v3803_v32  ;;  %v2737_v58 = vld [vmem:[%s4201_s0] sm:$0x3] }
 0x175   : > { %v2585_v46 = vpop.permute.xlu1 %2584  ;;  %3528 = vmatprep.mubr.msk.bf16.mxu0 %vm3805_vm2, %v3803_v32 }
 0x176   : > { %v1412_v17 = vpop.permute.xlu0 %1411 }
 0x177   : > { %2596 = vrot.lane.b32.xlu1 %v2592_v2, %s4894_s29 }
 0x178   : > { %1342 = vrot.lane.b32.xlu0 %v1329_v30, %s4893_s26 }
 0x179   : > { %v1414_v43 = vpop.permute.xlu1 %1413 }
 0x17a   : > { %v1418_v49 = vpop.permute.xlu0 %1417  ;;  %v1415_v63 = vsel %vm823_vm1, %v1412_v17, %v1414_v43  ;;  %v1438_v48 = vsel %vm598_vm3, %v4329_v21, %v1414_v43 }
 0x17b   : > { %2598 = vrot.lane.b32.xlu1 %v2585_v46, %s4894_s29  ;;  %v1435_v47 = vsel %vm598_vm3, %v4258_v15, %v1415_v63  ;;  %v3270_v63 = vld [vmem:[%s4872_s5 + $0x14] sm:$0xf] }
 0x17d   : > { %v1420_v44 = vpop.permute.xlu1 %1419 }
 0x17e   : > { %v968_v62 = vpop.permute.xlu0 %967  ;;  %v1421_v51 = vsel %vm830_vm5, %v1418_v49, %v1420_v44  ;;  %v1442_v57 = vsel %vm602_vm4, %v1438_v48, %v1420_v44  ;;  %v3296_v48 = vld [vmem:[%s4872_s5 + $0x48] sm:$0xf] }
 0x17f   : > { %v1440_v8 = vsel %vm602_vm4, %v1435_v47, %v1421_v51 }
 0x181   : > { %v970_v37 = vpop.permute.xlu1 %969 }
 0x182   : > { %v976_v0 = vsel %vm975_vm9, %v968_v62, %v970_v37  ;;  %v1424_v3 = vpop.permute.xlu0 %1423 }
 0x183   : > { %3421 = vmatpush3.bf16.msra.mxu1 %v976_v0 }
 0x184   : > { %3422 = vmatprep.subr.bf16.mxu1 %v3803_v32 }
 0x185   : > { %v1426_v4 = vpop.permute.xlu1 %1425 }
 0x186   : > { %v1427_v9 = vsel %vm837_vm7, %v1424_v3, %v1426_v4  ;;  %v1446_v61 = vsel %vm605_vm6, %v1442_v57, %v1426_v4  ;;  %v2666_v10 = vpop.permute.xlu0 %2665 }
 0x187   : > { %1453 = vrot.lane.b32.xlu1 %v1446_v61, %s4895_s19  ;;  %v1444_v21 = vsel %vm605_vm6, %v1440_v8, %v1427_v9  ;;  %v2677_v59 = vsel %vm598_vm3, %v4283_v60, %v2666_v10  ;;  %v3268_v60 = vld [vmem:[%s4872_s5 + $0x10] sm:$0xf] }
 0x188   : > { %1451 = vrot.lane.b32.xlu0 %v1444_v21, %s4895_s19 }
 0x189   : > { %v2203_v1 = vpop.permute.xlu1 %2202 }
 0x18a   : > { %3525 = vmatpush3.bf16.msra.mxu0 %v2203_v1  ;;  %v2669_v15 = vpop.permute.xlu0 %2668 }
 0x18b   : > { %3526 = vmatprep.subr.bf16.mxu0 %v3803_v32  ;;  %v2679_v13 = vsel %vm602_vm4, %v2677_v59, %v2669_v15 }
 0x18d   : > { %v2672_v14 = vpop.permute.xlu1 %2671 }
 0x18e   : > { %v2681_v16 = vsel %vm605_vm6, %v2679_v13, %v2672_v14  ;;  %v972_v18 = vpop.permute.xlu0 %971 }
 0x18f   : > { %2685 = vrot.lane.b32.xlu0 %v2681_v16, %s4896_s18 }
 0x191   : > { %v974_v22 = vpop.permute.xlu1 %973 }
 0x192   : > { %v977_v24 = vsel %vm975_vm9, %v972_v18, %v974_v22  ;;  %v1429_v25 = vpop.permute.xlu0 %1428 }
 0x193   : > { %v983_v28 = vsel %vm598_vm3, %v977_v24, 0 }
 0x194   : > { %3423 = vmatpush3.bf16.msra.mxu1 %v983_v28 }
 0x195   : > { %v1431_v29 = vpop.permute.xlu1 %1430  ;;  %3428 = vmatprep.subr.bf16.mxu1 %v3803_v32 }
 0x196   : > { %v1432_v45 = vsel %vm844_vm0, %v1429_v25, %v1431_v29  ;;  %v2205_v35 = vpop.permute.xlu0 %2204  ;;  %1457 = vrot.lane.b32.xlu0 %v1431_v29, %s4895_s19 }
 0x197   : > { %v2211_v40 = vsel %vm598_vm3, %v2205_v35, 0  ;;  %1455 = vrot.lane.b32.xlu1 %v1432_v45, %s4895_s19  ;;  %3425 = vmatmul.mubr.msk.bf16.vlgmr.msra.gmra.mrb[0].mxu1 %vm618_vm8, %v3268_v60 }
 0x198   : > { %3527 = vmatpush3.bf16.msra.mxu0 %v2211_v40  ;;  %3432 = vmatprep.mubr.msk.bf16.mxu1 %vm3805_vm2, %v3803_v32 }
 0x199   : > { %v2674_v50 = vpop.permute.xlu1 %2673  ;;  %3532 = vmatprep.subr.bf16.mxu0 %v3803_v32 }
 0x19a   : > { %v1044_v6 = vpop.permute.xlu0 %1043  ;;  %1526 = vrot.lane.b32.xlu0 %v1518_v38, %s4892_s17  ;;  %s553_s17 = scalar_lea.vmem %s4874_s7, %s552_s16 }
 0x19b   : > { %2687 = vrot.lane.b32.xlu1 %v2674_v50, %s4896_s18  ;;  %3529 = vmatmul.mubr.msk.bf16.vlgmr.msra.gmra.mrb[0].mxu0 %vm618_vm8, %v3294_v42  ;;  %v1055_v52 = vsel %vm598_vm3, %v4321_v19, %v1044_v6  ;;  %s561_s18 = scalar_lea.vmem %s4875_s8, %s3258_s30 }
 0x19c   : > { %3536 = vmatprep.mubr.msk.bf16.mxu0 %vm3805_vm2, %v3803_v32 }
 0x19d   : > { %v1047_v39 = vpop.permute.xlu1 %1046 }
 0x19e   : > { %v2757_v33 = vpop.permute.xlu0 %2756  ;;  %1532 = vrot.lane.b32.xlu0 %v1531_v31, %s3801_s21  ;;  %v1057_v26 = vsel %vm602_vm4, %v1055_v52, %v1047_v39  ;;  %v3298_v39 = vld [vmem:[%s4872_s5 + $0x4c] sm:$0xf] }
 0x19f   : > { %1529 = vrot.lane.b32.xlu1 %v1528_v5, %s3800_s20 }
 0x1a1   : > { %v2759_v53 = vpop.permute.xlu1 %2758 }
 0x1a2   : > { %v1050_v20 = vpop.permute.xlu0 %1049  ;;  %1534 = vrot.lane.b32.xlu0 %v1525_v41, %s4891_s25  ;;  %v2760_v46 = vsel %vm823_vm1, %v2757_v33, %v2759_v53 }
 0x1a3   : > { %v1059_v36 = vsel %vm605_vm6, %v1057_v26, %v1050_v20  ;;  %v2781_v17 = vsel %vm598_vm3, %v2737_v58, %v2760_v46 }
 0x1a4   : > { %3429 = vmatpush3.bf16.msra.mxu1 %v1059_v36 }
 0x1a5   : > { %v2763_v55 = vpop.permute.xlu1 %2762  ;;  %3430 = vmatprep.subr.bf16.mxu1 %v3803_v32 }
 0x1a6   : > { %v2765_v56 = vpop.permute.xlu0 %2764 }
 0x1a7   : > { %v2766_v19 = vsel %vm830_vm5, %v2763_v55, %v2765_v56 }
 0x1a8   : > { %v2783_v43 = vsel %vm602_vm4, %v2781_v17, %v2766_v19 }
 0x1a9   : > { %v2307_v54 = vpop.permute.xlu1 %2306 }
 0x1aa   : > { %3533 = vmatpush3.bf16.msra.mxu0 %v2307_v54  ;;  %v2769_v2 = vpop.permute.xlu0 %2768 }
 0x1ab   : > { %3534 = vmatprep.subr.bf16.mxu0 %v3803_v32 }
 0x1ad   : > { %v2771_v30 = vpop.permute.xlu1 %2770 }
 0x1ae   : > { %v2772_v49 = vsel %vm837_vm7, %v2769_v2, %v2771_v30  ;;  %v1052_v44 = vpop.permute.xlu0 %1051  ;;  %v3274_v30 = vld [vmem:[%s4872_s5 + $0x1c] sm:$0xf] }
 0x1af   : > { %v1067_v62 = vsel %vm598_vm3, %v1052_v44, 0  ;;  %v2785_v37 = vsel %vm605_vm6, %v2783_v43, %v2772_v49  ;;  %v3300_v43 = vld [vmem:[%s4872_s5 + $0x50] sm:$0xf] }
 0x1b0   : > { %2789 = vrot.lane.b32.xlu1 %v2785_v37, %s4893_s26  ;;  %3431 = vmatpush3.bf16.msra.mxu1 %v1067_v62 }
 0x1b1   : > { %v2309_v0 = vpop.permute.xlu1 %2308  ;;  %3436 = vmatprep.subr.bf16.mxu1 %v3803_v32 }
 0x1b2   : > { %v2315_v3 = vsel %vm598_vm3, %v2309_v0, 0  ;;  %v2775_v51 = vpop.permute.xlu0 %2774  ;;  %v3276_v0 = vld [vmem:[%s4872_s5 + $0x20] sm:$0xf] }
 0x1b3   : > { %3535 = vmatpush3.bf16.msra.mxu0 %v2315_v3  ;;  %3433 = vmatmul.mubr.msk.bf16.vlgmr.msra.gmra.mrb[0].mxu1 %vm618_vm8, %v3270_v63  ;;  %v3302_v3 = vld [vmem:[%s4872_s5 + $0x54] sm:$0xf] }
 0x1b4   : > { %3540 = vmatprep.subr.bf16.mxu0 %v3803_v32  ;;  %3440 = vmatprep.mubr.msk.bf16.mxu1 %vm3805_vm2, %v3803_v32 }
 0x1b5   : > { %v2777_v47 = vpop.permute.xlu1 %2776 }
 0x1b6   : > { %v2778_v57 = vsel %vm844_vm0, %v2775_v51, %v2777_v47  ;;  %v2861_v4 = vpop.permute.xlu0 %2860  ;;  %3537 = vmatmul.mubr.msk.bf16.vlgmr.msra.gmra.mrb[0].mxu0 %vm618_vm8, %v3296_v48 }
 0x1b7   : > { %2791 = vrot.lane.b32.xlu1 %v2778_v57, %s4893_s26  ;;  %3544 = vmatprep.mubr.msk.bf16.mxu0 %vm3805_vm2, %v3803_v32 }
 0x1b9   : > { %v2863_v8 = vpop.permute.xlu1 %2862 }
 0x1ba   : > { %v2867_v9 = vpop.permute.xlu0 %2866  ;;  %v2864_v15 = vsel %vm823_vm1, %v2861_v4, %v2863_v8  ;;  %v2887_v14 = vsel %vm598_vm3, %v4554_v34, %v2863_v8 }
 0x1bb   : > { %v2884_v18 = vsel %vm598_vm3, %v4455_v7, %v2864_v15 }
 0x1bd   : > { %v2869_v61 = vpop.permute.xlu1 %2868 }
 0x1be   : > { %v1611_v10 = vpop.permute.xlu0 %1610  ;;  %v2870_v13 = vsel %vm830_vm5, %v2867_v9, %v2869_v61  ;;  %v2891_v22 = vsel %vm602_vm4, %v2887_v14, %v2869_v61 }
 0x1bf   : > { %v2889_v25 = vsel %vm602_vm4, %v2884_v18, %v2870_v13  ;;  %v1622_v7 = vsel %vm598_vm3, %v4461_v27, %v1611_v10  ;;  %v3272_v27 = vld [vmem:[%s4872_s5 + $0x18] sm:$0xf] }
 0x1c1   : > { %v2418_v21 = vpop.permute.xlu1 %2417 }
 0x1c2   : > { %v2420_v1 = vpop.permute.xlu0 %2419 }
 0x1c3   : > { %v2425_v59 = vsel %vm975_vm9, %v2418_v21, %v2420_v1  ;;  %v3278_v21 = vld [vmem:[%s4872_s5 + $0x24] sm:$0xf] }
 0x1c4   : > { %3541 = vmatpush3.bf16.msra.mxu0 %v2425_v59  ;;  %v3304_v59 = vld [vmem:[%s4872_s5 + $0x58] sm:$0xf] }
 0x1c5   : > { %v2873_v16 = vpop.permute.xlu1 %2872  ;;  %3542 = vmatprep.subr.bf16.mxu0 %v3803_v32 }
 0x1c6   : > { %v2875_v24 = vpop.permute.xlu0 %2874 }
 0x1c7   : > { %v2876_v11 = vsel %vm837_vm7, %v2873_v16, %v2875_v24  ;;  %v2895_v28 = vsel %vm605_vm6, %v2891_v22, %v2875_v24 }
 0x1c8   : > { %2902 = vrot.lane.b32.xlu1 %v2895_v28, %s4895_s19  ;;  %v2893_v60 = vsel %vm605_vm6, %v2889_v25, %v2876_v11  ;;  %v3280_v25 = vld [vmem:[%s4872_s5 + $0x28] sm:$0xf] }
 0x1c9   : > { %v1148_v34 = vpop.permute.xlu1 %1147  ;;  %2900 = vrot.lane.b32.xlu0 %v2893_v60, %s4895_s19 }
 0x1ca   : > { %3437 = vmatpush3.bf16.msra.mxu1 %v1148_v34  ;;  %v1614_v29 = vpop.permute.xlu0 %1613  ;;  %v3306_v34 = vld [vmem:[%s4872_s5 + $0x5c] sm:$0xf] }
 0x1cb   : > { %3438 = vmatprep.subr.bf16.mxu1 %v3803_v32  ;;  %v1624_v45 = vsel %vm602_vm4, %v1622_v7, %v1614_v29 }
 0x1cd   : > { %v1617_v35 = vpop.permute.xlu1 %1616 }
 0x1ce   : > { %v1626_v38 = vsel %vm605_vm6, %v1624_v45, %v1617_v35  ;;  %v2422_v40 = vpop.permute.xlu0 %2421 }
 0x1cf   : > { %1630 = vrot.lane.b32.xlu0 %v1626_v38, %s4894_s29 }
 0x1d1   : > { %v2424_v41 = vpop.permute.xlu1 %2423 }
 0x1d2   : > { %v2426_v42 = vsel %vm975_vm9, %v2422_v40, %v2424_v41  ;;  %v1150_v50 = vpop.permute.xlu0 %1149 }
 0x1d3   : > { %v2432_v6 = vsel %vm598_vm3, %v2426_v42, 0  ;;  %v1156_v31 = vsel %vm598_vm3, %v1150_v50, 0  ;;  %v3308_v50 = vld [vmem:[%s4872_s5 + $0x60] sm:$0xf] }
 0x1d4   : > { %3439 = vmatpush3.bf16.msra.mxu1 %v1156_v31  ;;  %3543 = vmatpush3.bf16.msra.mxu0 %v2432_v6 }
 0x1d5   : > { %v2878_v5 = vpop.permute.xlu1 %2877  ;;  %3444 = vmatprep.subr.bf16.mxu1 %v3803_v32  ;;  %3548 = vmatprep.subr.bf16.mxu0 %v3803_v32 }
 0x1d6   : > { %v2880_v33 = vpop.permute.xlu0 %2879 }
 0x1d7   : > { %v2881_v52 = vsel %vm844_vm0, %v2878_v5, %v2880_v33  ;;  %2906 = vrot.lane.b32.xlu0 %v2880_v33, %s4895_s19  ;;  %3441 = vmatmul.mubr.msk.bf16.vlgmr.msra.gmra.mrb[0].mxu1 %vm618_vm8, %v3272_v27 }
 0x1d8   : > { %2904 = vrot.lane.b32.xlu1 %v2881_v52, %s4895_s19  ;;  %3545 = vmatmul.mubr.msk.bf16.vlgmr.msra.gmra.mrb[0].mxu0 %vm618_vm8, %v3298_v39  ;;  %s569_s19 = scalar_lea.vmem %s4876_s9, %s3258_s30 }
 0x1d9   : > { %v1619_v53 = vpop.permute.xlu1 %1618  ;;  %3448 = vmatprep.mubr.msk.bf16.mxu1 %vm3805_vm2, %v3803_v32  ;;  %3552 = vmatprep.mubr.msk.bf16.mxu0 %vm3805_vm2, %v3803_v32 }
 0x1da   : > { %v2493_v26 = vpop.permute.xlu0 %2492 }
 0x1db   : > { %v2504_v20 = vsel %vm598_vm3, %v4546_v12, %v2493_v26 }
 0x1dc   : > { %1632 = vrot.lane.b32.xlu1 %v1619_v53, %s4894_s29  ;;  %v3310_v53 = vld [vmem:[%s4873_s6] ss:$0 sm:$0xff] }
 0x1dd   : > { %v2496_v36 = vpop.permute.xlu1 %2495 }
 0x1de   : > { %v2506_v55 = vsel %vm602_vm4, %v2504_v20, %v2496_v36  ;;  %v2499_v56 = vpop.permute.xlu0 %2498 }
 0x1df   : > { %v2508_v54 = vsel %vm605_vm6, %v2506_v55, %v2499_v56 }
 0x1e0   : > { %3549 = vmatpush3.bf16.msra.mxu0 %v2508_v54 }
 0x1e1   : > { %v1237_v58 = vpop.permute.xlu1 %1236  ;;  %3550 = vmatprep.subr.bf16.mxu0 %v3803_v32 }
 0x1e2   : > { %3445 = vmatpush3.bf16.msra.mxu1 %v1237_v58  ;;  %v1239_v46 = vpop.permute.xlu0 %1238 }
 0x1e3   : > { %3446 = vmatprep.subr.bf16.mxu1 %v3803_v32  ;;  %v1245_v2 = vsel %vm598_vm3, %v1239_v46, 0 }
 0x1e5   : > { %v2501_v19 = vpop.permute.xlu1 %2500 }
 0x1e6   : > { %v2516_v12 = vsel %vm598_vm3, %v2501_v19, 0  ;;  %3447 = vmatpush3.bf16.msra.mxu1 %v1245_v2  ;;  %v1341_v17 = vpop.permute.xlu0 %1340 }
 0x1e7   : > { %3551 = vmatpush3.bf16.msra.mxu0 %v2516_v12  ;;  %3452 = vmatprep.subr.bf16.mxu1 %v3803_v32 }
 0x1e8   : > { %3556 = vmatprep.subr.bf16.mxu0 %v3803_v32 }
 0x1e9   : > { %v2597_v49 = vpop.permute.xlu1 %2596  ;;  %3449 = vmatmul.mubr.msk.bf16.vlgmr.msra.gmra.mrb[0].mxu1 %vm618_vm8, %v3274_v30 }
 0x1ea   : > { %3453 = vmatpush3.bf16.msra.mxu1 %v1341_v17  ;;  %v1343_v44 = vpop.permute.xlu0 %1342  ;;  %3553 = vmatmul.mubr.msk.bf16.vlgmr.msra.gmra.mrb[0].mxu0 %vm618_vm8, %v3300_v43 }
 0x1eb   : > { %3557 = vmatpush3.bf16.msra.mxu0 %v2597_v49  ;;  %3454 = vmatprep.subr.bf16.mxu1 %v3803_v32  ;;  %v1349_v62 = vsel %vm598_vm3, %v1343_v44, 0 }
 0x1ec   : > { %3558 = vmatprep.subr.bf16.mxu0 %v3803_v32  ;;  %3456 = vmatprep.mubr.msk.bf16.mxu1 %vm3805_vm2, %v3803_v32 }
 0x1ed   : > { %v2599_v37 = vpop.permute.xlu1 %2598  ;;  %3560 = vmatprep.mubr.msk.bf16.mxu0 %vm3805_vm2, %v3803_v32 }
 0x1ee   : > { %v2605_v63 = vsel %vm598_vm3, %v2599_v37, 0  ;;  %3455 = vmatpush3.bf16.msra.mxu1 %v1349_v62 }
 0x1ef   : > { %3559 = vmatpush3.bf16.msra.mxu0 %v2605_v63  ;;  %3460 = vmatprep.subr.bf16.mxu1 %v3803_v32 }
 0x1f0   : > { %3564 = vmatprep.subr.bf16.mxu0 %v3803_v32 }
 0x1f5   : > { %3457 = vmatmul.mubr.msk.bf16.vlgmr.msra.gmra.mrb[0].mxu1 %vm618_vm8, %v3276_v0 }
 0x1f6   : > { %3561 = vmatmul.mubr.msk.bf16.vlgmr.msra.gmra.mrb[0].mxu0 %vm618_vm8, %v3302_v3  ;;  %3464 = vmatprep.mubr.msk.bf16.mxu1 %vm3805_vm2, %v3803_v32 }
 0x1f7   : > { %3568 = vmatprep.mubr.msk.bf16.mxu0 %vm3805_vm2, %v3803_v32 }
 0x1f9   : > { %v1454_v51 = vpop.permute.xlu1 %1453 }
 0x1fa   : > { %v1452_v48 = vpop.permute.xlu0 %1451 }
 0x1fb   : > { %v1459_v47 = vsel %vm975_vm9, %v1452_v48, %v1454_v51 }
 0x1fc   : > { %3461 = vmatpush3.bf16.msra.mxu1 %v1459_v47 }
 0x1fd   : > { %3462 = vmatprep.subr.bf16.mxu1 %v3803_v32 }
 0x201   : > { %v2686_v57 = vpop.permute.xlu0 %2685 }
 0x202   : > { %3565 = vmatpush3.bf16.msra.mxu0 %v2686_v57 }
 0x203   : > { %3566 = vmatprep.subr.bf16.mxu0 %v3803_v32 }
 0x208   : > { %v1458_v4 = vpop.permute.xlu0 %1457 }
 0x209   : > { %v1456_v8 = vpop.permute.xlu1 %1455 }
 0x20a   : > { %v1460_v9 = vsel %vm975_vm9, %v1456_v8, %v1458_v4 }
 0x20b   : > { %v1466_v61 = vsel %vm598_vm3, %v1460_v9, 0 }
 0x20c   : > { %3463 = vmatpush3.bf16.msra.mxu1 %v1466_v61  ;;  %v1527_v10 = vpop.permute.xlu0 %1526 }
 0x20d   : > { %v2688_v1 = vpop.permute.xlu1 %2687  ;;  %3468 = vmatprep.subr.bf16.mxu1 %v3803_v32  ;;  %v1538_v13 = vsel %vm598_vm3, %v4635_v23, %v1527_v10 }
 0x20e   : > { %v2694_v15 = vsel %vm598_vm3, %v2688_v1, 0 }
 0x20f   : > { %3567 = vmatpush3.bf16.msra.mxu0 %v2694_v15  ;;  %3465 = vmatmul.mubr.msk.bf16.vlgmr.msra.gmra.mrb[0].mxu1 %vm618_vm8, %v3278_v21 }
 0x210   : > { %3572 = vmatprep.subr.bf16.mxu0 %v3803_v32  ;;  %v1533_v14 = vpop.permute.xlu0 %1532  ;;  %3472 = vmatprep.mubr.msk.bf16.mxu1 %vm3805_vm2, %v3803_v32 }
 0x211   : > { %v1530_v16 = vpop.permute.xlu1 %1529 }
 0x212   : > { %3569 = vmatmul.mubr.msk.bf16.vlgmr.msra.gmra.mrb[0].mxu0 %vm618_vm8, %v3304_v59  ;;  %v1540_v18 = vsel %vm602_vm4, %v1538_v13, %v1530_v16 }
 0x213   : > { %v1542_v22 = vsel %vm605_vm6, %v1540_v18, %v1533_v14  ;;  %3576 = vmatprep.mubr.msk.bf16.mxu0 %vm3805_vm2, %v3803_v32 }
 0x214   : > { %v1535_v24 = vpop.permute.xlu0 %1534  ;;  %3469 = vmatpush3.bf16.msra.mxu1 %v1542_v22 }
 0x215   : > { %v1550_v23 = vsel %vm598_vm3, %v1535_v24, 0  ;;  %3470 = vmatprep.subr.bf16.mxu1 %v3803_v32 }
 0x218   : > { %3471 = vmatpush3.bf16.msra.mxu1 %v1550_v23 }
 0x219   : > { %3476 = vmatprep.subr.bf16.mxu1 %v3803_v32 }
 0x21b   : > { %3473 = vmatmul.mubr.msk.bf16.vlgmr.msra.gmra.mrb[0].mxu1 %vm618_vm8, %v3280_v25 }
 0x21c   : > { %3480 = vmatprep.mubr.msk.bf16.mxu1 %vm3805_vm2, %v3803_v32 }
 0x222   : > { %v2790_v11 = vpop.permute.xlu1 %2789 }
 0x223   : > { %3573 = vmatpush3.bf16.msra.mxu0 %v2790_v11 }
 0x224   : > { %3574 = vmatprep.subr.bf16.mxu0 %v3803_v32 }
 0x229   : > { %v2792_v28 = vpop.permute.xlu1 %2791 }
 0x22a   : > { %v2798_v60 = vsel %vm598_vm3, %v2792_v28, 0 }
 0x22b   : > { %3575 = vmatpush3.bf16.msra.mxu0 %v2798_v60 }
 0x22c   : > { %3580 = vmatprep.subr.bf16.mxu0 %v3803_v32 }
 0x22e   : > { %3577 = vmatmul.mubr.msk.bf16.vlgmr.msra.gmra.mrb[0].mxu0 %vm618_vm8, %v3306_v34 }
 0x22f   : > { %3584 = vmatprep.mubr.msk.bf16.mxu0 %vm3805_vm2, %v3803_v32 }
 0x23a   : > { %v2903_v29 = vpop.permute.xlu1 %2902 }
 0x23b   : > { %v2901_v7 = vpop.permute.xlu0 %2900 }
 0x23c   : > { %v2908_v45 = vsel %vm975_vm9, %v2901_v7, %v2903_v29 }
 0x23d   : > { %3581 = vmatpush3.bf16.msra.mxu0 %v2908_v45 }
 0x23e   : > { %3582 = vmatprep.subr.bf16.mxu0 %v3803_v32 }
 0x241   : > { %v1631_v35 = vpop.permute.xlu0 %1630 }
 0x242   : > { %3477 = vmatpush3.bf16.msra.mxu1 %v1631_v35 }
 0x243   : > { %3478 = vmatprep.subr.bf16.mxu1 %v3803_v32  ;;  %v3282_v32 = vld [vmem:[%s4872_s5 + $0x2c] sm:$0xf] }
 0x249   : > { %v2907_v38 = vpop.permute.xlu0 %2906 }
 0x24a   : > { %v2905_v40 = vpop.permute.xlu1 %2904 }
 0x24b   : > { %v2909_v41 = vsel %vm975_vm9, %v2905_v40, %v2907_v38 }
 0x24c   : > { %v2915_v42 = vsel %vm598_vm3, %v2909_v41, 0 }
 0x24d   : > { %3583 = vmatpush3.bf16.msra.mxu0 %v2915_v42 }
 0x24e   : > { %v1633_v6 = vpop.permute.xlu1 %1632 }
 0x24f   : > { %v1639_v31 = vsel %vm598_vm3, %v1633_v6, 0 }
 0x250   : > { %3479 = vmatpush3.bf16.msra.mxu1 %v1639_v31  ;;  %3585 = vmatmul.mubr.msk.bf16.vlgmr.msra.gmra.mrb[0].mxu0 %vm618_vm8, %v3308_v50 }
 0x253   : > { %3481 = vmatmul.mubr.msk.bf16.vlgmr.msra.gmra.mrb[0].mxu1 %vm618_vm8, %v3282_v32 }
 0x323   : > { %v2951_v27 = vpop.f32.mrb[0].mxu0 }
 0x324   : > { %v3586_v5 = vpop.f32.mrb[1].mxu0 }
 0x325   : > { %v2954_v39 = vpop.f32.mrb[2].mxu0 }
 0x326   : > { %v1675_v33 = vpop.f32.mrb[0].mxu1  ;;  %v3587_v52 = vpop.f32.mrb[3].mxu0 }
 0x327   : > { %v3588_v26 = vadd.f32 %v2951_v27, %v1675_v33  ;;  %v3482_v20 = vpop.f32.mrb[1].mxu1 }
 0x328   : > { %v1678_v36 = vpop.f32.mrb[2].mxu1 }
 0x329   : > { %v2958_v55 = vpack.c.bf16 %v3588_v26, %v3588_v26  ;;  %v3483_v56 = vpop.f32.mrb[3].mxu1  ;;  %v2968_v54 = vmul.f32 %v3588_v26, %v3310_v53 }
 0x32b   : > { %v2970_v58 = vsel %vm2969_vm10, %v2968_v54, 0.0  ;;  %v2975_v46 = vmul.f32 %v3588_v26, %v2968_v54  ;;  %2960 = vst.msk [vmem:[%s553_s17] sm:$0x1] %vm2959_vm11, %v2958_v55 }
 0x32c   : > { %2971 = vadd.xlane.f32.xlu0 %v2970_v58 }
 0x32d   : > { %v2976_v2 = vsel %vm2969_vm10, %v2975_v46, 0.0 }
 0x32e   : > { %2977 = vadd.xlane.f32.xlu1 %v2976_v2 }
 0x3b9   : > { %v2972_v19 = vpop.xlane.xlu0 %2971 }
 0x3ba   : > { %2974 = vst.msk [vmem:[%s561_s18] sm:$0x3] %vm2973_vm12, %v2972_v19 }
 0x3bb   : > { %v2978_v12 = vpop.xlane.xlu1 %2977 }
 0x3bc   : > { %2979 = vst.msk [vmem:[%s569_s19] sm:$0x3] %vm2973_vm12, %v2978_v12 }
 0x3bd PF: > { %s20_s13 = sadd.s32 1, %s3795_s13   ;;  %s4897_s30 = smov %s3787_s11 }
 0x3be   : > { %p17_p12 = scmp.ge.s32.totalorder %s20_s13, 18   ;;  %s4898_s10 = smov %s3791_s12 }
 0x3bf   : > { %s4899_s11 = smov %s4902_s14  ;;  %s4900_s12 = smov %s4906_s15 }
 0x3c0   :  { %19 = sbr.rel (!%p17_p12) target bundleno = 3 (0x3), region = 138 }

</bundles_post_ra>
